<compile_context>
chip_gen: v7x
topology: tpu7x:2x2x1
jax: 0.10.0
libtpu: 0.0.40
codegen_flags: <defaults>
</compile_context>

<pallas_src>
import functools
import math

import jax
import jax.numpy as jnp
from jax.experimental import pallas as pl
from jax.experimental.pallas import tpu as pltpu


def _round_up(a, m):
    return (a + m - 1) // m * m


def _vmem_limit_bytes():
    # ~75% of physical VMEM (v5e/v6e: 128 MiB -> 96 MiB, v7x: 64 MiB -> 48 MiB),
    # capped at 100 MiB; catches block-size overshoot at compile time.
    try:
        cap = int(getattr(pltpu.get_tpu_info(), "vmem_capacity_bytes", 128 << 20))
    except Exception:
        cap = 128 << 20
    return min(cap * 3 // 4, 100 << 20)


# ----------------------------------------------------------------------------
# Kernel 1: ConvTranspose2d(kernel=2, stride=2) == one lane-dense matmul
#   o(4*Cout, M) = w(4*Cout, Cin) @ x(Cin, M) + b
# ----------------------------------------------------------------------------
def _convtranspose_kernel(x_ref, w_ref, b_ref, o_ref):
    acc = jnp.dot(w_ref[...], x_ref[...], preferred_element_type=jnp.float32)
    o_ref[...] = (acc + b_ref[...]).astype(o_ref.dtype)


def conv_transpose_2x2_s2_matmul(x_all, w4, b4, *, out_dtype):
    """x_all: (Cin, M), w4: (R=4*Cout, Cin), b4: (R, 1) f32 -> (R, M) in out_dtype."""
    Cin, M = x_all.shape
    R = w4.shape[0]
    TM = min(M, 1024)            # lane tile; ragged edge is masked by Pallas
    TR = min(R, 512)             # output-row tile (matters at real UNet widths)
    # TODO(synk): at Cin >= 1024 add a K grid axis with an f32 VMEM accumulator.
    return pl.pallas_call(
        _convtranspose_kernel,
        out_shape=jax.ShapeDtypeStruct((R, M), out_dtype),
        grid=(pl.cdiv(R, TR), pl.cdiv(M, TM)),
        in_specs=[
            pl.BlockSpec((Cin, TM), lambda r, m: (0, m)),
            pl.BlockSpec((TR, Cin), lambda r, m: (r, 0)),
            pl.BlockSpec((TR, 1), lambda r, m: (r, 0)),
        ],
        out_specs=pl.BlockSpec((TR, TM), lambda r, m: (r, m)),
        compiler_params=pltpu.CompilerParams(
            dimension_semantics=("parallel", "parallel"),
            vmem_limit_bytes=_vmem_limit_bytes()),
    )(x_all, w4, b4)


# ----------------------------------------------------------------------------
# Kernel 2: fused [crop + concat + col-pad] -> [Conv3x3+ReLU] -> [Conv3x3+ReLU],
#           one image per grid step, everything channel-major (C, flat_spatial).
# ----------------------------------------------------------------------------
def _fused_up_block_kernel(up_ref, br_ref, w1_ref, b1_ref, w2_ref, b2_ref, o_ref,
                           pad1_s, pad2_s, *, Hu, Wu, Wp, margin, padlen, dy, dx):
    L = Hu * Wp
    cd = pad1_s.dtype
    Cout = up_ref.shape[1]
    Ci1 = pad1_s.shape[0]
    Co1 = pad2_s.shape[0]

    # Zero ONLY the halo lanes (the top/bottom padding rows the 3x3 taps read), every
    # step.  Kept per-step (not pl.when(first step)) so results stay correct when the
    # 'parallel' batch axis is sharded across TensorCores with per-core scratch.
    pad1_s[:, 0:margin] = jnp.zeros((Ci1, margin), cd)
    pad1_s[:, margin + L:padlen] = jnp.zeros((Ci1, padlen - margin - L), cd)
    pad2_s[:, 0:margin] = jnp.zeros((Co1, margin), cd)
    pad2_s[:, margin + L:padlen] = jnp.zeros((Co1, padlen - margin - L), cd)

    # center-crop(bridge) + channel-concat + per-row column pad, all as VMEM stores:
    # image row y lands at flat lanes [margin + y*Wp, margin + y*Wp + Wp).
    zpad = jnp.zeros((Ci1, Wp - Wu), cd)
    for y in range(Hu):                      # static unroll; fine at these sizes
        off = margin + y * Wp
        pad1_s[0:Cout, off:off + Wu] = up_ref[0, :, y, :].astype(cd)
        pad1_s[Cout:Ci1, off:off + Wu] = br_ref[0, :, dy + y, dx:dx + Wu].astype(cd)
        pad1_s[:, off + Wu:off + Wp] = zpad

    def conv3x3_relu(pad_s, w_ref, b):
        # 9 accumulated MXU dots, one per tap; each LHS weight slice is (Co, Ci) and
        # each RHS is a shifted flat view of the zero-padded image (no im2col).
        acc = None
        t = 0
        for ky in range(3):
            for kx in range(3):
                base = margin - (Wp + 1) + ky * Wp + kx
                d = jnp.dot(w_ref[t], pad_s[:, base:base + L],
                            preferred_element_type=jnp.float32)
                acc = d if acc is None else acc + d
                t += 1
        return jnp.maximum(acc + b, 0.0)

    h = conv3x3_relu(pad1_s, w1_ref, b1_ref[...])             # (Co1, L) f32
    # zero the wrap-around pad columns of conv1's output before it feeds conv2
    lane = jax.lax.broadcasted_iota(jnp.int32, (1, L), 1)
    h = jnp.where((lane % Wp) < Wu, h, 0.0).astype(cd)
    pad2_s[:, margin:margin + L] = h                          # aligned full-lane store

    o_ref[0] = conv3x3_relu(pad2_s, w2_ref, b2_ref[...]).astype(o_ref.dtype)


def fused_up_conv_block(up, bridge, w1, b1, w2, b2, *, Hu, Wu, Wp, dy, dx,
                        compute_dtype, out_dtype):
    """up: (N, Cout, Hu, Wu); bridge: (N, Cb, BH, BW); w1/w2: (9, Co, Ci) tap-major."""
    N, Cout = up.shape[:2]
    Cb = bridge.shape[1]
    Ci1 = Cout + Cb
    _, Co1, K1 = w1.shape
    _, Co2, K2 = w2.shape
    assert K1 == Ci1 and K2 == Co1
    L = Hu * Wp
    margin = _round_up(Wp + 1, 128)          # data starts at a 128-aligned lane offset
    padlen = _round_up(margin + L + Wp + 1, 128)

    kernel = functools.partial(_fused_up_block_kernel, Hu=Hu, Wu=Wu, Wp=Wp,
                               margin=margin, padlen=padlen, dy=dy, dx=dx)
    return pl.pallas_call(
        kernel,
        out_shape=jax.ShapeDtypeStruct((N, Co2, L), out_dtype),
        grid=(N,),
        in_specs=[
            pl.BlockSpec((1, Cout, Hu, Wu), lambda n: (n, 0, 0, 0)),
            pl.BlockSpec((1, Cb, bridge.shape[2], bridge.shape[3]),
                         lambda n: (n, 0, 0, 0)),
            pl.BlockSpec((9, Co1, K1), lambda n: (0, 0, 0)),
            pl.BlockSpec((Co1, 1), lambda n: (0, 0)),
            pl.BlockSpec((9, Co2, K2), lambda n: (0, 0, 0)),
            pl.BlockSpec((Co2, 1), lambda n: (0, 0)),
        ],
        out_specs=pl.BlockSpec((1, Co2, L), lambda n: (n, 0, 0)),
        scratch_shapes=[
            pltpu.VMEM((Ci1, padlen), compute_dtype),   # zero-padded conv1 input
            pltpu.VMEM((Co1, padlen), compute_dtype),   # zero-padded conv2 input
        ],
        compiler_params=pltpu.CompilerParams(
            dimension_semantics=("parallel",),
            vmem_limit_bytes=_vmem_limit_bytes()),
    )(up, bridge, w1.astype(compute_dtype), b1.astype(jnp.float32),
      w2.astype(compute_dtype), b2.astype(jnp.float32))


# ----------------------------------------------------------------------------
# Forward pass (matches UNetUpBlock.forward for up_mode='upconv', batch_norm=False)
# ----------------------------------------------------------------------------
def unet_up_block_forward(x_nchw, bridge_nchw, params, padding=1,
                          compute_dtype=jnp.bfloat16, out_dtype=None):
    assert padding == 1, "only the padding=True configuration is implemented"
    if out_dtype is None:
        out_dtype = compute_dtype
    N, Cin, H, W = x_nchw.shape
    Cout = params["up_w"].shape[1]
    Hu, Wu = 2 * H, 2 * W

    # per-row column pad: >= 2 zero columns AND Hu*Wp a multiple of 128 so the fused
    # kernel's (Co, L) stores are full-lane (unmasked vst).
    step = 128 // math.gcd(Hu, 128)
    Wp = _round_up(Wu + 2, step)

    # --- ConvTranspose2d(k=2, s=2): lane-dense MXU matmul over the whole batch ------
    x_all = jnp.transpose(x_nchw, (1, 0, 2, 3)).reshape(Cin, N * H * W)
    w4 = jnp.transpose(params["up_w"], (2, 3, 1, 0)).reshape(4 * Cout, Cin)
    b4 = jnp.tile(params["up_b"], 4).reshape(4 * Cout, 1).astype(jnp.float32)
    up4 = conv_transpose_2x2_s2_matmul(x_all.astype(compute_dtype),
                                       w4.astype(compute_dtype), b4,
                                       out_dtype=compute_dtype)
    # 2x2 pixel shuffle (XLA glue): (di,dj,co,n,i,j) -> (n,co,2i+di,2j+dj)
    up = up4.reshape(2, 2, Cout, N, H, W).transpose(3, 2, 4, 0, 5, 1)
    up = up.reshape(N, Cout, Hu, Wu)

    # crop offsets; crop + concat + col-pad themselves happen inside the fused kernel
    dy = (bridge_nchw.shape[2] - Hu) // 2
    dx = (bridge_nchw.shape[3] - Wu) // 2

    # weights folded to (9, Co, Ci), taps ordered (ky, kx)
    w1 = jnp.transpose(params["conv1_w"], (2, 3, 0, 1)).reshape(
        9, params["conv1_w"].shape[0], params["conv1_w"].shape[1])
    w2 = jnp.transpose(params["conv2_w"], (2, 3, 0, 1)).reshape(
        9, params["conv2_w"].shape[0], params["conv2_w"].shape[1])

    out_flat = fused_up_conv_block(
        up, bridge_nchw, w1, params["conv1_b"].reshape(-1, 1),
        w2, params["conv2_b"].reshape(-1, 1),
        Hu=Hu, Wu=Wu, Wp=Wp, dy=dy, dx=dx,
        compute_dtype=compute_dtype, out_dtype=out_dtype)

    # drop the per-row pad columns -> NCHW output (no transposes anywhere)
    Co2 = w2.shape[1]
    return out_flat.reshape(N, Co2, Hu, Wp)[:, :, :, :Wu]


# ----------------------------------------------------------------------------
# Pure-JAX reference (mirrors PyTorch semantics)
# ----------------------------------------------------------------------------
def reference_forward(x, bridge, params, padding=1):
    N, Cin, H, W = x.shape
    Cout = params["up_w"].shape[1]
    up = jnp.einsum("ncij,coab->noiajb", x, params["up_w"])
    up = up.reshape(N, Cout, 2 * H, 2 * W) + params["up_b"].reshape(1, Cout, 1, 1)
    dy = (bridge.shape[2] - 2 * H) // 2
    dx = (bridge.shape[3] - 2 * W) // 2
    crop = bridge[:, :, dy:dy + 2 * H, dx:dx + 2 * W]
    out = jnp.concatenate([up, crop], axis=1)

    def conv(z, w, b):
        o = jax.lax.conv_general_dilated(
            z, w, window_strides=(1, 1),
            padding=[(padding, padding), (padding, padding)],
            dimension_numbers=("NCHW", "OIHW", "NCHW"))
        return jnp.maximum(o + b.reshape(1, -1, 1, 1), 0.0)

    out = conv(out, params["conv1_w"], params["conv1_b"])
    out = conv(out, params["conv2_w"], params["conv2_b"])
    return out


# ----------------------------------------------------------------------------
if __name__ == "__main__":
    # Module config: in_size=8, out_size=4, up_mode='upconv', padding=True, batch_norm=False
    in_size, out_size = 8, 4
    N, H, W = 2, 8, 8          # x spatial; up-sampled map is 16x16
    BH, BW = 18, 18            # bridge spatial (center-cropped to 16x16)

    key = jax.random.PRNGKey(0)
    ks = iter(jax.random.split(key, 8))

    x = jax.random.normal(next(ks), (N, in_size, H, W), jnp.float32)
    bridge = jax.random.normal(next(ks), (N, in_size - out_size, BH, BW), jnp.float32)

    params = {
        # ConvTranspose2d(in_size, out_size, 2, stride=2): weight (Cin, Cout, 2, 2)
        "up_w": 0.1 * jax.random.normal(next(ks), (in_size, out_size, 2, 2), jnp.float32),
        "up_b": 0.1 * jax.random.normal(next(ks), (out_size,), jnp.float32),
        # Conv2d(in_size, out_size, 3, padding=1): weight (Cout, Cin, 3, 3)
        "conv1_w": 0.1 * jax.random.normal(next(ks), (out_size, in_size, 3, 3), jnp.float32),
        "conv1_b": 0.1 * jax.random.normal(next(ks), (out_size,), jnp.float32),
        # Conv2d(out_size, out_size, 3, padding=1)
        "conv2_w": 0.1 * jax.random.normal(next(ks), (out_size, out_size, 3, 3), jnp.float32),
        "conv2_b": 0.1 * jax.random.normal(next(ks), (out_size,), jnp.float32),
    }

    ref = jax.block_until_ready(reference_forward(x, bridge, params))

    # exactness of the kernel algorithm (f32 operands)
    out_f32 = jax.block_until_ready(
        jax.jit(functools.partial(unet_up_block_forward,
                                  compute_dtype=jnp.float32))(x, bridge, params))
    assert out_f32.shape == (N, out_size, 2 * H, 2 * W), out_f32.shape
    err_f32 = float(jnp.max(jnp.abs(out_f32 - ref)))
    assert jnp.allclose(out_f32, ref, atol=1e-4, rtol=1e-4), err_f32

    # default fast path: bf16 MXU operands / bf16 outputs, f32 accumulation
    out_bf16 = jax.block_until_ready(jax.jit(unet_up_block_forward)(x, bridge, params))
    assert out_bf16.shape == (N, out_size, 2 * H, 2 * W), out_bf16.shape
    err_bf16 = float(jnp.max(jnp.abs(out_bf16.astype(jnp.float32) - ref)))
    assert err_bf16 < 5e-2, err_bf16

    print("KERNEL_OK")
</pallas_src>

<mosaic_0001>
module attributes {stable_mosaic.version = 11 : i64} {
  func.func @_convtranspose_kernel(%arg0: i32, %arg1: i32, %arg2: memref<8x128xf32, #tpu.memory_space<vmem>>, %arg3: memref<16x8xf32, #tpu.memory_space<vmem>>, %arg4: memref<16x1xf32, #tpu.memory_space<vmem>>, %arg5: memref<16x128xf32, #tpu.memory_space<vmem>>) attributes {dimension_semantics = [#tpu.dimension_semantics<parallel>, #tpu.dimension_semantics<parallel>], iteration_bounds = array<i64: 1, 1>, scalar_prefetch = 0 : i64, scratch_operands = 0 : i64, tpu.core_type = #tpu.core_type<tc>, window_params = [{transform_indices = @transform_0, window_bounds = array<i64: 8, 128>}, {transform_indices = @transform_1, window_bounds = array<i64: 16, 8>}, {transform_indices = @transform_2, window_bounds = array<i64: 16, 1>}, {transform_indices = @transform_3, window_bounds = array<i64: 16, 128>}]} {
    %c0 = arith.constant 0 : index
    %c0_0 = arith.constant 0 : index
    %0 = vector.load %arg3[%c0, %c0_0] : memref<16x8xf32, #tpu.memory_space<vmem>>, vector<16x8xf32>
    %c0_1 = arith.constant 0 : index
    %c0_2 = arith.constant 0 : index
    %1 = vector.load %arg2[%c0_1, %c0_2] : memref<8x128xf32, #tpu.memory_space<vmem>>, vector<8x128xf32>
    %cst = arith.constant dense<0.000000e+00> : vector<16x128xf32>
    %2 = tpu.matmul %0, %1, %cst {dimension_numbers = #tpu.dot_dimension_numbers<[1], [0], [0], [1], [0, 0, 1, 1], [], []>} : vector<16x8xf32>, vector<8x128xf32>, vector<16x128xf32> -> vector<16x128xf32>
    %c0_3 = arith.constant 0 : index
    %c0_4 = arith.constant 0 : index
    %3 = vector.load %arg4[%c0_3, %c0_4] : memref<16x1xf32, #tpu.memory_space<vmem>>, vector<16x1xf32>
    %4 = vector.broadcast %3 : vector<16x1xf32> to vector<16x128xf32>
    %5 = arith.addf %2, %4 : vector<16x128xf32>
    %c0_5 = arith.constant 0 : index
    %c0_6 = arith.constant 0 : index
    %6 = vector.load %arg5[%c0_5, %c0_6] : memref<16x128xf32, #tpu.memory_space<vmem>>, vector<16x128xf32>
    tpu.vector_store %arg5[%c0_5, %c0_6], %5 {strides = array<i32>} : memref<16x128xf32, #tpu.memory_space<vmem>>, vector<16x128xf32>,
    return
  }
  func.func @transform_0(%arg0: i32, %arg1: i32) -> (i32, i32) {
    %c0_i32 = arith.constant 0 : i32
    %c0_i32_0 = arith.constant 0 : i32
    return %c0_i32, %arg1 : i32, i32
  }
  func.func @transform_1(%arg0: i32, %arg1: i32) -> (i32, i32) {
    %c0_i32 = arith.constant 0 : i32
    %c0_i32_0 = arith.constant 0 : i32
    return %arg0, %c0_i32 : i32, i32
  }
  func.func @transform_2(%arg0: i32, %arg1: i32) -> (i32, i32) {
    %c0_i32 = arith.constant 0 : i32
    %c0_i32_0 = arith.constant 0 : i32
    return %arg0, %c0_i32 : i32, i32
  }
  func.func @transform_3(%arg0: i32, %arg1: i32) -> (i32, i32) {
    %c0_i32 = arith.constant 0 : i32
    return %arg0, %arg1 : i32, i32
  }
}

module attributes {stable_mosaic.version = 11 : i64} {
  func.func @_fused_up_block_kernel(%arg0: i32, %arg1: memref<1x4x16x16xf32, #tpu.memory_space<vmem>>, %arg2: memref<1x4x18x18xf32, #tpu.memory_space<vmem>>, %arg3: memref<9x4x8xf32, #tpu.memory_space<vmem>>, %arg4: memref<4x1xf32, #tpu.memory_space<vmem>>, %arg5: memref<9x4x4xf32, #tpu.memory_space<vmem>>, %arg6: memref<4x1xf32, #tpu.memory_space<vmem>>, %arg7: memref<1x4x384xf32, #tpu.memory_space<vmem>>, %arg8: memref<8x640xf32, #tpu.memory_space<vmem>>, %arg9: memref<4x640xf32, #tpu.memory_space<vmem>>) attributes {dimension_semantics = [#tpu.dimension_semantics<parallel>], iteration_bounds = array<i64: 2>, scalar_prefetch = 0 : i64, scratch_operands = 2 : i64, tpu.core_type = #tpu.core_type<tc>, window_params = [{transform_indices = @transform_0, window_bounds = array<i64: 1, 4, 16, 16>}, {transform_indices = @transform_1, window_bounds = array<i64: 1, 4, 18, 18>}, {pipeline_mode = #tpu.pipeline_mode<synchronous>, transform_indices = @transform_2, window_bounds = array<i64: 9, 4, 8>}, {pipeline_mode = #tpu.pipeline_mode<synchronous>, transform_indices = @transform_3, window_bounds = array<i64: 4, 1>}, {pipeline_mode = #tpu.pipeline_mode<synchronous>, transform_indices = @transform_4, window_bounds = array<i64: 9, 4, 4>}, {pipeline_mode = #tpu.pipeline_mode<synchronous>, transform_indices = @transform_5, window_bounds = array<i64: 4, 1>}, {transform_indices = @transform_6, window_bounds = array<i64: 1, 4, 384>}]} {
    %cst = arith.constant 0.000000e+00 : f32
    %0 = vector.broadcast %cst : f32 to vector<8x128xf32>
    %c0 = arith.constant 0 : index
    %c0_0 = arith.constant 0 : index
    %1 = vector.load %arg8[%c0, %c0_0] : memref<8x640xf32, #tpu.memory_space<vmem>>, vector<8x128xf32>
    tpu.vector_store %arg8[%c0, %c0_0], %0 {strides = array<i32>} : memref<8x640xf32, #tpu.memory_space<vmem>>, vector<8x128xf32>,
    %cst_1 = arith.constant 0.000000e+00 : f32
    %2 = vector.broadcast %cst_1 : f32 to vector<8x128xf32>
    %c0_2 = arith.constant 0 : index
    %c512 = arith.constant 512 : index
    %3 = vector.load %arg8[%c0_2, %c512] : memref<8x640xf32, #tpu.memory_space<vmem>>, vector<8x128xf32>
    tpu.vector_store %arg8[%c0_2, %c512], %2 {strides = array<i32>} : memref<8x640xf32, #tpu.memory_space<vmem>>, vector<8x128xf32>,
    %cst_3 = arith.constant 0.000000e+00 : f32
    %4 = vector.broadcast %cst_3 : f32 to vector<4x128xf32>
    %c0_4 = arith.constant 0 : index
    %c0_5 = arith.constant 0 : index
    %5 = vector.load %arg9[%c0_4, %c0_5] : memref<4x640xf32, #tpu.memory_space<vmem>>, vector<4x128xf32>
    tpu.vector_store %arg9[%c0_4, %c0_5], %4 {strides = array<i32>} : memref<4x640xf32, #tpu.memory_space<vmem>>, vector<4x128xf32>,
    %cst_6 = arith.constant 0.000000e+00 : f32
    %6 = vector.broadcast %cst_6 : f32 to vector<4x128xf32>
    %c0_7 = arith.constant 0 : index
    %c512_8 = arith.constant 512 : index
    %7 = vector.load %arg9[%c0_7, %c512_8] : memref<4x640xf32, #tpu.memory_space<vmem>>, vector<4x128xf32>
    tpu.vector_store %arg9[%c0_7, %c512_8], %6 {strides = array<i32>} : memref<4x640xf32, #tpu.memory_space<vmem>>, vector<4x128xf32>,
    %cst_9 = arith.constant 0.000000e+00 : f32
    %8 = vector.broadcast %cst_9 : f32 to vector<8x8xf32>
    %c0_10 = arith.constant 0 : index
    %c0_11 = arith.constant 0 : index
    %c0_12 = arith.constant 0 : index
    %c0_13 = arith.constant 0 : index
    %9 = vector.load %arg1[%c0_10, %c0_11, %c0_12, %c0_13] : memref<1x4x16x16xf32, #tpu.memory_space<vmem>>, vector<1x4x1x16xf32>
    %10 = vector.shape_cast %9 : vector<1x4x1x16xf32> to vector<4x16xf32>
    %c0_14 = arith.constant 0 : index
    %c128 = arith.constant 128 : index
    %11 = vector.load %arg8[%c0_14, %c128] : memref<8x640xf32, #tpu.memory_space<vmem>>, vector<4x16xf32>
    tpu.vector_store %arg8[%c0_14, %c128], %10 {strides = array<i32>} : memref<8x640xf32, #tpu.memory_space<vmem>>, vector<4x16xf32>,
    %c0_15 = arith.constant 0 : index
    %c0_16 = arith.constant 0 : index
    %c1 = arith.constant 1 : index
    %c1_17 = arith.constant 1 : index
    %12 = vector.load %arg2[%c0_15, %c0_16, %c1, %c1_17] : memref<1x4x18x18xf32, #tpu.memory_space<vmem>>, vector<1x4x1x16xf32>
    %13 = vector.shape_cast %12 : vector<1x4x1x16xf32> to vector<4x16xf32>
    %c4 = arith.constant 4 : index
    %c128_18 = arith.constant 128 : index
    %14 = vector.load %arg8[%c4, %c128_18] : memref<8x640xf32, #tpu.memory_space<vmem>>, vector<4x16xf32>
    tpu.vector_store %arg8[%c4, %c128_18], %13 {strides = array<i32>} : memref<8x640xf32, #tpu.memory_space<vmem>>, vector<4x16xf32>,
    %c0_19 = arith.constant 0 : index
    %c144 = arith.constant 144 : index
    %15 = vector.load %arg8[%c0_19, %c144] : memref<8x640xf32, #tpu.memory_space<vmem>>, vector<8x8xf32>
    tpu.vector_store %arg8[%c0_19, %c144], %8 {strides = array<i32>} : memref<8x640xf32, #tpu.memory_space<vmem>>, vector<8x8xf32>,
    %c0_20 = arith.constant 0 : index
    %c0_21 = arith.constant 0 : index
    %c1_22 = arith.constant 1 : index
    %c0_23 = arith.constant 0 : index
    %16 = vector.load %arg1[%c0_20, %c0_21, %c1_22, %c0_23] : memref<1x4x16x16xf32, #tpu.memory_space<vmem>>, vector<1x4x1x16xf32>
    %17 = vector.shape_cast %16 : vector<1x4x1x16xf32> to vector<4x16xf32>
    %c0_24 = arith.constant 0 : index
    %c152 = arith.constant 152 : index
    %18 = vector.load %arg8[%c0_24, %c152] : memref<8x640xf32, #tpu.memory_space<vmem>>, vector<4x16xf32>
    tpu.vector_store %arg8[%c0_24, %c152], %17 {strides = array<i32>} : memref<8x640xf32, #tpu.memory_space<vmem>>, vector<4x16xf32>,
    %c0_25 = arith.constant 0 : index
    %c0_26 = arith.constant 0 : index
    %c2 = arith.constant 2 : index
    %c1_27 = arith.constant 1 : index
    %19 = vector.load %arg2[%c0_25, %c0_26, %c2, %c1_27] : memref<1x4x18x18xf32, #tpu.memory_space<vmem>>, vector<1x4x1x16xf32>
    %20 = vector.shape_cast %19 : vector<1x4x1x16xf32> to vector<4x16xf32>
    %c4_28 = arith.constant 4 : index
    %c152_29 = arith.constant 152 : index
    %21 = vector.load %arg8[%c4_28, %c152_29] : memref<8x640xf32, #tpu.memory_space<vmem>>, vector<4x16xf32>
    tpu.vector_store %arg8[%c4_28, %c152_29], %20 {strides = array<i32>} : memref<8x640xf32, #tpu.memory_space<vmem>>, vector<4x16xf32>,
    %c0_30 = arith.constant 0 : index
    %c168 = arith.constant 168 : index
    %22 = vector.load %arg8[%c0_30, %c168] : memref<8x640xf32, #tpu.memory_space<vmem>>, vector<8x8xf32>
    tpu.vector_store %arg8[%c0_30, %c168], %8 {strides = array<i32>} : memref<8x640xf32, #tpu.memory_space<vmem>>, vector<8x8xf32>,
    %c0_31 = arith.constant 0 : index
    %c0_32 = arith.constant 0 : index
    %c2_33 = arith.constant 2 : index
    %c0_34 = arith.constant 0 : index
    %23 = vector.load %arg1[%c0_31, %c0_32, %c2_33, %c0_34] : memref<1x4x16x16xf32, #tpu.memory_space<vmem>>, vector<1x4x1x16xf32>
    %24 = vector.shape_cast %23 : vector<1x4x1x16xf32> to vector<4x16xf32>
    %c0_35 = arith.constant 0 : index
    %c176 = arith.constant 176 : index
    %25 = vector.load %arg8[%c0_35, %c176] : memref<8x640xf32, #tpu.memory_space<vmem>>, vector<4x16xf32>
    tpu.vector_store %arg8[%c0_35, %c176], %24 {strides = array<i32>} : memref<8x640xf32, #tpu.memory_space<vmem>>, vector<4x16xf32>,
    %c0_36 = arith.constant 0 : index
    %c0_37 = arith.constant 0 : index
    %c3 = arith.constant 3 : index
    %c1_38 = arith.constant 1 : index
    %26 = vector.load %arg2[%c0_36, %c0_37, %c3, %c1_38] : memref<1x4x18x18xf32, #tpu.memory_space<vmem>>, vector<1x4x1x16xf32>
    %27 = vector.shape_cast %26 : vector<1x4x1x16xf32> to vector<4x16xf32>
    %c4_39 = arith.constant 4 : index
    %c176_40 = arith.constant 176 : index
    %28 = vector.load %arg8[%c4_39, %c176_40] : memref<8x640xf32, #tpu.memory_space<vmem>>, vector<4x16xf32>
    tpu.vector_store %arg8[%c4_39, %c176_40], %27 {strides = array<i32>} : memref<8x640xf32, #tpu.memory_space<vmem>>, vector<4x16xf32>,
    %c0_41 = arith.constant 0 : index
    %c192 = arith.constant 192 : index
    %29 = vector.load %arg8[%c0_41, %c192] : memref<8x640xf32, #tpu.memory_space<vmem>>, vector<8x8xf32>
    tpu.vector_store %arg8[%c0_41, %c192], %8 {strides = array<i32>} : memref<8x640xf32, #tpu.memory_space<vmem>>, vector<8x8xf32>,
    %c0_42 = arith.constant 0 : index
    %c0_43 = arith.constant 0 : index
    %c3_44 = arith.constant 3 : index
    %c0_45 = arith.constant 0 : index
    %30 = vector.load %arg1[%c0_42, %c0_43, %c3_44, %c0_45] : memref<1x4x16x16xf32, #tpu.memory_space<vmem>>, vector<1x4x1x16xf32>
    %31 = vector.shape_cast %30 : vector<1x4x1x16xf32> to vector<4x16xf32>
    %c0_46 = arith.constant 0 : index
    %c200 = arith.constant 200 : index
    %32 = vector.load %arg8[%c0_46, %c200] : memref<8x640xf32, #tpu.memory_space<vmem>>, vector<4x16xf32>
    tpu.vector_store %arg8[%c0_46, %c200], %31 {strides = array<i32>} : memref<8x640xf32, #tpu.memory_space<vmem>>, vector<4x16xf32>,
    %c0_47 = arith.constant 0 : index
    %c0_48 = arith.constant 0 : index
    %c4_49 = arith.constant 4 : index
    %c1_50 = arith.constant 1 : index
    %33 = vector.load %arg2[%c0_47, %c0_48, %c4_49, %c1_50] : memref<1x4x18x18xf32, #tpu.memory_space<vmem>>, vector<1x4x1x16xf32>
    %34 = vector.shape_cast %33 : vector<1x4x1x16xf32> to vector<4x16xf32>
    %c4_51 = arith.constant 4 : index
    %c200_52 = arith.constant 200 : index
    %35 = vector.load %arg8[%c4_51, %c200_52] : memref<8x640xf32, #tpu.memory_space<vmem>>, vector<4x16xf32>
    tpu.vector_store %arg8[%c4_51, %c200_52], %34 {strides = array<i32>} : memref<8x640xf32, #tpu.memory_space<vmem>>, vector<4x16xf32>,
    %c0_53 = arith.constant 0 : index
    %c216 = arith.constant 216 : index
    %36 = vector.load %arg8[%c0_53, %c216] : memref<8x640xf32, #tpu.memory_space<vmem>>, vector<8x8xf32>
    tpu.vector_store %arg8[%c0_53, %c216], %8 {strides = array<i32>} : memref<8x640xf32, #tpu.memory_space<vmem>>, vector<8x8xf32>,
    %c0_54 = arith.constant 0 : index
    %c0_55 = arith.constant 0 : index
    %c4_56 = arith.constant 4 : index
    %c0_57 = arith.constant 0 : index
    %37 = vector.load %arg1[%c0_54, %c0_55, %c4_56, %c0_57] : memref<1x4x16x16xf32, #tpu.memory_space<vmem>>, vector<1x4x1x16xf32>
    %38 = vector.shape_cast %37 : vector<1x4x1x16xf32> to vector<4x16xf32>
    %c0_58 = arith.constant 0 : index
    %c224 = arith.constant 224 : index
    %39 = vector.load %arg8[%c0_58, %c224] : memref<8x640xf32, #tpu.memory_space<vmem>>, vector<4x16xf32>
    tpu.vector_store %arg8[%c0_58, %c224], %38 {strides = array<i32>} : memref<8x640xf32, #tpu.memory_space<vmem>>, vector<4x16xf32>,
    %c0_59 = arith.constant 0 : index
    %c0_60 = arith.constant 0 : index
    %c5 = arith.constant 5 : index
    %c1_61 = arith.constant 1 : index
    %40 = vector.load %arg2[%c0_59, %c0_60, %c5, %c1_61] : memref<1x4x18x18xf32, #tpu.memory_space<vmem>>, vector<1x4x1x16xf32>
    %41 = vector.shape_cast %40 : vector<1x4x1x16xf32> to vector<4x16xf32>
    %c4_62 = arith.constant 4 : index
    %c224_63 = arith.constant 224 : index
    %42 = vector.load %arg8[%c4_62, %c224_63] : memref<8x640xf32, #tpu.memory_space<vmem>>, vector<4x16xf32>
    tpu.vector_store %arg8[%c4_62, %c224_63], %41 {strides = array<i32>} : memref<8x640xf32, #tpu.memory_space<vmem>>, vector<4x16xf32>,
    %c0_64 = arith.constant 0 : index
    %c240 = arith.constant 240 : index
    %43 = vector.load %arg8[%c0_64, %c240] : memref<8x640xf32, #tpu.memory_space<vmem>>, vector<8x8xf32>
    tpu.vector_store %arg8[%c0_64, %c240], %8 {strides = array<i32>} : memref<8x640xf32, #tpu.memory_space<vmem>>, vector<8x8xf32>,
    %c0_65 = arith.constant 0 : index
    %c0_66 = arith.constant 0 : index
    %c5_67 = arith.constant 5 : index
    %c0_68 = arith.constant 0 : index
    %44 = vector.load %arg1[%c0_65, %c0_66, %c5_67, %c0_68] : memref<1x4x16x16xf32, #tpu.memory_space<vmem>>, vector<1x4x1x16xf32>
    %45 = vector.shape_cast %44 : vector<1x4x1x16xf32> to vector<4x16xf32>
    %c0_69 = arith.constant 0 : index
    %c248 = arith.constant 248 : index
    %46 = vector.load %arg8[%c0_69, %c248] : memref<8x640xf32, #tpu.memory_space<vmem>>, vector<4x16xf32>
    tpu.vector_store %arg8[%c0_69, %c248], %45 {strides = array<i32>} : memref<8x640xf32, #tpu.memory_space<vmem>>, vector<4x16xf32>,
    %c0_70 = arith.constant 0 : index
    %c0_71 = arith.constant 0 : index
    %c6 = arith.constant 6 : index
    %c1_72 = arith.constant 1 : index
    %47 = vector.load %arg2[%c0_70, %c0_71, %c6, %c1_72] : memref<1x4x18x18xf32, #tpu.memory_space<vmem>>, vector<1x4x1x16xf32>
    %48 = vector.shape_cast %47 : vector<1x4x1x16xf32> to vector<4x16xf32>
    %c4_73 = arith.constant 4 : index
    %c248_74 = arith.constant 248 : index
    %49 = vector.load %arg8[%c4_73, %c248_74] : memref<8x640xf32, #tpu.memory_space<vmem>>, vector<4x16xf32>
    tpu.vector_store %arg8[%c4_73, %c248_74], %48 {strides = array<i32>} : memref<8x640xf32, #tpu.memory_space<vmem>>, vector<4x16xf32>,
    %c0_75 = arith.constant 0 : index
    %c264 = arith.constant 264 : index
    %50 = vector.load %arg8[%c0_75, %c264] : memref<8x640xf32, #tpu.memory_space<vmem>>, vector<8x8xf32>
    tpu.vector_store %arg8[%c0_75, %c264], %8 {strides = array<i32>} : memref<8x640xf32, #tpu.memory_space<vmem>>, vector<8x8xf32>,
    %c0_76 = arith.constant 0 : index
    %c0_77 = arith.constant 0 : index
    %c6_78 = arith.constant 6 : index
    %c0_79 = arith.constant 0 : index
    %51 = vector.load %arg1[%c0_76, %c0_77, %c6_78, %c0_79] : memref<1x4x16x16xf32, #tpu.memory_space<vmem>>, vector<1x4x1x16xf32>
    %52 = vector.shape_cast %51 : vector<1x4x1x16xf32> to vector<4x16xf32>
    %c0_80 = arith.constant 0 : index
    %c272 = arith.constant 272 : index
    %53 = vector.load %arg8[%c0_80, %c272] : memref<8x640xf32, #tpu.memory_space<vmem>>, vector<4x16xf32>
    tpu.vector_store %arg8[%c0_80, %c272], %52 {strides = array<i32>} : memref<8x640xf32, #tpu.memory_space<vmem>>, vector<4x16xf32>,
    %c0_81 = arith.constant 0 : index
    %c0_82 = arith.constant 0 : index
    %c7 = arith.constant 7 : index
    %c1_83 = arith.constant 1 : index
    %54 = vector.load %arg2[%c0_81, %c0_82, %c7, %c1_83] : memref<1x4x18x18xf32, #tpu.memory_space<vmem>>, vector<1x4x1x16xf32>
    %55 = vector.shape_cast %54 : vector<1x4x1x16xf32> to vector<4x16xf32>
    %c4_84 = arith.constant 4 : index
    %c272_85 = arith.constant 272 : index
    %56 = vector.load %arg8[%c4_84, %c272_85] : memref<8x640xf32, #tpu.memory_space<vmem>>, vector<4x16xf32>
    tpu.vector_store %arg8[%c4_84, %c272_85], %55 {strides = array<i32>} : memref<8x640xf32, #tpu.memory_space<vmem>>, vector<4x16xf32>,
    %c0_86 = arith.constant 0 : index
    %c288 = arith.constant 288 : index
    %57 = vector.load %arg8[%c0_86, %c288] : memref<8x640xf32, #tpu.memory_space<vmem>>, vector<8x8xf32>
    tpu.vector_store %arg8[%c0_86, %c288], %8 {strides = array<i32>} : memref<8x640xf32, #tpu.memory_space<vmem>>, vector<8x8xf32>,
    %c0_87 = arith.constant 0 : index
    %c0_88 = arith.constant 0 : index
    %c7_89 = arith.constant 7 : index
    %c0_90 = arith.constant 0 : index
    %58 = vector.load %arg1[%c0_87, %c0_88, %c7_89, %c0_90] : memref<1x4x16x16xf32, #tpu.memory_space<vmem>>, vector<1x4x1x16xf32>
    %59 = vector.shape_cast %58 : vector<1x4x1x16xf32> to vector<4x16xf32>
    %c0_91 = arith.constant 0 : index
    %c296 = arith.constant 296 : index
    %60 = vector.load %arg8[%c0_91, %c296] : memref<8x640xf32, #tpu.memory_space<vmem>>, vector<4x16xf32>
    tpu.vector_store %arg8[%c0_91, %c296], %59 {strides = array<i32>} : memref<8x640xf32, #tpu.memory_space<vmem>>, vector<4x16xf32>,
    %c0_92 = arith.constant 0 : index
    %c0_93 = arith.constant 0 : index
    %c8 = arith.constant 8 : index
    %c1_94 = arith.constant 1 : index
    %61 = vector.load %arg2[%c0_92, %c0_93, %c8, %c1_94] : memref<1x4x18x18xf32, #tpu.memory_space<vmem>>, vector<1x4x1x16xf32>
    %62 = vector.shape_cast %61 : vector<1x4x1x16xf32> to vector<4x16xf32>
    %c4_95 = arith.constant 4 : index
    %c296_96 = arith.constant 296 : index
    %63 = vector.load %arg8[%c4_95, %c296_96] : memref<8x640xf32, #tpu.memory_space<vmem>>, vector<4x16xf32>
    tpu.vector_store %arg8[%c4_95, %c296_96], %62 {strides = array<i32>} : memref<8x640xf32, #tpu.memory_space<vmem>>, vector<4x16xf32>,
    %c0_97 = arith.constant 0 : index
    %c312 = arith.constant 312 : index
    %64 = vector.load %arg8[%c0_97, %c312] : memref<8x640xf32, #tpu.memory_space<vmem>>, vector<8x8xf32>
    tpu.vector_store %arg8[%c0_97, %c312], %8 {strides = array<i32>} : memref<8x640xf32, #tpu.memory_space<vmem>>, vector<8x8xf32>,
    %c0_98 = arith.constant 0 : index
    %c0_99 = arith.constant 0 : index
    %c8_100 = arith.constant 8 : index
    %c0_101 = arith.constant 0 : index
    %65 = vector.load %arg1[%c0_98, %c0_99, %c8_100, %c0_101] : memref<1x4x16x16xf32, #tpu.memory_space<vmem>>, vector<1x4x1x16xf32>
    %66 = vector.shape_cast %65 : vector<1x4x1x16xf32> to vector<4x16xf32>
    %c0_102 = arith.constant 0 : index
    %c320 = arith.constant 320 : index
    %67 = vector.load %arg8[%c0_102, %c320] : memref<8x640xf32, #tpu.memory_space<vmem>>, vector<4x16xf32>
    tpu.vector_store %arg8[%c0_102, %c320], %66 {strides = array<i32>} : memref<8x640xf32, #tpu.memory_space<vmem>>, vector<4x16xf32>,
    %c0_103 = arith.constant 0 : index
    %c0_104 = arith.constant 0 : index
    %c9 = arith.constant 9 : index
    %c1_105 = arith.constant 1 : index
    %68 = vector.load %arg2[%c0_103, %c0_104, %c9, %c1_105] : memref<1x4x18x18xf32, #tpu.memory_space<vmem>>, vector<1x4x1x16xf32>
    %69 = vector.shape_cast %68 : vector<1x4x1x16xf32> to vector<4x16xf32>
    %c4_106 = arith.constant 4 : index
    %c320_107 = arith.constant 320 : index
    %70 = vector.load %arg8[%c4_106, %c320_107] : memref<8x640xf32, #tpu.memory_space<vmem>>, vector<4x16xf32>
    tpu.vector_store %arg8[%c4_106, %c320_107], %69 {strides = array<i32>} : memref<8x640xf32, #tpu.memory_space<vmem>>, vector<4x16xf32>,
    %c0_108 = arith.constant 0 : index
    %c336 = arith.constant 336 : index
    %71 = vector.load %arg8[%c0_108, %c336] : memref<8x640xf32, #tpu.memory_space<vmem>>, vector<8x8xf32>
    tpu.vector_store %arg8[%c0_108, %c336], %8 {strides = array<i32>} : memref<8x640xf32, #tpu.memory_space<vmem>>, vector<8x8xf32>,
    %c0_109 = arith.constant 0 : index
    %c0_110 = arith.constant 0 : index
    %c9_111 = arith.constant 9 : index
    %c0_112 = arith.constant 0 : index
    %72 = vector.load %arg1[%c0_109, %c0_110, %c9_111, %c0_112] : memref<1x4x16x16xf32, #tpu.memory_space<vmem>>, vector<1x4x1x16xf32>
    %73 = vector.shape_cast %72 : vector<1x4x1x16xf32> to vector<4x16xf32>
    %c0_113 = arith.constant 0 : index
    %c344 = arith.constant 344 : index
    %74 = vector.load %arg8[%c0_113, %c344] : memref<8x640xf32, #tpu.memory_space<vmem>>, vector<4x16xf32>
    tpu.vector_store %arg8[%c0_113, %c344], %73 {strides = array<i32>} : memref<8x640xf32, #tpu.memory_space<vmem>>, vector<4x16xf32>,
    %c0_114 = arith.constant 0 : index
    %c0_115 = arith.constant 0 : index
    %c10 = arith.constant 10 : index
    %c1_116 = arith.constant 1 : index
    %75 = vector.load %arg2[%c0_114, %c0_115, %c10, %c1_116] : memref<1x4x18x18xf32, #tpu.memory_space<vmem>>, vector<1x4x1x16xf32>
    %76 = vector.shape_cast %75 : vector<1x4x1x16xf32> to vector<4x16xf32>
    %c4_117 = arith.constant 4 : index
    %c344_118 = arith.constant 344 : index
    %77 = vector.load %arg8[%c4_117, %c344_118] : memref<8x640xf32, #tpu.memory_space<vmem>>, vector<4x16xf32>
    tpu.vector_store %arg8[%c4_117, %c344_118], %76 {strides = array<i32>} : memref<8x640xf32, #tpu.memory_space<vmem>>, vector<4x16xf32>,
    %c0_119 = arith.constant 0 : index
    %c360 = arith.constant 360 : index
    %78 = vector.load %arg8[%c0_119, %c360] : memref<8x640xf32, #tpu.memory_space<vmem>>, vector<8x8xf32>
    tpu.vector_store %arg8[%c0_119, %c360], %8 {strides = array<i32>} : memref<8x640xf32, #tpu.memory_space<vmem>>, vector<8x8xf32>,
    %c0_120 = arith.constant 0 : index
    %c0_121 = arith.constant 0 : index
    %c10_122 = arith.constant 10 : index
    %c0_123 = arith.constant 0 : index
    %79 = vector.load %arg1[%c0_120, %c0_121, %c10_122, %c0_123] : memref<1x4x16x16xf32, #tpu.memory_space<vmem>>, vector<1x4x1x16xf32>
    %80 = vector.shape_cast %79 : vector<1x4x1x16xf32> to vector<4x16xf32>
    %c0_124 = arith.constant 0 : index
    %c368 = arith.constant 368 : index
    %81 = vector.load %arg8[%c0_124, %c368] : memref<8x640xf32, #tpu.memory_space<vmem>>, vector<4x16xf32>
    tpu.vector_store %arg8[%c0_124, %c368], %80 {strides = array<i32>} : memref<8x640xf32, #tpu.memory_space<vmem>>, vector<4x16xf32>,
    %c0_125 = arith.constant 0 : index
    %c0_126 = arith.constant 0 : index
    %c11 = arith.constant 11 : index
    %c1_127 = arith.constant 1 : index
    %82 = vector.load %arg2[%c0_125, %c0_126, %c11, %c1_127] : memref<1x4x18x18xf32, #tpu.memory_space<vmem>>, vector<1x4x1x16xf32>
    %83 = vector.shape_cast %82 : vector<1x4x1x16xf32> to vector<4x16xf32>
    %c4_128 = arith.constant 4 : index
    %c368_129 = arith.constant 368 : index
    %84 = vector.load %arg8[%c4_128, %c368_129] : memref<8x640xf32, #tpu.memory_space<vmem>>, vector<4x16xf32>
    tpu.vector_store %arg8[%c4_128, %c368_129], %83 {strides = array<i32>} : memref<8x640xf32, #tpu.memory_space<vmem>>, vector<4x16xf32>,
    %c0_130 = arith.constant 0 : index
    %c384 = arith.constant 384 : index
    %85 = vector.load %arg8[%c0_130, %c384] : memref<8x640xf32, #tpu.memory_space<vmem>>, vector<8x8xf32>
    tpu.vector_store %arg8[%c0_130, %c384], %8 {strides = array<i32>} : memref<8x640xf32, #tpu.memory_space<vmem>>, vector<8x8xf32>,
    %c0_131 = arith.constant 0 : index
    %c0_132 = arith.constant 0 : index
    %c11_133 = arith.constant 11 : index
    %c0_134 = arith.constant 0 : index
    %86 = vector.load %arg1[%c0_131, %c0_132, %c11_133, %c0_134] : memref<1x4x16x16xf32, #tpu.memory_space<vmem>>, vector<1x4x1x16xf32>
    %87 = vector.shape_cast %86 : vector<1x4x1x16xf32> to vector<4x16xf32>
    %c0_135 = arith.constant 0 : index
    %c392 = arith.constant 392 : index
    %88 = vector.load %arg8[%c0_135, %c392] : memref<8x640xf32, #tpu.memory_space<vmem>>, vector<4x16xf32>
    tpu.vector_store %arg8[%c0_135, %c392], %87 {strides = array<i32>} : memref<8x640xf32, #tpu.memory_space<vmem>>, vector<4x16xf32>,
    %c0_136 = arith.constant 0 : index
    %c0_137 = arith.constant 0 : index
    %c12 = arith.constant 12 : index
    %c1_138 = arith.constant 1 : index
    %89 = vector.load %arg2[%c0_136, %c0_137, %c12, %c1_138] : memref<1x4x18x18xf32, #tpu.memory_space<vmem>>, vector<1x4x1x16xf32>
    %90 = vector.shape_cast %89 : vector<1x4x1x16xf32> to vector<4x16xf32>
    %c4_139 = arith.constant 4 : index
    %c392_140 = arith.constant 392 : index
    %91 = vector.load %arg8[%c4_139, %c392_140] : memref<8x640xf32, #tpu.memory_space<vmem>>, vector<4x16xf32>
    tpu.vector_store %arg8[%c4_139, %c392_140], %90 {strides = array<i32>} : memref<8x640xf32, #tpu.memory_space<vmem>>, vector<4x16xf32>,
    %c0_141 = arith.constant 0 : index
    %c408 = arith.constant 408 : index
    %92 = vector.load %arg8[%c0_141, %c408] : memref<8x640xf32, #tpu.memory_space<vmem>>, vector<8x8xf32>
    tpu.vector_store %arg8[%c0_141, %c408], %8 {strides = array<i32>} : memref<8x640xf32, #tpu.memory_space<vmem>>, vector<8x8xf32>,
    %c0_142 = arith.constant 0 : index
    %c0_143 = arith.constant 0 : index
    %c12_144 = arith.constant 12 : index
    %c0_145 = arith.constant 0 : index
    %93 = vector.load %arg1[%c0_142, %c0_143, %c12_144, %c0_145] : memref<1x4x16x16xf32, #tpu.memory_space<vmem>>, vector<1x4x1x16xf32>
    %94 = vector.shape_cast %93 : vector<1x4x1x16xf32> to vector<4x16xf32>
    %c0_146 = arith.constant 0 : index
    %c416 = arith.constant 416 : index
    %95 = vector.load %arg8[%c0_146, %c416] : memref<8x640xf32, #tpu.memory_space<vmem>>, vector<4x16xf32>
    tpu.vector_store %arg8[%c0_146, %c416], %94 {strides = array<i32>} : memref<8x640xf32, #tpu.memory_space<vmem>>, vector<4x16xf32>,
    %c0_147 = arith.constant 0 : index
    %c0_148 = arith.constant 0 : index
    %c13 = arith.constant 13 : index
    %c1_149 = arith.constant 1 : index
    %96 = vector.load %arg2[%c0_147, %c0_148, %c13, %c1_149] : memref<1x4x18x18xf32, #tpu.memory_space<vmem>>, vector<1x4x1x16xf32>
    %97 = vector.shape_cast %96 : vector<1x4x1x16xf32> to vector<4x16xf32>
    %c4_150 = arith.constant 4 : index
    %c416_151 = arith.constant 416 : index
    %98 = vector.load %arg8[%c4_150, %c416_151] : memref<8x640xf32, #tpu.memory_space<vmem>>, vector<4x16xf32>
    tpu.vector_store %arg8[%c4_150, %c416_151], %97 {strides = array<i32>} : memref<8x640xf32, #tpu.memory_space<vmem>>, vector<4x16xf32>,
    %c0_152 = arith.constant 0 : index
    %c432 = arith.constant 432 : index
    %99 = vector.load %arg8[%c0_152, %c432] : memref<8x640xf32, #tpu.memory_space<vmem>>, vector<8x8xf32>
    tpu.vector_store %arg8[%c0_152, %c432], %8 {strides = array<i32>} : memref<8x640xf32, #tpu.memory_space<vmem>>, vector<8x8xf32>,
    %c0_153 = arith.constant 0 : index
    %c0_154 = arith.constant 0 : index
    %c13_155 = arith.constant 13 : index
    %c0_156 = arith.constant 0 : index
    %100 = vector.load %arg1[%c0_153, %c0_154, %c13_155, %c0_156] : memref<1x4x16x16xf32, #tpu.memory_space<vmem>>, vector<1x4x1x16xf32>
    %101 = vector.shape_cast %100 : vector<1x4x1x16xf32> to vector<4x16xf32>
    %c0_157 = arith.constant 0 : index
    %c440 = arith.constant 440 : index
    %102 = vector.load %arg8[%c0_157, %c440] : memref<8x640xf32, #tpu.memory_space<vmem>>, vector<4x16xf32>
    tpu.vector_store %arg8[%c0_157, %c440], %101 {strides = array<i32>} : memref<8x640xf32, #tpu.memory_space<vmem>>, vector<4x16xf32>,
    %c0_158 = arith.constant 0 : index
    %c0_159 = arith.constant 0 : index
    %c14 = arith.constant 14 : index
    %c1_160 = arith.constant 1 : index
    %103 = vector.load %arg2[%c0_158, %c0_159, %c14, %c1_160] : memref<1x4x18x18xf32, #tpu.memory_space<vmem>>, vector<1x4x1x16xf32>
    %104 = vector.shape_cast %103 : vector<1x4x1x16xf32> to vector<4x16xf32>
    %c4_161 = arith.constant 4 : index
    %c440_162 = arith.constant 440 : index
    %105 = vector.load %arg8[%c4_161, %c440_162] : memref<8x640xf32, #tpu.memory_space<vmem>>, vector<4x16xf32>
    tpu.vector_store %arg8[%c4_161, %c440_162], %104 {strides = array<i32>} : memref<8x640xf32, #tpu.memory_space<vmem>>, vector<4x16xf32>,
    %c0_163 = arith.constant 0 : index
    %c456 = arith.constant 456 : index
    %106 = vector.load %arg8[%c0_163, %c456] : memref<8x640xf32, #tpu.memory_space<vmem>>, vector<8x8xf32>
    tpu.vector_store %arg8[%c0_163, %c456], %8 {strides = array<i32>} : memref<8x640xf32, #tpu.memory_space<vmem>>, vector<8x8xf32>,
    %c0_164 = arith.constant 0 : index
    %c0_165 = arith.constant 0 : index
    %c14_166 = arith.constant 14 : index
    %c0_167 = arith.constant 0 : index
    %107 = vector.load %arg1[%c0_164, %c0_165, %c14_166, %c0_167] : memref<1x4x16x16xf32, #tpu.memory_space<vmem>>, vector<1x4x1x16xf32>
    %108 = vector.shape_cast %107 : vector<1x4x1x16xf32> to vector<4x16xf32>
    %c0_168 = arith.constant 0 : index
    %c464 = arith.constant 464 : index
    %109 = vector.load %arg8[%c0_168, %c464] : memref<8x640xf32, #tpu.memory_space<vmem>>, vector<4x16xf32>
    tpu.vector_store %arg8[%c0_168, %c464], %108 {strides = array<i32>} : memref<8x640xf32, #tpu.memory_space<vmem>>, vector<4x16xf32>,
    %c0_169 = arith.constant 0 : index
    %c0_170 = arith.constant 0 : index
    %c15 = arith.constant 15 : index
    %c1_171 = arith.constant 1 : index
    %110 = vector.load %arg2[%c0_169, %c0_170, %c15, %c1_171] : memref<1x4x18x18xf32, #tpu.memory_space<vmem>>, vector<1x4x1x16xf32>
    %111 = vector.shape_cast %110 : vector<1x4x1x16xf32> to vector<4x16xf32>
    %c4_172 = arith.constant 4 : index
    %c464_173 = arith.constant 464 : index
    %112 = vector.load %arg8[%c4_172, %c464_173] : memref<8x640xf32, #tpu.memory_space<vmem>>, vector<4x16xf32>
    tpu.vector_store %arg8[%c4_172, %c464_173], %111 {strides = array<i32>} : memref<8x640xf32, #tpu.memory_space<vmem>>, vector<4x16xf32>,
    %c0_174 = arith.constant 0 : index
    %c480 = arith.constant 480 : index
    %113 = vector.load %arg8[%c0_174, %c480] : memref<8x640xf32, #tpu.memory_space<vmem>>, vector<8x8xf32>
    tpu.vector_store %arg8[%c0_174, %c480], %8 {strides = array<i32>} : memref<8x640xf32, #tpu.memory_space<vmem>>, vector<8x8xf32>,
    %c0_175 = arith.constant 0 : index
    %c0_176 = arith.constant 0 : index
    %c15_177 = arith.constant 15 : index
    %c0_178 = arith.constant 0 : index
    %114 = vector.load %arg1[%c0_175, %c0_176, %c15_177, %c0_178] : memref<1x4x16x16xf32, #tpu.memory_space<vmem>>, vector<1x4x1x16xf32>
    %115 = vector.shape_cast %114 : vector<1x4x1x16xf32> to vector<4x16xf32>
    %c0_179 = arith.constant 0 : index
    %c488 = arith.constant 488 : index
    %116 = vector.load %arg8[%c0_179, %c488] : memref<8x640xf32, #tpu.memory_space<vmem>>, vector<4x16xf32>
    tpu.vector_store %arg8[%c0_179, %c488], %115 {strides = array<i32>} : memref<8x640xf32, #tpu.memory_space<vmem>>, vector<4x16xf32>,
    %c0_180 = arith.constant 0 : index
    %c0_181 = arith.constant 0 : index
    %c16 = arith.constant 16 : index
    %c1_182 = arith.constant 1 : index
    %117 = vector.load %arg2[%c0_180, %c0_181, %c16, %c1_182] : memref<1x4x18x18xf32, #tpu.memory_space<vmem>>, vector<1x4x1x16xf32>
    %118 = vector.shape_cast %117 : vector<1x4x1x16xf32> to vector<4x16xf32>
    %c4_183 = arith.constant 4 : index
    %c488_184 = arith.constant 488 : index
    %119 = vector.load %arg8[%c4_183, %c488_184] : memref<8x640xf32, #tpu.memory_space<vmem>>, vector<4x16xf32>
    tpu.vector_store %arg8[%c4_183, %c488_184], %118 {strides = array<i32>} : memref<8x640xf32, #tpu.memory_space<vmem>>, vector<4x16xf32>,
    %c0_185 = arith.constant 0 : index
    %c504 = arith.constant 504 : index
    %120 = vector.load %arg8[%c0_185, %c504] : memref<8x640xf32, #tpu.memory_space<vmem>>, vector<8x8xf32>
    tpu.vector_store %arg8[%c0_185, %c504], %8 {strides = array<i32>} : memref<8x640xf32, #tpu.memory_space<vmem>>, vector<8x8xf32>,
    %c0_186 = arith.constant 0 : index
    %c0_187 = arith.constant 0 : index
    %121 = vector.load %arg4[%c0_186, %c0_187] : memref<4x1xf32, #tpu.memory_space<vmem>>, vector<4x1xf32>
    %c0_188 = arith.constant 0 : index
    %c0_189 = arith.constant 0 : index
    %c0_190 = arith.constant 0 : index
    %122 = vector.load %arg3[%c0_188, %c0_189, %c0_190] : memref<9x4x8xf32, #tpu.memory_space<vmem>>, vector<1x4x8xf32>
    %123 = vector.shape_cast %122 : vector<1x4x8xf32> to vector<4x8xf32>
    %c0_191 = arith.constant 0 : index
    %c103 = arith.constant 103 : index
    %124 = vector.load %arg8[%c0_191, %c103] : memref<8x640xf32, #tpu.memory_space<vmem>>, vector<8x384xf32>
    %cst_192 = arith.constant dense<0.000000e+00> : vector<4x384xf32>
    %125 = tpu.matmul %123, %124, %cst_192 {dimension_numbers = #tpu.dot_dimension_numbers<[1], [0], [0], [1], [0, 0, 1, 1], [], []>} : vector<4x8xf32>, vector<8x384xf32>, vector<4x384xf32> -> vector<4x384xf32>
    %c1_193 = arith.constant 1 : index
    %c0_194 = arith.constant 0 : index
    %c0_195 = arith.constant 0 : index
    %126 = vector.load %arg3[%c1_193, %c0_194, %c0_195] : memref<9x4x8xf32, #tpu.memory_space<vmem>>, vector<1x4x8xf32>
    %127 = vector.shape_cast %126 : vector<1x4x8xf32> to vector<4x8xf32>
    %c0_196 = arith.constant 0 : index
    %c104 = arith.constant 104 : index
    %128 = vector.load %arg8[%c0_196, %c104] : memref<8x640xf32, #tpu.memory_space<vmem>>, vector<8x384xf32>
    %cst_197 = arith.constant dense<0.000000e+00> : vector<4x384xf32>
    %129 = tpu.matmul %127, %128, %cst_197 {dimension_numbers = #tpu.dot_dimension_numbers<[1], [0], [0], [1], [0, 0, 1, 1], [], []>} : vector<4x8xf32>, vector<8x384xf32>, vector<4x384xf32> -> vector<4x384xf32>
    %130 = arith.addf %125, %129 : vector<4x384xf32>
    %c2_198 = arith.constant 2 : index
    %c0_199 = arith.constant 0 : index
    %c0_200 = arith.constant 0 : index
    %131 = vector.load %arg3[%c2_198, %c0_199, %c0_200] : memref<9x4x8xf32, #tpu.memory_space<vmem>>, vector<1x4x8xf32>
    %132 = vector.shape_cast %131 : vector<1x4x8xf32> to vector<4x8xf32>
    %c0_201 = arith.constant 0 : index
    %c105 = arith.constant 105 : index
    %133 = vector.load %arg8[%c0_201, %c105] : memref<8x640xf32, #tpu.memory_space<vmem>>, vector<8x384xf32>
    %cst_202 = arith.constant dense<0.000000e+00> : vector<4x384xf32>
    %134 = tpu.matmul %132, %133, %cst_202 {dimension_numbers = #tpu.dot_dimension_numbers<[1], [0], [0], [1], [0, 0, 1, 1], [], []>} : vector<4x8xf32>, vector<8x384xf32>, vector<4x384xf32> -> vector<4x384xf32>
    %135 = arith.addf %130, %134 : vector<4x384xf32>
    %c3_203 = arith.constant 3 : index
    %c0_204 = arith.constant 0 : index
    %c0_205 = arith.constant 0 : index
    %136 = vector.load %arg3[%c3_203, %c0_204, %c0_205] : memref<9x4x8xf32, #tpu.memory_space<vmem>>, vector<1x4x8xf32>
    %137 = vector.shape_cast %136 : vector<1x4x8xf32> to vector<4x8xf32>
    %c0_206 = arith.constant 0 : index
    %c127 = arith.constant 127 : index
    %138 = vector.load %arg8[%c0_206, %c127] : memref<8x640xf32, #tpu.memory_space<vmem>>, vector<8x384xf32>
    %cst_207 = arith.constant dense<0.000000e+00> : vector<4x384xf32>
    %139 = tpu.matmul %137, %138, %cst_207 {dimension_numbers = #tpu.dot_dimension_numbers<[1], [0], [0], [1], [0, 0, 1, 1], [], []>} : vector<4x8xf32>, vector<8x384xf32>, vector<4x384xf32> -> vector<4x384xf32>
    %140 = arith.addf %135, %139 : vector<4x384xf32>
    %c4_208 = arith.constant 4 : index
    %c0_209 = arith.constant 0 : index
    %c0_210 = arith.constant 0 : index
    %141 = vector.load %arg3[%c4_208, %c0_209, %c0_210] : memref<9x4x8xf32, #tpu.memory_space<vmem>>, vector<1x4x8xf32>
    %142 = vector.shape_cast %141 : vector<1x4x8xf32> to vector<4x8xf32>
    %c0_211 = arith.constant 0 : index
    %c128_212 = arith.constant 128 : index
    %143 = vector.load %arg8[%c0_211, %c128_212] : memref<8x640xf32, #tpu.memory_space<vmem>>, vector<8x384xf32>
    %cst_213 = arith.constant dense<0.000000e+00> : vector<4x384xf32>
    %144 = tpu.matmul %142, %143, %cst_213 {dimension_numbers = #tpu.dot_dimension_numbers<[1], [0], [0], [1], [0, 0, 1, 1], [], []>} : vector<4x8xf32>, vector<8x384xf32>, vector<4x384xf32> -> vector<4x384xf32>
    %145 = arith.addf %140, %144 : vector<4x384xf32>
    %c5_214 = arith.constant 5 : index
    %c0_215 = arith.constant 0 : index
    %c0_216 = arith.constant 0 : index
    %146 = vector.load %arg3[%c5_214, %c0_215, %c0_216] : memref<9x4x8xf32, #tpu.memory_space<vmem>>, vector<1x4x8xf32>
    %147 = vector.shape_cast %146 : vector<1x4x8xf32> to vector<4x8xf32>
    %c0_217 = arith.constant 0 : index
    %c129 = arith.constant 129 : index
    %148 = vector.load %arg8[%c0_217, %c129] : memref<8x640xf32, #tpu.memory_space<vmem>>, vector<8x384xf32>
    %cst_218 = arith.constant dense<0.000000e+00> : vector<4x384xf32>
    %149 = tpu.matmul %147, %148, %cst_218 {dimension_numbers = #tpu.dot_dimension_numbers<[1], [0], [0], [1], [0, 0, 1, 1], [], []>} : vector<4x8xf32>, vector<8x384xf32>, vector<4x384xf32> -> vector<4x384xf32>
    %150 = arith.addf %145, %149 : vector<4x384xf32>
    %c6_219 = arith.constant 6 : index
    %c0_220 = arith.constant 0 : index
    %c0_221 = arith.constant 0 : index
    %151 = vector.load %arg3[%c6_219, %c0_220, %c0_221] : memref<9x4x8xf32, #tpu.memory_space<vmem>>, vector<1x4x8xf32>
    %152 = vector.shape_cast %151 : vector<1x4x8xf32> to vector<4x8xf32>
    %c0_222 = arith.constant 0 : index
    %c151 = arith.constant 151 : index
    %153 = vector.load %arg8[%c0_222, %c151] : memref<8x640xf32, #tpu.memory_space<vmem>>, vector<8x384xf32>
    %cst_223 = arith.constant dense<0.000000e+00> : vector<4x384xf32>
    %154 = tpu.matmul %152, %153, %cst_223 {dimension_numbers = #tpu.dot_dimension_numbers<[1], [0], [0], [1], [0, 0, 1, 1], [], []>} : vector<4x8xf32>, vector<8x384xf32>, vector<4x384xf32> -> vector<4x384xf32>
    %155 = arith.addf %150, %154 : vector<4x384xf32>
    %c7_224 = arith.constant 7 : index
    %c0_225 = arith.constant 0 : index
    %c0_226 = arith.constant 0 : index
    %156 = vector.load %arg3[%c7_224, %c0_225, %c0_226] : memref<9x4x8xf32, #tpu.memory_space<vmem>>, vector<1x4x8xf32>
    %157 = vector.shape_cast %156 : vector<1x4x8xf32> to vector<4x8xf32>
    %c0_227 = arith.constant 0 : index
    %c152_228 = arith.constant 152 : index
    %158 = vector.load %arg8[%c0_227, %c152_228] : memref<8x640xf32, #tpu.memory_space<vmem>>, vector<8x384xf32>
    %cst_229 = arith.constant dense<0.000000e+00> : vector<4x384xf32>
    %159 = tpu.matmul %157, %158, %cst_229 {dimension_numbers = #tpu.dot_dimension_numbers<[1], [0], [0], [1], [0, 0, 1, 1], [], []>} : vector<4x8xf32>, vector<8x384xf32>, vector<4x384xf32> -> vector<4x384xf32>
    %160 = arith.addf %155, %159 : vector<4x384xf32>
    %c8_230 = arith.constant 8 : index
    %c0_231 = arith.constant 0 : index
    %c0_232 = arith.constant 0 : index
    %161 = vector.load %arg3[%c8_230, %c0_231, %c0_232] : memref<9x4x8xf32, #tpu.memory_space<vmem>>, vector<1x4x8xf32>
    %162 = vector.shape_cast %161 : vector<1x4x8xf32> to vector<4x8xf32>
    %c0_233 = arith.constant 0 : index
    %c153 = arith.constant 153 : index
    %163 = vector.load %arg8[%c0_233, %c153] : memref<8x640xf32, #tpu.memory_space<vmem>>, vector<8x384xf32>
    %cst_234 = arith.constant dense<0.000000e+00> : vector<4x384xf32>
    %164 = tpu.matmul %162, %163, %cst_234 {dimension_numbers = #tpu.dot_dimension_numbers<[1], [0], [0], [1], [0, 0, 1, 1], [], []>} : vector<4x8xf32>, vector<8x384xf32>, vector<4x384xf32> -> vector<4x384xf32>
    %165 = arith.addf %160, %164 : vector<4x384xf32>
    %166 = vector.broadcast %121 : vector<4x1xf32> to vector<4x384xf32>
    %167 = arith.addf %165, %166 : vector<4x384xf32>
    %cst_235 = arith.constant 0.000000e+00 : f32
    %168 = vector.broadcast %cst_235 : f32 to vector<4x384xf32>
    %169 = arith.maximumf %167, %168 : vector<4x384xf32>
    %170 = tpu.iota {dimensions = array<i32: 1>} : vector<1x384xi32>
    %c24_i32 = arith.constant 24 : i32
    %c0_i32 = arith.constant 0 : i32
    %171 = arith.cmpi eq, %c24_i32, %c0_i32 : i32
    %c1_i32 = arith.constant 1 : i32
    %172 = arith.select %171, %c1_i32, %c24_i32 : i32
    %173 = vector.broadcast %172 : i32 to vector<1x384xi32>
    %174 = arith.remsi %170, %173 : vector<1x384xi32>
    %c0_i32_236 = arith.constant 0 : i32
    %175 = vector.broadcast %c0_i32_236 : i32 to vector<1x384xi32>
    %176 = arith.cmpi ne, %174, %175 : vector<1x384xi32>
    %c0_i32_237 = arith.constant 0 : i32
    %177 = vector.broadcast %c0_i32_237 : i32 to vector<1x384xi32>
    %178 = arith.cmpi slt, %174, %177 : vector<1x384xi32>
    %c0_i32_238 = arith.constant 0 : i32
    %179 = arith.cmpi slt, %172, %c0_i32_238 : i32
    %180 = vector.broadcast %179 : i1 to vector<1x384xi1>
    %181 = vector.broadcast %180 : vector<1x384xi1> to vector<1x384xi1>
    %182 = arith.xori %178, %181 : vector<1x384xi1>
    %183 = arith.andi %182, %176 : vector<1x384xi1>
    %184 = vector.broadcast %172 : i32 to vector<1x384xi32>
    %185 = arith.addi %174, %184 : vector<1x384xi32>
    %186 = arith.select %183, %185, %174 : vector<1x384xi1>, vector<1x384xi32>
    %c16_i32 = arith.constant 16 : i32
    %187 = vector.broadcast %c16_i32 : i32 to vector<1x384xi32>
    %188 = arith.cmpi slt, %186, %187 : vector<1x384xi32>
    %cst_239 = arith.constant 0.000000e+00 : f32
    %189 = vector.shape_cast %188 : vector<1x384xi1> to vector<1x384xi1>
    %190 = vector.broadcast %189 : vector<1x384xi1> to vector<4x384xi1>
    %191 = vector.broadcast %cst_239 : f32 to vector<4x384xf32>
    %192 = arith.select %190, %169, %191 : vector<4x384xi1>, vector<4x384xf32>
    %c0_240 = arith.constant 0 : index
    %c128_241 = arith.constant 128 : index
    %193 = vector.load %arg9[%c0_240, %c128_241] : memref<4x640xf32, #tpu.memory_space<vmem>>, vector<4x384xf32>
    tpu.vector_store %arg9[%c0_240, %c128_241], %192 {strides = array<i32>} : memref<4x640xf32, #tpu.memory_space<vmem>>, vector<4x384xf32>,
    %c0_242 = arith.constant 0 : index
    %c0_243 = arith.constant 0 : index
    %194 = vector.load %arg6[%c0_242, %c0_243] : memref<4x1xf32, #tpu.memory_space<vmem>>, vector<4x1xf32>
    %c0_244 = arith.constant 0 : index
    %c0_245 = arith.constant 0 : index
    %c0_246 = arith.constant 0 : index
    %195 = vector.load %arg5[%c0_244, %c0_245, %c0_246] : memref<9x4x4xf32, #tpu.memory_space<vmem>>, vector<1x4x4xf32>
    %196 = vector.shape_cast %195 : vector<1x4x4xf32> to vector<4x4xf32>
    %c0_247 = arith.constant 0 : index
    %c103_248 = arith.constant 103 : index
    %197 = vector.load %arg9[%c0_247, %c103_248] : memref<4x640xf32, #tpu.memory_space<vmem>>, vector<4x384xf32>
    %cst_249 = arith.constant dense<0.000000e+00> : vector<4x384xf32>
    %198 = tpu.matmul %196, %197, %cst_249 {dimension_numbers = #tpu.dot_dimension_numbers<[1], [0], [0], [1], [0, 0, 1, 1], [], []>} : vector<4x4xf32>, vector<4x384xf32>, vector<4x384xf32> -> vector<4x384xf32>
    %c1_250 = arith.constant 1 : index
    %c0_251 = arith.constant 0 : index
    %c0_252 = arith.constant 0 : index
    %199 = vector.load %arg5[%c1_250, %c0_251, %c0_252] : memref<9x4x4xf32, #tpu.memory_space<vmem>>, vector<1x4x4xf32>
    %200 = vector.shape_cast %199 : vector<1x4x4xf32> to vector<4x4xf32>
    %c0_253 = arith.constant 0 : index
    %c104_254 = arith.constant 104 : index
    %201 = vector.load %arg9[%c0_253, %c104_254] : memref<4x640xf32, #tpu.memory_space<vmem>>, vector<4x384xf32>
    %cst_255 = arith.constant dense<0.000000e+00> : vector<4x384xf32>
    %202 = tpu.matmul %200, %201, %cst_255 {dimension_numbers = #tpu.dot_dimension_numbers<[1], [0], [0], [1], [0, 0, 1, 1], [], []>} : vector<4x4xf32>, vector<4x384xf32>, vector<4x384xf32> -> vector<4x384xf32>
    %203 = arith.addf %198, %202 : vector<4x384xf32>
    %c2_256 = arith.constant 2 : index
    %c0_257 = arith.constant 0 : index
    %c0_258 = arith.constant 0 : index
    %204 = vector.load %arg5[%c2_256, %c0_257, %c0_258] : memref<9x4x4xf32, #tpu.memory_space<vmem>>, vector<1x4x4xf32>
    %205 = vector.shape_cast %204 : vector<1x4x4xf32> to vector<4x4xf32>
    %c0_259 = arith.constant 0 : index
    %c105_260 = arith.constant 105 : index
    %206 = vector.load %arg9[%c0_259, %c105_260] : memref<4x640xf32, #tpu.memory_space<vmem>>, vector<4x384xf32>
    %cst_261 = arith.constant dense<0.000000e+00> : vector<4x384xf32>
    %207 = tpu.matmul %205, %206, %cst_261 {dimension_numbers = #tpu.dot_dimension_numbers<[1], [0], [0], [1], [0, 0, 1, 1], [], []>} : vector<4x4xf32>, vector<4x384xf32>, vector<4x384xf32> -> vector<4x384xf32>
    %208 = arith.addf %203, %207 : vector<4x384xf32>
    %c3_262 = arith.constant 3 : index
    %c0_263 = arith.constant 0 : index
    %c0_264 = arith.constant 0 : index
    %209 = vector.load %arg5[%c3_262, %c0_263, %c0_264] : memref<9x4x4xf32, #tpu.memory_space<vmem>>, vector<1x4x4xf32>
    %210 = vector.shape_cast %209 : vector<1x4x4xf32> to vector<4x4xf32>
    %c0_265 = arith.constant 0 : index
    %c127_266 = arith.constant 127 : index
    %211 = vector.load %arg9[%c0_265, %c127_266] : memref<4x640xf32, #tpu.memory_space<vmem>>, vector<4x384xf32>
    %cst_267 = arith.constant dense<0.000000e+00> : vector<4x384xf32>
    %212 = tpu.matmul %210, %211, %cst_267 {dimension_numbers = #tpu.dot_dimension_numbers<[1], [0], [0], [1], [0, 0, 1, 1], [], []>} : vector<4x4xf32>, vector<4x384xf32>, vector<4x384xf32> -> vector<4x384xf32>
    %213 = arith.addf %208, %212 : vector<4x384xf32>
    %c4_268 = arith.constant 4 : index
    %c0_269 = arith.constant 0 : index
    %c0_270 = arith.constant 0 : index
    %214 = vector.load %arg5[%c4_268, %c0_269, %c0_270] : memref<9x4x4xf32, #tpu.memory_space<vmem>>, vector<1x4x4xf32>
    %215 = vector.shape_cast %214 : vector<1x4x4xf32> to vector<4x4xf32>
    %c0_271 = arith.constant 0 : index
    %c128_272 = arith.constant 128 : index
    %216 = vector.load %arg9[%c0_271, %c128_272] : memref<4x640xf32, #tpu.memory_space<vmem>>, vector<4x384xf32>
    %cst_273 = arith.constant dense<0.000000e+00> : vector<4x384xf32>
    %217 = tpu.matmul %215, %216, %cst_273 {dimension_numbers = #tpu.dot_dimension_numbers<[1], [0], [0], [1], [0, 0, 1, 1], [], []>} : vector<4x4xf32>, vector<4x384xf32>, vector<4x384xf32> -> vector<4x384xf32>
    %218 = arith.addf %213, %217 : vector<4x384xf32>
    %c5_274 = arith.constant 5 : index
    %c0_275 = arith.constant 0 : index
    %c0_276 = arith.constant 0 : index
    %219 = vector.load %arg5[%c5_274, %c0_275, %c0_276] : memref<9x4x4xf32, #tpu.memory_space<vmem>>, vector<1x4x4xf32>
    %220 = vector.shape_cast %219 : vector<1x4x4xf32> to vector<4x4xf32>
    %c0_277 = arith.constant 0 : index
    %c129_278 = arith.constant 129 : index
    %221 = vector.load %arg9[%c0_277, %c129_278] : memref<4x640xf32, #tpu.memory_space<vmem>>, vector<4x384xf32>
    %cst_279 = arith.constant dense<0.000000e+00> : vector<4x384xf32>
    %222 = tpu.matmul %220, %221, %cst_279 {dimension_numbers = #tpu.dot_dimension_numbers<[1], [0], [0], [1], [0, 0, 1, 1], [], []>} : vector<4x4xf32>, vector<4x384xf32>, vector<4x384xf32> -> vector<4x384xf32>
    %223 = arith.addf %218, %222 : vector<4x384xf32>
    %c6_280 = arith.constant 6 : index
    %c0_281 = arith.constant 0 : index
    %c0_282 = arith.constant 0 : index
    %224 = vector.load %arg5[%c6_280, %c0_281, %c0_282] : memref<9x4x4xf32, #tpu.memory_space<vmem>>, vector<1x4x4xf32>
    %225 = vector.shape_cast %224 : vector<1x4x4xf32> to vector<4x4xf32>
    %c0_283 = arith.constant 0 : index
    %c151_284 = arith.constant 151 : index
    %226 = vector.load %arg9[%c0_283, %c151_284] : memref<4x640xf32, #tpu.memory_space<vmem>>, vector<4x384xf32>
    %cst_285 = arith.constant dense<0.000000e+00> : vector<4x384xf32>
    %227 = tpu.matmul %225, %226, %cst_285 {dimension_numbers = #tpu.dot_dimension_numbers<[1], [0], [0], [1], [0, 0, 1, 1], [], []>} : vector<4x4xf32>, vector<4x384xf32>, vector<4x384xf32> -> vector<4x384xf32>
    %228 = arith.addf %223, %227 : vector<4x384xf32>
    %c7_286 = arith.constant 7 : index
    %c0_287 = arith.constant 0 : index
    %c0_288 = arith.constant 0 : index
    %229 = vector.load %arg5[%c7_286, %c0_287, %c0_288] : memref<9x4x4xf32, #tpu.memory_space<vmem>>, vector<1x4x4xf32>
    %230 = vector.shape_cast %229 : vector<1x4x4xf32> to vector<4x4xf32>
    %c0_289 = arith.constant 0 : index
    %c152_290 = arith.constant 152 : index
    %231 = vector.load %arg9[%c0_289, %c152_290] : memref<4x640xf32, #tpu.memory_space<vmem>>, vector<4x384xf32>
    %cst_291 = arith.constant dense<0.000000e+00> : vector<4x384xf32>
    %232 = tpu.matmul %230, %231, %cst_291 {dimension_numbers = #tpu.dot_dimension_numbers<[1], [0], [0], [1], [0, 0, 1, 1], [], []>} : vector<4x4xf32>, vector<4x384xf32>, vector<4x384xf32> -> vector<4x384xf32>
    %233 = arith.addf %228, %232 : vector<4x384xf32>
    %c8_292 = arith.constant 8 : index
    %c0_293 = arith.constant 0 : index
    %c0_294 = arith.constant 0 : index
    %234 = vector.load %arg5[%c8_292, %c0_293, %c0_294] : memref<9x4x4xf32, #tpu.memory_space<vmem>>, vector<1x4x4xf32>
    %235 = vector.shape_cast %234 : vector<1x4x4xf32> to vector<4x4xf32>
    %c0_295 = arith.constant 0 : index
    %c153_296 = arith.constant 153 : index
    %236 = vector.load %arg9[%c0_295, %c153_296] : memref<4x640xf32, #tpu.memory_space<vmem>>, vector<4x384xf32>
    %cst_297 = arith.constant dense<0.000000e+00> : vector<4x384xf32>
    %237 = tpu.matmul %235, %236, %cst_297 {dimension_numbers = #tpu.dot_dimension_numbers<[1], [0], [0], [1], [0, 0, 1, 1], [], []>} : vector<4x4xf32>, vector<4x384xf32>, vector<4x384xf32> -> vector<4x384xf32>
    %238 = arith.addf %233, %237 : vector<4x384xf32>
    %239 = vector.broadcast %194 : vector<4x1xf32> to vector<4x384xf32>
    %240 = arith.addf %238, %239 : vector<4x384xf32>
    %cst_298 = arith.constant 0.000000e+00 : f32
    %241 = vector.broadcast %cst_298 : f32 to vector<4x384xf32>
    %242 = arith.maximumf %240, %241 : vector<4x384xf32>
    %c0_299 = arith.constant 0 : index
    %c0_300 = arith.constant 0 : index
    %c0_301 = arith.constant 0 : index
    %243 = vector.load %arg7[%c0_299, %c0_300, %c0_301] : memref<1x4x384xf32, #tpu.memory_space<vmem>>, vector<1x4x384xf32>
    %244 = vector.shape_cast %243 : vector<1x4x384xf32> to vector<4x384xf32>
    %245 = vector.shape_cast %242 : vector<4x384xf32> to vector<1x4x384xf32>
    tpu.vector_store %arg7[%c0_299, %c0_300, %c0_301], %245 {strides = array<i32>} : memref<1x4x384xf32, #tpu.memory_space<vmem>>, vector<1x4x384xf32>,
    return
  }
  func.func @transform_0(%arg0: i32) -> (i32, i32, i32, i32) {
    %c0_i32 = arith.constant 0 : i32
    %c0_i32_0 = arith.constant 0 : i32
    %c0_i32_1 = arith.constant 0 : i32
    %c0_i32_2 = arith.constant 0 : i32
    return %arg0, %c0_i32, %c0_i32_0, %c0_i32_1 : i32, i32, i32, i32
  }
  func.func @transform_1(%arg0: i32) -> (i32, i32, i32, i32) {
    %c0_i32 = arith.constant 0 : i32
    %c0_i32_0 = arith.constant 0 : i32
    %c0_i32_1 = arith.constant 0 : i32
    %c0_i32_2 = arith.constant 0 : i32
    return %arg0, %c0_i32, %c0_i32_0, %c0_i32_1 : i32, i32, i32, i32
  }
  func.func @transform_2(%arg0: i32) -> (i32, i32, i32) {
    %c0_i32 = arith.constant 0 : i32
    %c0_i32_0 = arith.constant 0 : i32
    %c0_i32_1 = arith.constant 0 : i32
    %c0_i32_2 = arith.constant 0 : i32
    return %c0_i32, %c0_i32_0, %c0_i32_1 : i32, i32, i32
  }
  func.func @transform_3(%arg0: i32) -> (i32, i32) {
    %c0_i32 = arith.constant 0 : i32
    %c0_i32_0 = arith.constant 0 : i32
    %c0_i32_1 = arith.constant 0 : i32
    return %c0_i32, %c0_i32_0 : i32, i32
  }
  func.func @transform_4(%arg0: i32) -> (i32, i32, i32) {
    %c0_i32 = arith.constant 0 : i32
    %c0_i32_0 = arith.constant 0 : i32
    %c0_i32_1 = arith.constant 0 : i32
    %c0_i32_2 = arith.constant 0 : i32
    return %c0_i32, %c0_i32_0, %c0_i32_1 : i32, i32, i32
  }
  func.func @transform_5(%arg0: i32) -> (i32, i32) {
    %c0_i32 = arith.constant 0 : i32
    %c0_i32_0 = arith.constant 0 : i32
    %c0_i32_1 = arith.constant 0 : i32
    return %c0_i32, %c0_i32_0 : i32, i32
  }
  func.func @transform_6(%arg0: i32) -> (i32, i32, i32) {
    %c0_i32 = arith.constant 0 : i32
    %c0_i32_0 = arith.constant 0 : i32
    %c0_i32_1 = arith.constant 0 : i32
    return %arg0, %c0_i32, %c0_i32_0 : i32, i32, i32
  }
}

</mosaic_0001>

<bundles_post_ra>
// kernel: tile.8
= control target key start
LH: loop header
LB: loop body
LE: loop exit
PB: predicated region body
PF: predicated region fallthrough
CT: control target
= control target key end

     0   :  { %s22_s0 = inlined_call_operand.vmem [shape: f32[4], index: 0, kind: input, shape index: {}]   ;;  %s23_s1 = inlined_call_operand.vmem [shape: f32[4,4], index: 1, kind: output, shape index: {}]  }
   0x1   :  { %v4_v0 = vld [vmem:[%s22_s0] ss:$0 sm:$0xff] }
   0x2   :  { %5 = vst [vmem:[%s23_s1] sm:$0xf] %v4_v0 }

// kernel: tile.0
= control target key start
LH: loop header
LB: loop body
LE: loop exit
PB: predicated region body
PF: predicated region fallthrough
CT: control target
= control target key end

     0   :  { %s95_s0 = inlined_call_operand.vmem [shape: f32[4,4], index: 0, kind: input, shape index: {}]   ;;  %s96_s1 = inlined_call_operand.hbm [shape: f32[16,1], index: 1, kind: output, shape index: {}]  }
   0x1   :  { %v5_v0 = vld [vmem:[%s95_s0] sm:$0xf] }
   0x2   :  { %6 = vst [vmem:[#allocation2] sm:$0xf] %v5_v0 }
   0x3   :  { %2 = vsyncpa [#allocation1], 0  ;;  %s66_s0 = smov 127   ;;  %s67_s8 = smov 125   ;;  %vm8_vm0 = vcmask 7168  }
   0x4   :  { %s68_s9 = smov 126   ;;  %s69_s10 = smov [#allocation0]  }
   0x5   :  { %s32_s11 = sshll.u32 %s69_s10, 4  ;;  %s33_s11 = int_to_ptr.vmem [resolvable:$true] %s32_s11 }
   0x6   :  { %s42_s12 = scalar_lea.vmem %s33_s11, 256  ;;  %p47_p1 = scmp.lt.s32.totalorder %s33_s11, %s33_s11 }
   0x7   :  { %p43_p0 = scmp.ne.s32.totalorder %s33_s11, %s42_s12  ;;  %p48_p2 = scmp.lt.s32.totalorder %s42_s12, %s42_s12 }
   0x9   :  { %v10_v1 = vld [vmem:[#allocation2] sm:$0xf]   ;;  %p49_p3 = por %p48_p2, %p47_p1 }
   0xa   :  { %v22_v2 = vld [vmem:[#allocation2] sm:$0xf]   ;;  %11 = vrot.lane.b32.xlu0 %v10_v1, %s66_s0 }
   0xb   :  { %23 = vrot.lane.b32.xlu1 %v22_v2, %s67_s8  ;;  %v7_v3 = vld [vmem:[#allocation2] sm:$0xf]   ;;  %p50_p4 = pnand %p49_p3, %p43_p0 }
   0xc   :  { %v16_v4 = vld [vmem:[#allocation2] sm:$0xf]   ;;  %9 = vst.msk [vmem:[#allocation0] ss:$4 sm:$0xf] %vm8_vm0, %v7_v3  }
   0xe   :  { %17 = vrot.lane.b32.xlu0 %v16_v4, %s68_s9 }
  0x7c   :  { %v12_v5 = vpop.permute.xlu0 %11  }
  0x7d   :  { %v24_v6 = vpop.permute.xlu1 %23   ;;  %15 = vst.msk [vmem:[#allocation0 + $0x1] ss:$4 sm:$0xf] %vm8_vm0, %v12_v5  }
  0x7e   :  { %27 = vst.msk [vmem:[#allocation0 + $0x3] ss:$4 sm:$0xf] %vm8_vm0, %v24_v6  }
  0x80   :  { %v18_v7 = vpop.permute.xlu0 %17  }
  0x81   :  { %21 = vst.msk [vmem:[#allocation0 + $0x2] ss:$4 sm:$0xf] %vm8_vm0, %v18_v7  }
  0x82   :  { %53 = shalt.err (!%p50_p4)
}
  0x83   :  { %s54_s15 = scalar_lea.hbm %s96_s1, 256 }
  0x84   :  { %p55_p5 = scmp.ne.s32.totalorder %s96_s1, %s54_s15  ;;  %p58_p6 = scmp.lt.u32.totalorder %s54_s15, %s96_s1 }
  0x86   :  { %p60_p7 = pnand %p58_p6, %p55_p5 }
  0x88   :  { %63 = shalt.err (!%p60_p7)
}
  0x89   :  { %35 = dma.vmem_to_hbm [thread:$0]  %s33_s11, 256, %s96_s1, [#allocation1]  }
  0x8a   :  { %64 = dma.done.wait [#allocation1], 256  }
  0x8b   :  { %65 = vsyncadd [#allocation1], 4294967040 }
  0x8c   :  { %37 = vsyncpa [#allocation1], 1 }

// kernel: unet_up_block_forward.2
= control target key start
LH: loop header
LB: loop body
LE: loop exit
PB: predicated region body
PF: predicated region fallthrough
CT: control target
= control target key end

     0   :  { %8 = vsyncpa [#allocation3], 0  ;;  %s367_s0 = inlined_call_operand.hbm [shape: f32[8,128], index: 0, kind: input, shape index: {}]   ;;  %s368_s1 = inlined_call_operand.hbm [shape: f32[16,8], index: 1, kind: input, shape index: {}]   ;;  %s369_s2 = inlined_call_operand.hbm [shape: f32[16,1], index: 2, kind: input, shape index: {}]   ;;  %s370_s3 = inlined_call_operand.hbm [shape: f32[16,128], index: 3, kind: output, shape index: {}]  }
   0x1   :  { %9 = vsyncpa [#allocation6], 0 }
   0x2   :  { %10 = vsyncpa [#allocation4], 0  ;;  %s283_s12 = smov [#allocation5]   ;;  %s189_s16 = scalar_lea.hbm %s368_s1, 256 }
   0x3   :  { %s26_s13 = sshll.u32 %s283_s12, 4  ;;  %p190_p0 = scmp.ne.s32.totalorder %s368_s1, %s189_s16  ;;  %s27_s13 = int_to_ptr.vmem [resolvable:$true] %s26_s13 }
   0x4   :  { %p193_p1 = scmp.lt.u32.totalorder %s189_s16, %s368_s1 }
   0x6   :  { %p195_p2 = pnand %p193_p1, %p190_p0 }
   0x8   :  { %198 = shalt.err (!%p195_p2)
}
   0x9   :  { %s199_s21 = scalar_lea.vmem %s27_s13, 256  ;;  %p204_p4 = scmp.lt.s32.totalorder %s27_s13, %s27_s13 }
   0xa   :  { %p200_p3 = scmp.ne.s32.totalorder %s27_s13, %s199_s21  ;;  %p205_p5 = scmp.lt.s32.totalorder %s199_s21, %s199_s21 }
   0xc   :  { %p206_p6 = por %p205_p5, %p204_p4 }
   0xe   :  { %p207_p7 = pnand %p206_p6, %p200_p3 }
  0x10   :  { %210 = shalt.err (!%p207_p7)
}
  0x11   :  { %s284_s22 = smov 128   ;;  %s285_s23 = smov 8  }
  0x12   :  { %32 = dma.hbm_to_vmem [thread:$0]  %s368_s1, 256, %s27_s13, [#allocation6], %s284_s22, %s284_s22, %s285_s23  }
  0x13   :  { %s286_s26 = smov [#allocation2]   ;;  %s287_s28 = smov [#allocation7]  }
  0x14   :  { %s17_s27 = sshll.u32 %s286_s26, 4  ;;  %s38_s29 = sshll.u32 %s287_s28, 4  ;;  %s18_s27 = int_to_ptr.vmem [resolvable:$true] %s17_s27  ;;  %s39_s29 = int_to_ptr.vmem [resolvable:$true] %s38_s29 }
  0x15   :  { %s211_s5 = scalar_lea.hbm %s367_s0, 128 }
  0x16   :  { %p212_p8 = scmp.ne.s32.totalorder %s367_s0, %s211_s5  ;;  %p215_p9 = scmp.lt.u32.totalorder %s211_s5, %s367_s0 }
  0x18   :  { %p217_p10 = pnand %p215_p9, %p212_p8 }
  0x1a   :  { %220 = shalt.err (!%p217_p10)
}
  0x1b   :  { %s221_s1 = scalar_lea.vmem %s18_s27, 128  ;;  %p226_p12 = scmp.lt.s32.totalorder %s18_s27, %s18_s27 }
  0x1c   :  { %p222_p11 = scmp.ne.s32.totalorder %s18_s27, %s221_s1  ;;  %p227_p13 = scmp.lt.s32.totalorder %s221_s1, %s221_s1 }
  0x1e   :  { %p228_p0 = por %p227_p13, %p226_p12 }
  0x20   :  { %p229_p1 = pnand %p228_p0, %p222_p11 }
  0x22   :  { %232 = shalt.err (!%p229_p1)
}
  0x23   :  { %20 = dma.hbm_to_vmem [thread:$0]  %s367_s0, 128, %s18_s27, [#allocation3]  }
  0x24   :  { %s233_s14 = scalar_lea.hbm %s369_s2, 256 }
  0x25   :  { %p234_p2 = scmp.ne.s32.totalorder %s369_s2, %s233_s14  ;;  %p237_p3 = scmp.lt.u32.totalorder %s233_s14, %s369_s2 }
  0x27   :  { %p239_p4 = pnand %p237_p3, %p234_p2 }
  0x29   :  { %242 = shalt.err (!%p239_p4)
}
  0x2a   :  { %s243_s19 = scalar_lea.vmem %s39_s29, 256  ;;  %p248_p6 = scmp.lt.s32.totalorder %s39_s29, %s39_s29 }
  0x2b   :  { %p244_p5 = scmp.ne.s32.totalorder %s39_s29, %s243_s19  ;;  %p249_p7 = scmp.lt.s32.totalorder %s243_s19, %s243_s19 }
  0x2d   :  { %p250_p8 = por %p249_p7, %p248_p6 }
  0x2f   :  { %p251_p9 = pnand %p250_p8, %p244_p5 }
  0x31   :  { %254 = shalt.err (!%p251_p9)
}
  0x32   :  { %44 = dma.hbm_to_vmem [thread:$0]  %s369_s2, 256, %s39_s29, [#allocation6], %s284_s22, %s284_s22, %s285_s23  }
  0x33   :  { %277 = dma.done.wait [#allocation3], 128  }
  0x34   :  { %278 = vsyncadd [#allocation3], 4294967168 }
  0x35   :  { %279 = dma.done.wait [#allocation6], 512  }
  0x36   :  { %280 = vsyncadd [#allocation6], 4294966784  ;;  %v288_v0 = vmov 0   ;;  %vm69_vm0 = vcmask 64512   ;;  %v56_v1 = vld [vmem:[#allocation2] sm:$0xff]  ;;  %v54_v2 = vld [vmem:[#allocation5] sm:$0xff] }
  0x37   :  { %188 = vset.pattern.permute.xlu0 %v288_v0  ;;  %v55_v3 = vld [vmem:[#allocation5 + $0x8] sm:$0xff]  ;;  %176 = vmatprep.subr.mxu0 %v56_v1  ;;  %v57_v4 = vld [vmem:[#allocation7] sm:$0xff]  ;;  %v58_v5 = vld [vmem:[#allocation7 + $0x8] sm:$0xff]  ;;  %s289_s2 = smov [#allocation8]  }
  0x38   :  { %178 = vmatprep.mubr.msk.f32.mxu0 %vm69_vm0, %v54_v2  ;;  %177 = vmatpush3.msra.mxu0 %v56_v1  ;;  %s158_s21 = sshll.u32 %s289_s2, 4  ;;  %s159_s21 = int_to_ptr.vmem [resolvable:$true] %s158_s21 }
  0x39   :  { %61 = vperm.xlu0 %188, %v57_v4   ;;  %179 = vmatmul.mubr.msk.f32.vlgmr.msra.gmra.mrb[0].mxu0 %vm69_vm0, %v55_v3  ;;  %s255_s24 = scalar_lea.vmem %s159_s21, 256  ;;  %p260_p11 = scmp.lt.s32.totalorder %s159_s21, %s159_s21 }
  0x3a   :  { %p256_p10 = scmp.ne.s32.totalorder %s159_s21, %s255_s24  ;;  %p261_p12 = scmp.lt.s32.totalorder %s255_s24, %s255_s24 }
  0x3c   :  { %p262_p13 = por %p261_p12, %p260_p11 }
  0x3d   :  { %66 = vperm.xlu0 %188, %v58_v5  }
  0x3e   :  { %p263_p0 = pnand %p262_p13, %p256_p10 }
  0xb8   :  { %v62_v6 = vpop.permute.xlu0 %61 }
  0xbc   :  { %v67_v7 = vpop.permute.xlu0 %66 }
 0x10c   :  { %v180_v8 = vpop.f32.mrb[0].mxu0 }
 0x10d   :  { %v148_v9 = vadd.f32 %v180_v8, %v67_v7  ;;  %v142_v10 = vpop.f32.mrb[1].mxu0 }
 0x10e   :  { %v143_v11 = vadd.f32 %v142_v10, %v62_v6 }
 0x10f   :  { %152 = vst [vmem:[#allocation8 + $0x8] sm:$0xff] %v148_v9 }
 0x110   :  { %151 = vst [vmem:[#allocation8] sm:$0xff] %v143_v11 }
 0x111   :  { %266 = shalt.err (!%p263_p0)
}
 0x112   :  { %s267_s27 = scalar_lea.hbm %s370_s3, 256 }
 0x113   :  { %p268_p1 = scmp.ne.s32.totalorder %s370_s3, %s267_s27  ;;  %p271_p2 = scmp.lt.u32.totalorder %s267_s27, %s370_s3 }
 0x115   :  { %p273_p3 = pnand %p271_p2, %p268_p1 }
 0x117   :  { %276 = shalt.err (!%p273_p3)
}
 0x118   :  { %164 = dma.vmem_to_hbm [thread:$0]  %s159_s21, 256, %s370_s3, [#allocation4], %s284_s22, %s284_s22, %s285_s23  }
 0x119   :  { %281 = dma.done.wait [#allocation4], 256  }
 0x11a   :  { %282 = vsyncadd [#allocation4], 4294967040 }
 0x11b   :  { %168 = vsyncpa [#allocation3], 1 }
 0x11c   :  { %169 = vsyncpa [#allocation6], 1 }
 0x11d   :  { %170 = vsyncpa [#allocation4], 1 }

// kernel: unet_up_block_forward.3
= control target key start
LH: loop header
LB: loop body
LE: loop exit
PB: predicated region body
PF: predicated region fallthrough
CT: control target
= control target key end

     0   :  { %s5915_s0 = inlined_call_operand.hbm [shape: f32[2,4,16,16], index: 0, kind: input, shape index: {}]   ;;  %s5916_s1 = inlined_call_operand.hbm [shape: f32[2,4,18,18], index: 1, kind: input, shape index: {}]   ;;  %s5917_s2 = inlined_call_operand.hbm [shape: f32[9,4,8], index: 2, kind: input, shape index: {}]   ;;  %s5918_s3 = inlined_call_operand.hbm [shape: f32[4,1], index: 3, kind: input, shape index: {}]   ;;  %s5919_s4 = inlined_call_operand.hbm [shape: f32[9,4,4], index: 4, kind: input, shape index: {}]   ;;  %s5920_s5 = inlined_call_operand.hbm [shape: f32[4,1], index: 5, kind: input, shape index: {}]   ;;  %s5921_s6 = inlined_call_operand.hbm [shape: f32[2,4,384], index: 6, kind: output, shape index: {}]  }
   0x1   :  { %5928 = sst [smem:[#allocation22_spill]] %s5915_s0 }
   0x2   :  { %5929 = sst [smem:[#allocation23_spill]] %s5917_s2 }
   0x3   :  { %5930 = sst [smem:[#allocation24_spill]] %s5918_s3 }
   0x4   :  { %5931 = sst [smem:[#allocation25_spill]] %s5919_s4 }
   0x5   :  { %11 = vsyncpa [#allocation5], 0 }
   0x6   :  { %13 = vsyncpa [#allocation5 + $0x1], 0 }
   0x7   :  { %14 = vsyncpa [#allocation8], 0 }
   0x8   :  { %16 = vsyncpa [#allocation8 + $0x1], 0 }
   0x9   :  { %17 = vsyncpa [#allocation11], 0 }
   0xa   :  { %18 = vsyncpa [#allocation14], 0 }
   0xb   :  { %19 = vsyncpa [#allocation6], 0 }
   0xc   :  { %21 = vsyncpa [#allocation6 + $0x1], 0  ;;  %s5005_s21 = smov 0   ;;  %s5007_s22 = smov 0  }
   0xd   :  { %s5009_s23 = smov 0   ;;  %s5011_s24 = smov 0  }
   0xe LB: > { %s5026_s25 = sadd.s32 4294967295, %s4920_s24   ;;  %s4273_s26 = sadd.s32 4294967294, %s4920_s24   ;;  %s4920_s24 = sphi %s5011_s24, %s5967_s24   ;;  %s4916_s23 = sphi %s5009_s23, %s5966_s23   ;;  %s4912_s22 = sphi %s5007_s22, %s5965_s22   ;;  %s4908_s21 = sphi %s5005_s21, %s5964_s21  }
   0xf   : > { %p47_p0 = scmp.ne.s32.totalorder %s4912_s22, %s4908_s21  ;;  %p5922_p1 = scmp.eq.s32.totalorder %s5026_s25, 0 }
  0x10   : > { %p187_p3 = scmp.eq.s32.totalorder %s4273_s26, 1  ;;  %p4274_p5 = scmp.ge.s32.totalorder %s4920_s24, 1 }
  0x11   : > { %p5035_p4 = por %p5922_p1, %p47_p0  ;;  %p194_p7 = scmp.lt.s32.totalorder %s4920_s24, 3 }
  0x12   : > { %p5040_p6 = por %p187_p3, %p47_p0  ;;  %s4922_s30 = smov [#allocation9]  }
  0x13   : > { %s5932_s27 = scalar_select %p5035_p4, 1, 0 }
  0x14   : > { %s5933_s28 = scalar_select %p5040_p6, 1, 0 }
  0x15   : > { %p5045_p8 = pnand %p4274_p5, %p194_p7  ;;  %s206_s7 = sshll.u32 %s4922_s30, 4  ;;  %s5049_s7 = int_to_ptr.vmem [resolvable:$true] %s206_s7 }
  0x16   : > { %s4923_s9 = smov [#allocation10]   ;;  %s4924_s11 = smov [#allocation12]  }
  0x17   : > { %s5934_s29 = scalar_select %p5045_p8, 1, 0 }
  0x18   : > { %p4548_p9 = pneg %p5045_p8  ;;  %s220_s10 = sshll.u32 %s4923_s9, 4  ;;  %s5060_s10 = int_to_ptr.vmem [resolvable:$true] %s220_s10 }
  0x19   : > { %s5062_s12 = sshll.u32 %s4924_s11, 4  ;;  %s5936_s2 = sld [smem:[#allocation23_spill]]  ;;  %s231_s12 = int_to_ptr.vmem [resolvable:$true] %s5062_s12 }
  0x1a   : > { %p5056_p11 = pnand %p4548_p9, %p5922_p1 }
  0x1c   : > { %p5072_p13 = pneg %p5056_p11 }
  0x1f   : > { %s4666_s15 = scalar_lea.hbm %s5936_s2, 576 }
  0x20   : > { %p4667_p12 = scmp.ne.s32.totalorder %s5936_s2, %s4666_s15  ;;  %p4673_p5 = scmp.lt.u32.totalorder %s4666_s15, %s5936_s2 }
  0x22   : > { %p4669_p0 = pnand %p5072_p13, %p4667_p12 }
  0x24   : > { %p4670_p3 = pneg %p4669_p0 }
  0x26   : > { %p4675_p7 = pnand %p4673_p5, %p4670_p3 }
  0x28   : > { %4678 = shalt.err (!%p4675_p7)
}
  0x29   : > { %s4679_s26 = scalar_lea.vmem %s5049_s7, 576  ;;  %p4687_p2 = scmp.lt.s32.totalorder %s5049_s7, %s5049_s7 }
  0x2a   : > { %p4680_p9 = scmp.ne.s32.totalorder %s5049_s7, %s4679_s26  ;;  %p4688_p6 = scmp.lt.s32.totalorder %s4679_s26, %s4679_s26 }
  0x2c   : > { %p4682_p10 = pnand %p4680_p9, %p5072_p13  ;;  %p4689_p12 = por %p4688_p6, %p4687_p2 }
  0x2e   : > { %p4683_p1 = pneg %p4682_p10 }
  0x30   : > { %p4690_p0 = pnand %p4689_p12, %p4683_p1 }
  0x32   : > { %4693 = shalt.err (!%p4690_p0)
}
  0x33   : > { %s4925_s30 = smov 64   ;;  %s4926_s9 = smov 4  }
  0x34   : > { %4551 = dma.hbm_to_vmem [thread:$0]  (!%p5056_p11), %s5936_s2, 576, %s5049_s7, [#allocation8], %s4925_s30, %s4925_s30, %s4926_s9  }
  0x35   : > { %s5938_s3 = sld [smem:[#allocation24_spill]] }
  0x3b   : > { %s4694_s16 = scalar_lea.hbm %s5938_s3, 64 }
  0x3c   : > { %p4695_p1 = scmp.ne.s32.totalorder %s5938_s3, %s4694_s16  ;;  %p4701_p10 = scmp.lt.u32.totalorder %s4694_s16, %s5938_s3 }
  0x3e   : > { %p4697_p2 = pnand %p4695_p1, %p5072_p13 }
  0x40   : > { %p4698_p6 = pneg %p4697_p2 }
  0x42   : > { %p4703_p3 = pnand %p4701_p10, %p4698_p6 }
  0x44   : > { %4706 = shalt.err (!%p4703_p3)
}
  0x45   : > { %s4707_s7 = scalar_lea.vmem %s5060_s10, 64  ;;  %p4715_p12 = scmp.lt.s32.totalorder %s5060_s10, %s5060_s10 }
  0x46   : > { %p4708_p5 = scmp.ne.s32.totalorder %s5060_s10, %s4707_s7  ;;  %p4716_p0 = scmp.lt.s32.totalorder %s4707_s7, %s4707_s7 }
  0x48   : > { %p4710_p7 = pnand %p4708_p5, %p5072_p13  ;;  %p4717_p1 = por %p4716_p0, %p4715_p12 }
  0x4a   : > { %p4711_p9 = pneg %p4710_p7 }
  0x4c   : > { %p4718_p2 = pnand %p4717_p1, %p4711_p9 }
  0x4e   : > { %4721 = shalt.err (!%p4718_p2)
}
  0x4f   : > { %4554 = dma.hbm_to_vmem [thread:$0]  (!%p5056_p11), %s5938_s3, 64, %s5060_s10, [#allocation11]  }
  0x50   : > { %s5939_s4 = sld [smem:[#allocation25_spill]] }
  0x56   : > { %s4722_s16 = scalar_lea.hbm %s5939_s4, 576 }
  0x57   : > { %p4723_p6 = scmp.ne.s32.totalorder %s5939_s4, %s4722_s16  ;;  %p4729_p5 = scmp.lt.u32.totalorder %s4722_s16, %s5939_s4 }
  0x59   : > { %p4725_p10 = pnand %p4723_p6, %p5072_p13 }
  0x5b   : > { %p4726_p3 = pneg %p4725_p10 }
  0x5d   : > { %p4731_p7 = pnand %p4729_p5, %p4726_p3 }
  0x5f   : > { %4734 = shalt.err (!%p4731_p7)
}
  0x60   : > { %s4735_s7 = scalar_lea.vmem %s231_s12, 576  ;;  %p4743_p1 = scmp.lt.s32.totalorder %s231_s12, %s231_s12 }
  0x61   : > { %p4736_p9 = scmp.ne.s32.totalorder %s231_s12, %s4735_s7  ;;  %p4744_p2 = scmp.lt.s32.totalorder %s4735_s7, %s4735_s7 }
  0x63   : > { %p4738_p12 = pnand %p4736_p9, %p5072_p13  ;;  %p4745_p4 = por %p4744_p2, %p4743_p1 }
  0x65   : > { %p4739_p0 = pneg %p4738_p12 }
  0x67   : > { %p4746_p8 = pnand %p4745_p4, %p4739_p0 }
  0x69   : > { %4749 = shalt.err (!%p4746_p8)
}
  0x6a   : > { %4557 = dma.hbm_to_vmem [thread:$0]  (!%p5056_p11), %s5939_s4, 576, %s231_s12, [#allocation11], %s4925_s30, %s4925_s30, %s4926_s9  }
  0x6b   : > { %s4927_s13 = smov [#allocation13]   ;;  %s4750_s17 = scalar_lea.hbm %s5920_s5, 64 }
  0x6c   : > { %s244_s14 = sshll.u32 %s4927_s13, 4  ;;  %p4751_p4 = scmp.ne.s32.totalorder %s5920_s5, %s4750_s17  ;;  %s245_s14 = int_to_ptr.vmem [resolvable:$true] %s244_s14 }
  0x6d   : > { %p4757_p10 = scmp.lt.u32.totalorder %s4750_s17, %s5920_s5 }
  0x6e   : > { %p4753_p8 = pnand %p4751_p4, %p5072_p13 }
  0x70   : > { %p4754_p6 = pneg %p4753_p8 }
  0x72   : > { %p4759_p3 = pnand %p4757_p10, %p4754_p6 }
  0x74   : > { %4762 = shalt.err (!%p4759_p3)
}
  0x75   : > { %s4763_s12 = scalar_lea.vmem %s245_s14, 64  ;;  %p4771_p12 = scmp.lt.s32.totalorder %s245_s14, %s245_s14 }
  0x76   : > { %p4764_p5 = scmp.ne.s32.totalorder %s245_s14, %s4763_s12  ;;  %p4772_p0 = scmp.lt.s32.totalorder %s4763_s12, %s4763_s12 }
  0x78   : > { %p4766_p7 = pnand %p4764_p5, %p5072_p13  ;;  %p4773_p1 = por %p4772_p0, %p4771_p12 }
  0x7a   : > { %p4767_p9 = pneg %p4766_p7 }
  0x7c   : > { %p4774_p2 = pnand %p4773_p1, %p4767_p9 }
  0x7e   : > { %4777 = shalt.err (!%p4774_p2)
}
  0x7f   : > { %4560 = dma.hbm_to_vmem [thread:$0]  (!%p5056_p11), %s5920_s5, 64, %s245_s14, [#allocation14]  }
  0x80   : > { %s5160_s18 = sadd.s32 1, %s4920_s24   ;;  %s34_s10 = sadd.s32 1, %s4916_s23 }
  0x81   : > { %s31_s8 = ssub.s32 %s4920_s24, %s5160_s18  ;;  %p41_p13 = scmp.ne.s32.totalorder %s4916_s23, %s4912_s22 }
  0x82   : > { %p32_p4 = scmp.eq.s32.totalorder %s31_s8, 0  ;;  %p42_p8 = scmp.eq.s32.totalorder %s4920_s24, 0 }
  0x83   : > { %p5940_p6 = scmp.eq.s32.totalorder %s5026_s25, 1  ;;  %p4576_p3 = scmp.lt.s32.totalorder %s4920_s24, 2 }
  0x84   : > { %s5176_s13 = scalar_select %p32_p4, %s4916_s23, %s34_s10  }
  0x85   : > { %p5170_p10 = por %p5940_p6, %p41_p13  ;;  %p43_p5 = por %p42_p8, %p41_p13 }
  0x86   : > { %s5179_s15 = sand.u32 1, %s4916_s23   ;;  %s4356_s16 = sshll.u32 %s4920_s24, 10 }
  0x87   : > { %s4280_s14 = sshll.u32 %s5179_s15, 6  ;;  %s5942_s0 = sld [smem:[#allocation22_spill]] }
  0x88   : > { %s259_s26 = scalar_lea.vmem [#allocation4], %s4280_s14  ;;  %p5190_p11 = pnand %p4576_p3, %p43_p5 }
  0x89   : > { %s266_s7 = sshll.u32 %s259_s26, 4  ;;  %s256_s9 = scalar_lea.sflag [#allocation5], %s5179_s15  ;;  %s5188_s7 = int_to_ptr.vmem [resolvable:$true] %s266_s7 }
  0x8a   : > { %p4780_p9 = pneg %p5190_p11 }
  0x8d   : > { %s5186_s20 = scalar_lea.hbm %s5942_s0, %s4356_s16  ;;  %s4783_s16 = scalar_lea.hbm %s5942_s0, 2048 }
  0x8e   : > { %s4778_s10 = scalar_lea.hbm %s5186_s20, 1024  ;;  %p4784_p1 = scmp.lt.u32.totalorder %s5186_s20, %s5942_s0 }
  0x8f   : > { %p4779_p7 = scmp.ne.s32.totalorder %s5186_s20, %s4778_s10  ;;  %p4785_p2 = scmp.lt.u32.totalorder %s4783_s16, %s4778_s10 }
  0x90   : > { %p4787_p4 = scmp.lt.u32.totalorder %s4778_s10, %s5186_s20 }
  0x91   : > { %p4781_p12 = pnand %p4780_p9, %p4779_p7  ;;  %p4786_p13 = por %p4785_p2, %p4784_p1 }
  0x93   : > { %p4782_p0 = pneg %p4781_p12  ;;  %p4788_p8 = por %p4787_p4, %p4786_p13 }
  0x95   : > { %p4789_p6 = pnand %p4788_p8, %p4782_p0 }
  0x97   : > { %4792 = shalt.err (!%p4789_p6)
}
  0x98   : > { %s4793_s26 = scalar_lea.vmem %s5188_s7, 1024  ;;  %s4928_s8 = smov [#allocation4]  }
  0x99   : > { %p4794_p3 = scmp.ne.s32.totalorder %s5188_s7, %s4793_s26  ;;  %s4798_s14 = sshll.u32 %s4928_s8, 4  ;;  %s4799_s14 = int_to_ptr.vmem [resolvable:$false] %s4798_s14 }
  0x9a   : > { %s4800_s17 = scalar_lea.vmem %s4799_s14, 2048  ;;  %p4801_p12 = scmp.lt.s32.totalorder %s5188_s7, %s4799_s14 }
  0x9b   : > { %p4796_p5 = pnand %p4794_p3, %p4780_p9  ;;  %p4802_p1 = scmp.lt.s32.totalorder %s4800_s17, %s4793_s26 }
  0x9d   : > { %p4797_p7 = pneg %p4796_p5  ;;  %p4803_p2 = por %p4802_p1, %p4801_p12 }
  0x9f   : > { %p4804_p13 = pnand %p4803_p2, %p4797_p7 }
  0xa1   : > { %4807 = shalt.err (!%p4804_p13)
}
  0xa2   : > { %s4929_s10 = smov 128   ;;  %s4930_s16 = smov 8  }
  0xa3   : > { %4564 = dma.hbm_to_vmem [thread:$0]  (!%p5190_p11), %s5186_s20, 1024, %s5188_s7, %s256_s9, %s4929_s10, %s4929_s10, %s4930_s16  }
  0xa4   : > { %s4515_s19 = smul.u32 96, %s5179_s15  ;;  %s5944_s2 = sand.u32 1, %s4920_s24  }
  0xa5   : > { %s4516_s26 = smul.u32 1536, %s4920_s24  ;;  %s5237_s3 = scalar_lea.sflag [#allocation8], %s5944_s2 }
  0xa6   : > { %s280_s30 = scalar_lea.vmem [#allocation7], %s4515_s19  ;;  %s4813_s7 = scalar_lea.hbm %s5916_s1, 3072 }
  0xa7   : > { %s5231_s17 = scalar_lea.hbm %s5916_s1, %s4516_s26  ;;  %s287_s0 = sshll.u32 %s280_s30, 4  ;;  %s5233_s0 = int_to_ptr.vmem [resolvable:$true] %s287_s0 }
  0xa8   : > { %s4808_s4 = scalar_lea.hbm %s5231_s17, 1536  ;;  %p4814_p6 = scmp.lt.u32.totalorder %s5231_s17, %s5916_s1 }
  0xa9   : > { %p4809_p0 = scmp.ne.s32.totalorder %s5231_s17, %s4808_s4  ;;  %p4815_p3 = scmp.lt.u32.totalorder %s4813_s7, %s4808_s4 }
  0xaa   : > { %p4817_p7 = scmp.lt.u32.totalorder %s4808_s4, %s5231_s17 }
  0xab   : > { %p4811_p4 = pnand %p4809_p0, %p4780_p9  ;;  %p4816_p5 = por %p4815_p3, %p4814_p6 }
  0xad   : > { %p4812_p8 = pneg %p4811_p4  ;;  %p4818_p12 = por %p4817_p7, %p4816_p5 }
  0xaf   : > { %p4819_p1 = pnand %p4818_p12, %p4812_p8 }
  0xb1   : > { %4822 = shalt.err (!%p4819_p1)
}
  0xb2   : > { %s4823_s2 = scalar_lea.vmem %s5233_s0, 1536  ;;  %s4931_s30 = smov [#allocation7]  }
  0xb3   : > { %p4824_p2 = scmp.ne.s32.totalorder %s5233_s0, %s4823_s2  ;;  %s4828_s19 = sshll.u32 %s4931_s30, 4  ;;  %s4829_s19 = int_to_ptr.vmem [resolvable:$false] %s4828_s19 }
  0xb4   : > { %s4830_s8 = scalar_lea.vmem %s4829_s19, 3072  ;;  %p4831_p4 = scmp.lt.s32.totalorder %s5233_s0, %s4829_s19 }
  0xb5   : > { %p4826_p13 = pnand %p4824_p2, %p4780_p9  ;;  %p4832_p6 = scmp.lt.s32.totalorder %s4830_s8, %s4823_s2 }
  0xb7   : > { %p4827_p0 = pneg %p4826_p13  ;;  %p4833_p3 = por %p4832_p6, %p4831_p4 }
  0xb9   : > { %p4834_p5 = pnand %p4833_p3, %p4827_p0 }
  0xbb   : > { %4837 = shalt.err (!%p4834_p5)
}
  0xbc   : > { %4567 = dma.hbm_to_vmem [thread:$0]  (!%p5190_p11), %s5231_s17, 1536, %s5233_s0, %s5237_s3, %s4929_s10, %s4929_s10, %s4930_s16  }
  0xbd   : > { %p5945_p9 = scmp.ne.s32.totalorder %s5934_s29, 0 }
  0xbe   : > { %s5269_s4 = sand.u32 (!%p5945_p9), 1, %s4912_s22   ;;  %p5946_p8 = scmp.ne.s32.totalorder (!%p5945_p9), %s5932_s27, 0 }
  0xbf   : > { %299 = sbr.rel (%p5945_p9) target bundleno = 1217 (0x4c1), region = 44  ;;  %s4285_s14 = sshll.u32 (!%p5945_p9), %s5269_s4, 6 }
  0xc0   : > { %s302_s15 = scalar_lea.sflag (!%p5945_p9), [#allocation5], %s5269_s4  ;;  %s5273_s20 = scalar_lea.vmem (!%p5945_p9), [#allocation4], %s4285_s14 }
  0xc6   : > { %4883 = dma.done.wait (%p5946_p8), %s302_s15, 1024  }
  0xc7   : > { %4885 = vsyncadd (%p5946_p8), %s302_s15, 4294966272  ;;  %s310_s0 = sand.u32 1, %s5026_s25   ;;  %s4517_s3 = smul.u32 96, %s5269_s4 }
  0xc8   : > { %s311_s29 = scalar_lea.sflag [#allocation8], %s310_s0 }
  0xc9   : > { %s5281_s12 = scalar_lea.vmem [#allocation7], %s4517_s3 }
  0xca   : > { %4887 = dma.done.wait (%p5946_p8), %s311_s29, 1536  }
  0xcb   : > { %4889 = vsyncadd (%p5946_p8), %s311_s29, 4294965760  ;;  %p5947_p11 = scmp.eq.s32.totalorder %s5026_s25, 0 }
  0xcd   : > { %4891 = dma.done.wait (%p5947_p11), [#allocation8], 576   ;;  %p5948_p7 = pmov %p5947_p11 }
  0xcf   : > { %4893 = vsyncadd (%p5948_p7), [#allocation8], 4294966720  ;;  %p5949_p12 = pmov %p5948_p7 }
  0xd0   : > { %p5950_p1 = pmov %p5948_p7 }
  0xd1   : > { %4895 = dma.done.wait (%p5949_p12), [#allocation11], 640  }
  0xd2   : > { %4897 = vsyncadd (%p5950_p1), [#allocation11], 4294966656  ;;  %p5951_p2 = pmov %p5950_p1 }
  0xd3   : > { %p5952_p13 = pmov %p5950_p1 }
  0xd4   : > { %4899 = dma.done.wait (%p5951_p2), [#allocation14], 64  }
  0xd5   : > { %4901 = vsyncadd (%p5952_p13), [#allocation14], 4294967232  ;;  %vm398_vm0 = vcmask 1045509   ;;  %vm401_vm1 = vcmask 1046534   ;;  %v4932_v0 = vmov 0.0   ;;  %vm404_vm2 = vcmask 1047559  }
  0xd6   : > { %364 = vst [vmem:[#allocation2] sm:$0xff] %v4932_v0  ;;  %366 = vst [vmem:[#allocation3] sm:$0xf] %v4932_v0  ;;  %1126 = vmatprep.mubr.f32.mxu0 %v4932_v0  ;;  %4393 = vmatprep.subr.mxu1 %v4932_v0  ;;  %vm377_vm3 = vcmask 1041409   ;;  %vm380_vm4 = vcmask 1042434   ;;  %vm383_vm5 = vcmask 1043459  }
  0xd7   : > { %367 = vst [vmem:[#allocation3 + $0x10] sm:$0xf] %v4932_v0  ;;  %v388_v1 = vld [vmem:[%s5281_s12 + $0x1] sm:$0x1]  ;;  %v389_v2 = vld [vmem:[%s5281_s12 + $0x19] sm:$0x1] }
  0xd8   : > { %v390_v3 = vld [vmem:[%s5281_s12 + $0x31] sm:$0x1]  ;;  %v391_v4 = vld [vmem:[%s5281_s12 + $0x49] sm:$0x1]  ;;  %v396_v5 = vrot.slane %v388_v1, 4  ;;  %v397_v6 = vrot.slane %v389_v2, 3 }
  0xd9   : > { %v400_v7 = vrot.slane %v390_v3, 2  ;;  %v403_v8 = vrot.slane %v391_v4, 1  ;;  %v598_v9 = vld [vmem:[%s5281_s12 + $0x6] sm:$0x1]  ;;  %v599_v10 = vld [vmem:[%s5281_s12 + $0x1e] sm:$0x1] }
  0xda   : > { %v399_v11 = vsel %vm398_vm0, %v397_v6, %v396_v5  ;;  %v600_v12 = vld [vmem:[%s5281_s12 + $0x36] sm:$0x1]  ;;  %v601_v13 = vld [vmem:[%s5281_s12 + $0x4e] sm:$0x1]  ;;  %v606_v14 = vrot.slane %v598_v9, 4  ;;  %v607_v15 = vrot.slane %v599_v10, 3 }
  0xdb   : > { %v402_v16 = vsel %vm401_vm1, %v400_v7, %v399_v11  ;;  %v609_v17 = vrot.slane %v600_v12, 2  ;;  %v611_v18 = vrot.slane %v601_v13, 1  ;;  %v577_v19 = vld [vmem:[%s5273_s20 + $0x5] sm:$0x1]  ;;  %v578_v20 = vld [vmem:[%s5273_s20 + $0x15] sm:$0x1] }
  0xdc   : > { %v405_v21 = vsel %vm404_vm2, %v403_v8, %v402_v16  ;;  %v608_v22 = vsel %vm398_vm0, %v607_v15, %v606_v14  ;;  %v579_v23 = vld [vmem:[%s5273_s20 + $0x25] sm:$0x1]  ;;  %v580_v24 = vld [vmem:[%s5273_s20 + $0x35] sm:$0x1]  ;;  %v585_v25 = vrot.slane %v578_v20, 7  ;;  %s4933_s27 = smov 127  }
  0xdd   : > { %406 = vrot.lane.b32.xlu0 %v405_v21, %s4933_s27  ;;  %v610_v26 = vsel %vm401_vm1, %v609_v17, %v608_v22  ;;  %v587_v27 = vrot.slane %v579_v23, 6  ;;  %v589_v28 = vrot.slane %v580_v24, 5  ;;  %v413_v29 = vld [vmem:[%s5273_s20 + $0x1] sm:$0x1]  ;;  %v414_v30 = vld [vmem:[%s5273_s20 + $0x11] sm:$0x1] }
  0xde   : > { %v612_v31 = vsel %vm404_vm2, %v611_v18, %v610_v26  ;;  %v586_v32 = vsel %vm377_vm3, %v585_v25, %v577_v19  ;;  %v415_v33 = vld [vmem:[%s5273_s20 + $0x21] sm:$0x1]  ;;  %v416_v34 = vld [vmem:[%s5273_s20 + $0x31] sm:$0x1]  ;;  %v421_v35 = vrot.slane %v414_v30, 7  ;;  %s4934_s10 = smov 119  }
  0xdf   : > { %613 = vrot.lane.b32.xlu1 %v612_v31, %s4934_s10  ;;  %v588_v36 = vsel %vm380_vm4, %v587_v27, %v586_v32  ;;  %v423_v37 = vrot.slane %v415_v33, 6  ;;  %v425_v38 = vrot.slane %v416_v34, 5  ;;  %v432_v39 = vld [vmem:[%s5281_s12 + $0x2] sm:$0x1]  ;;  %v433_v40 = vld [vmem:[%s5281_s12 + $0x1a] sm:$0x1] }
  0xe0   : > { %v590_v41 = vsel %vm383_vm5, %v589_v28, %v588_v36  ;;  %v422_v42 = vsel %vm377_vm3, %v421_v35, %v413_v29  ;;  %v434_v43 = vld [vmem:[%s5281_s12 + $0x32] sm:$0x1]  ;;  %v435_v44 = vld [vmem:[%s5281_s12 + $0x4a] sm:$0x1]  ;;  %v440_v45 = vrot.slane %v432_v39, 4  ;;  %v441_v46 = vrot.slane %v433_v40, 3 }
  0xe1   : > { %s4935_s16 = smov 120   ;;  %v424_v47 = vsel %vm380_vm4, %v423_v37, %v422_v42  ;;  %v443_v48 = vrot.slane %v434_v43, 2  ;;  %v445_v49 = vrot.slane %v435_v44, 1  ;;  %v622_v50 = vld [vmem:[%s5273_s20 + $0x6] sm:$0x1]  ;;  %s4936_s17 = smov 24  }
  0xe2   : > { %591 = vrot.lane.b32.xlu0 %v590_v41, %s4935_s16  ;;  %v623_v51 = vld [vmem:[%s5273_s20 + $0x16] sm:$0x1]  ;;  %v426_v52 = vsel %vm383_vm5, %v425_v38, %v424_v47  ;;  %v442_v53 = vsel %vm398_vm0, %v441_v46, %v440_v45  ;;  %v624_v54 = vld [vmem:[%s5273_s20 + $0x26] sm:$0x1]  ;;  %v641_v60 = vld [vmem:[%s5281_s12 + $0x7] sm:$0x1] }
  0xe3   : > { %v625_v55 = vld [vmem:[%s5273_s20 + $0x36] sm:$0x1]  ;;  %v630_v56 = vrot.slane %v623_v51, 7  ;;  %427 = vrot.lane.b32.xlu1 %v426_v52, %s4936_s17  ;;  %v444_v57 = vsel %vm401_vm1, %v443_v48, %v442_v53  ;;  %v632_v58 = vrot.slane %v624_v54, 6  ;;  %v642_v61 = vld [vmem:[%s5281_s12 + $0x1f] sm:$0x1] }
  0xe4   : > { %v634_v59 = vrot.slane %v625_v55, 5  ;;  %v446_v62 = vsel %vm404_vm2, %v445_v49, %v444_v57  ;;  %v643_v1 = vld [vmem:[%s5281_s12 + $0x37] sm:$0x1]  ;;  %v644_v2 = vld [vmem:[%s5281_s12 + $0x4f] sm:$0x1]  ;;  %v649_v3 = vrot.slane %v641_v60, 4 }
  0xe5   : > { %v631_v63 = vsel %vm377_vm3, %v630_v56, %v622_v50  ;;  %v650_v4 = vrot.slane %v642_v61, 3  ;;  %s4937_s7 = smov 23   ;;  %v652_v6 = vrot.slane %v643_v1, 2  ;;  %v654_v7 = vrot.slane %v644_v2, 1  ;;  %v454_v8 = vld [vmem:[%s5273_s20 + $0x2] sm:$0x1] }
  0xe6   : > { %447 = vrot.lane.b32.xlu0 %v446_v62, %s4937_s7  ;;  %v633_v5 = vsel %vm380_vm4, %v632_v58, %v631_v63  ;;  %v455_v9 = vld [vmem:[%s5273_s20 + $0x12] sm:$0x1]  ;;  %v456_v12 = vld [vmem:[%s5273_s20 + $0x22] sm:$0x1]  ;;  %s4938_s9 = smov 16   ;;  %s4939_s26 = smov 15  }
  0xe7   : > { %v635_v10 = vsel %vm383_vm5, %v634_v59, %v633_v5  ;;  %v651_v11 = vsel %vm398_vm0, %v650_v4, %v649_v3  ;;  %v457_v13 = vld [vmem:[%s5273_s20 + $0x32] sm:$0x1]  ;;  %v462_v14 = vrot.slane %v455_v9, 7  ;;  %v464_v16 = vrot.slane %v456_v12, 6  ;;  %v473_v18 = vld [vmem:[%s5281_s12 + $0x3] sm:$0x1] }
  0xe8   : > { %636 = vrot.lane.b32.xlu1 %v635_v10, %s4938_s9  ;;  %v653_v15 = vsel %vm401_vm1, %v652_v6, %v651_v11  ;;  %v466_v17 = vrot.slane %v457_v13, 5  ;;  %v474_v19 = vld [vmem:[%s5281_s12 + $0x1b] sm:$0x1]  ;;  %v475_v22 = vld [vmem:[%s5281_s12 + $0x33] sm:$0x1]  ;;  %v481_v24 = vrot.slane %v473_v18, 4 }
  0xe9   : > { %v655_v20 = vsel %vm404_vm2, %v654_v7, %v653_v15  ;;  %v463_v21 = vsel %vm377_vm3, %v462_v14, %v454_v8  ;;  %v476_v23 = vld [vmem:[%s5281_s12 + $0x4b] sm:$0x1]  ;;  %v482_v25 = vrot.slane %v474_v19, 3  ;;  %v484_v27 = vrot.slane %v475_v22, 2  ;;  %v663_v29 = vld [vmem:[%s5273_s20 + $0x7] sm:$0x1] }
  0xea   : > { %656 = vrot.lane.b32.xlu0 %v655_v20, %s4939_s26  ;;  %v465_v26 = vsel %vm380_vm4, %v464_v16, %v463_v21  ;;  %v486_v28 = vrot.slane %v476_v23, 1  ;;  %v664_v30 = vld [vmem:[%s5273_s20 + $0x17] sm:$0x1]  ;;  %v665_v33 = vld [vmem:[%s5273_s20 + $0x27] sm:$0x1]  ;;  %s4940_s2 = smov 48  }
  0xeb   : > { %v467_v31 = vsel %vm383_vm5, %v466_v17, %v465_v26  ;;  %v483_v32 = vsel %vm398_vm0, %v482_v25, %v481_v24  ;;  %v666_v34 = vld [vmem:[%s5273_s20 + $0x37] sm:$0x1]  ;;  %v671_v35 = vrot.slane %v664_v30, 7  ;;  %v673_v37 = vrot.slane %v665_v33, 6  ;;  %v682_v39 = vld [vmem:[%s5281_s12 + $0x8] sm:$0x1] }
  0xec   : > { %468 = vrot.lane.b32.xlu1 %v467_v31, %s4940_s2  ;;  %v485_v36 = vsel %vm401_vm1, %v484_v27, %v483_v32  ;;  %v675_v38 = vrot.slane %v666_v34, 5  ;;  %v683_v40 = vld [vmem:[%s5281_s12 + $0x20] sm:$0x1]  ;;  %v684_v43 = vld [vmem:[%s5281_s12 + $0x38] sm:$0x1]  ;;  %v690_v45 = vrot.slane %v682_v39, 4 }
  0xed   : > { %v487_v41 = vsel %vm404_vm2, %v486_v28, %v485_v36  ;;  %v672_v42 = vsel %vm377_vm3, %v671_v35, %v663_v29  ;;  %v685_v44 = vld [vmem:[%s5281_s12 + $0x50] sm:$0x1]  ;;  %v691_v46 = vrot.slane %v683_v40, 3  ;;  %s4941_s30 = smov 47   ;;  %v693_v48 = vrot.slane %v684_v43, 2  ;;  %s4942_s19 = smov 40  }
  0xee   : > { %488 = vrot.lane.b32.xlu0 %v487_v41, %s4941_s30  ;;  %v674_v47 = vsel %vm380_vm4, %v673_v37, %v672_v42  ;;  %v695_v49 = vrot.slane %v685_v44, 1  ;;  %v495_v50 = vld [vmem:[%s5273_s20 + $0x3] sm:$0x1]  ;;  %v496_v51 = vld [vmem:[%s5273_s20 + $0x13] sm:$0x1]  ;;  %s4943_s8 = smov 39  }
  0xef   : > { %v676_v52 = vsel %vm383_vm5, %v675_v38, %v674_v47  ;;  %v692_v53 = vsel %vm398_vm0, %v691_v46, %v690_v45  ;;  %v497_v54 = vld [vmem:[%s5273_s20 + $0x23] sm:$0x1]  ;;  %v498_v55 = vld [vmem:[%s5273_s20 + $0x33] sm:$0x1]  ;;  %v503_v56 = vrot.slane %v496_v51, 7  ;;  %s4944_s14 = smov 72  }
  0xf0   : > { %677 = vrot.lane.b32.xlu1 %v676_v52, %s4942_s19  ;;  %v694_v57 = vsel %vm401_vm1, %v693_v48, %v692_v53  ;;  %v505_v58 = vrot.slane %v497_v54, 6  ;;  %v507_v59 = vrot.slane %v498_v55, 5  ;;  %v514_v60 = vld [vmem:[%s5281_s12 + $0x4] sm:$0x1]  ;;  %v515_v61 = vld [vmem:[%s5281_s12 + $0x1c] sm:$0x1] }
  0xf1   : > { %v696_v62 = vsel %vm404_vm2, %v695_v49, %v694_v57  ;;  %v504_v63 = vsel %vm377_vm3, %v503_v56, %v495_v50  ;;  %v516_v1 = vld [vmem:[%s5281_s12 + $0x34] sm:$0x1]  ;;  %v517_v2 = vld [vmem:[%s5281_s12 + $0x4c] sm:$0x1]  ;;  %v522_v3 = vrot.slane %v514_v60, 4  ;;  %v523_v4 = vrot.slane %v515_v61, 3 }
  0xf2   : > { %697 = vrot.lane.b32.xlu0 %v696_v62, %s4943_s8  ;;  %v506_v5 = vsel %vm380_vm4, %v505_v58, %v504_v63  ;;  %v525_v6 = vrot.slane %v516_v1, 2  ;;  %v527_v7 = vrot.slane %v517_v2, 1  ;;  %v704_v8 = vld [vmem:[%s5273_s20 + $0x8] sm:$0x1]  ;;  %v705_v9 = vld [vmem:[%s5273_s20 + $0x18] sm:$0x1] }
  0xf3   : > { %v508_v10 = vsel %vm383_vm5, %v507_v59, %v506_v5  ;;  %v524_v11 = vsel %vm398_vm0, %v523_v4, %v522_v3  ;;  %v706_v12 = vld [vmem:[%s5273_s20 + $0x28] sm:$0x1]  ;;  %v707_v13 = vld [vmem:[%s5273_s20 + $0x38] sm:$0x1]  ;;  %v712_v14 = vrot.slane %v705_v9, 7  ;;  %s4945_s15 = smov 71  }
  0xf4   : > { %509 = vrot.lane.b32.xlu1 %v508_v10, %s4944_s14  ;;  %v526_v15 = vsel %vm401_vm1, %v525_v6, %v524_v11  ;;  %v714_v16 = vrot.slane %v706_v12, 6  ;;  %v716_v17 = vrot.slane %v707_v13, 5  ;;  %v723_v18 = vld [vmem:[%s5281_s12 + $0x9] sm:$0x1]  ;;  %v724_v19 = vld [vmem:[%s5281_s12 + $0x21] sm:$0x1] }
  0xf5   : > { %v528_v20 = vsel %vm404_vm2, %v527_v7, %v526_v15  ;;  %v713_v21 = vsel %vm377_vm3, %v712_v14, %v704_v8  ;;  %v725_v22 = vld [vmem:[%s5281_s12 + $0x39] sm:$0x1]  ;;  %v726_v23 = vld [vmem:[%s5281_s12 + $0x51] sm:$0x1]  ;;  %v731_v24 = vrot.slane %v723_v18, 4  ;;  %v732_v25 = vrot.slane %v724_v19, 3 }
  0xf6   : > { %529 = vrot.lane.b32.xlu0 %v528_v20, %s4945_s15  ;;  %v715_v26 = vsel %vm380_vm4, %v714_v16, %v713_v21  ;;  %v734_v27 = vrot.slane %v725_v22, 2  ;;  %v736_v28 = vrot.slane %v726_v23, 1  ;;  %v536_v29 = vld [vmem:[%s5273_s20 + $0x4] sm:$0x1]  ;;  %v537_v30 = vld [vmem:[%s5273_s20 + $0x14] sm:$0x1] }
  0xf7   : > { %v717_v31 = vsel %vm383_vm5, %v716_v17, %v715_v26  ;;  %v733_v32 = vsel %vm398_vm0, %v732_v25, %v731_v24  ;;  %v538_v33 = vld [vmem:[%s5273_s20 + $0x24] sm:$0x1]  ;;  %v539_v34 = vld [vmem:[%s5273_s20 + $0x34] sm:$0x1]  ;;  %v544_v35 = vrot.slane %v537_v30, 7  ;;  %s4946_s0 = smov 64  }
  0xf8   : > { %718 = vrot.lane.b32.xlu1 %v717_v31, %s4946_s0  ;;  %v735_v36 = vsel %vm401_vm1, %v734_v27, %v733_v32  ;;  %v546_v37 = vrot.slane %v538_v33, 6  ;;  %v548_v38 = vrot.slane %v539_v34, 5  ;;  %v555_v39 = vld [vmem:[%s5281_s12 + $0x5] sm:$0x1]  ;;  %v556_v40 = vld [vmem:[%s5281_s12 + $0x1d] sm:$0x1] }
  0xf9   : > { %v737_v41 = vsel %vm404_vm2, %v736_v28, %v735_v36  ;;  %v545_v42 = vsel %vm377_vm3, %v544_v35, %v536_v29  ;;  %v557_v43 = vld [vmem:[%s5281_s12 + $0x35] sm:$0x1]  ;;  %v558_v44 = vld [vmem:[%s5281_s12 + $0x4d] sm:$0x1]  ;;  %v563_v45 = vrot.slane %v555_v39, 4  ;;  %v564_v46 = vrot.slane %v556_v40, 3 }
  0xfa   : > { %s4947_s3 = smov 63   ;;  %v547_v47 = vsel %vm380_vm4, %v546_v37, %v545_v42  ;;  %v566_v48 = vrot.slane %v557_v43, 2  ;;  %v568_v49 = vrot.slane %v558_v44, 1  ;;  %v745_v50 = vld [vmem:[%s5273_s20 + $0x9] sm:$0x1]  ;;  %s4948_s29 = smov 96  }
  0xfb   : > { %738 = vrot.lane.b32.xlu0 %v737_v41, %s4947_s3  ;;  %v746_v51 = vld [vmem:[%s5273_s20 + $0x19] sm:$0x1]  ;;  %v549_v52 = vsel %vm383_vm5, %v548_v38, %v547_v47  ;;  %v565_v53 = vsel %vm398_vm0, %v564_v46, %v563_v45  ;;  %v747_v54 = vld [vmem:[%s5273_s20 + $0x29] sm:$0x1]  ;;  %v764_v60 = vld [vmem:[%s5281_s12 + $0xa] sm:$0x1] }
  0xfc   : > { %v748_v55 = vld [vmem:[%s5273_s20 + $0x39] sm:$0x1]  ;;  %v753_v56 = vrot.slane %v746_v51, 7  ;;  %550 = vrot.lane.b32.xlu1 %v549_v52, %s4948_s29  ;;  %v567_v57 = vsel %vm401_vm1, %v566_v48, %v565_v53  ;;  %v755_v58 = vrot.slane %v747_v54, 6  ;;  %v765_v61 = vld [vmem:[%s5281_s12 + $0x22] sm:$0x1] }
  0xfd   : > { %v757_v59 = vrot.slane %v748_v55, 5  ;;  %v569_v62 = vsel %vm404_vm2, %v568_v49, %v567_v57  ;;  %v766_v1 = vld [vmem:[%s5281_s12 + $0x3a] sm:$0x1]  ;;  %v767_v2 = vld [vmem:[%s5281_s12 + $0x52] sm:$0x1]  ;;  %v772_v3 = vrot.slane %v764_v60, 4 }
  0xfe   : > { %v754_v63 = vsel %vm377_vm3, %v753_v56, %v745_v50  ;;  %v773_v4 = vrot.slane %v765_v61, 3  ;;  %s4949_s10 = smov 95   ;;  %v775_v6 = vrot.slane %v766_v1, 2  ;;  %v777_v7 = vrot.slane %v767_v2, 1  ;;  %v786_v8 = vld [vmem:[%s5273_s20 + $0xa] sm:$0x1] }
  0xff   : > { %570 = vrot.lane.b32.xlu0 %v569_v62, %s4949_s10  ;;  %v756_v5 = vsel %vm380_vm4, %v755_v58, %v754_v63  ;;  %v787_v9 = vld [vmem:[%s5273_s20 + $0x1a] sm:$0x1]  ;;  %v788_v12 = vld [vmem:[%s5273_s20 + $0x2a] sm:$0x1]  ;;  %s4950_s16 = smov 88   ;;  %s4951_s9 = smov 87  }
 0x100   : > { %v758_v10 = vsel %vm383_vm5, %v757_v59, %v756_v5  ;;  %v774_v11 = vsel %vm398_vm0, %v773_v4, %v772_v3  ;;  %v789_v13 = vld [vmem:[%s5273_s20 + $0x3a] sm:$0x1]  ;;  %v794_v14 = vrot.slane %v787_v9, 7  ;;  %v796_v16 = vrot.slane %v788_v12, 6  ;;  %v805_v18 = vld [vmem:[%s5281_s12 + $0xb] sm:$0x1] }
 0x101   : > { %759 = vrot.lane.b32.xlu1 %v758_v10, %s4950_s16  ;;  %v776_v15 = vsel %vm401_vm1, %v775_v6, %v774_v11  ;;  %v798_v17 = vrot.slane %v789_v13, 5  ;;  %v806_v19 = vld [vmem:[%s5281_s12 + $0x23] sm:$0x1]  ;;  %v807_v22 = vld [vmem:[%s5281_s12 + $0x3b] sm:$0x1]  ;;  %v813_v24 = vrot.slane %v805_v18, 4 }
 0x102   : > { %v778_v20 = vsel %vm404_vm2, %v777_v7, %v776_v15  ;;  %v795_v21 = vsel %vm377_vm3, %v794_v14, %v786_v8  ;;  %v808_v23 = vld [vmem:[%s5281_s12 + $0x53] sm:$0x1]  ;;  %v814_v25 = vrot.slane %v806_v19, 3  ;;  %v816_v27 = vrot.slane %v807_v22, 2  ;;  %v827_v29 = vld [vmem:[%s5273_s20 + $0xb] sm:$0x1] }
 0x103   : > { %779 = vrot.lane.b32.xlu0 %v778_v20, %s4951_s9  ;;  %v797_v26 = vsel %vm380_vm4, %v796_v16, %v795_v21  ;;  %v818_v28 = vrot.slane %v808_v23, 1  ;;  %v828_v30 = vld [vmem:[%s5273_s20 + $0x1b] sm:$0x1]  ;;  %v829_v33 = vld [vmem:[%s5273_s20 + $0x2b] sm:$0x1]  ;;  %s4952_s26 = smov 112  }
 0x104   : > { %v799_v31 = vsel %vm383_vm5, %v798_v17, %v797_v26  ;;  %v815_v32 = vsel %vm398_vm0, %v814_v25, %v813_v24  ;;  %v830_v34 = vld [vmem:[%s5273_s20 + $0x3b] sm:$0x1]  ;;  %v835_v35 = vrot.slane %v828_v30, 7  ;;  %v837_v37 = vrot.slane %v829_v33, 6  ;;  %v846_v39 = vld [vmem:[%s5281_s12 + $0xc] sm:$0x1] }
 0x105   : > { %800 = vrot.lane.b32.xlu1 %v799_v31, %s4952_s26  ;;  %v817_v36 = vsel %vm401_vm1, %v816_v27, %v815_v32  ;;  %v839_v38 = vrot.slane %v830_v34, 5  ;;  %v847_v40 = vld [vmem:[%s5281_s12 + $0x24] sm:$0x1]  ;;  %v848_v43 = vld [vmem:[%s5281_s12 + $0x3c] sm:$0x1]  ;;  %v854_v45 = vrot.slane %v846_v39, 4 }
 0x106   : > { %v819_v41 = vsel %vm404_vm2, %v818_v28, %v817_v36  ;;  %v836_v42 = vsel %vm377_vm3, %v835_v35, %v827_v29  ;;  %v849_v44 = vld [vmem:[%s5281_s12 + $0x54] sm:$0x1]  ;;  %v855_v46 = vrot.slane %v847_v40, 3  ;;  %s4953_s2 = smov 111   ;;  %v857_v48 = vrot.slane %v848_v43, 2  ;;  %s4954_s30 = smov 8  }
 0x107   : > { %820 = vrot.lane.b32.xlu0 %v819_v41, %s4953_s2  ;;  %v838_v47 = vsel %vm380_vm4, %v837_v37, %v836_v42  ;;  %v859_v49 = vrot.slane %v849_v44, 1  ;;  %v868_v50 = vld [vmem:[%s5273_s20 + $0xc] sm:$0x1]  ;;  %v869_v51 = vld [vmem:[%s5273_s20 + $0x1c] sm:$0x1]  ;;  %s4955_s19 = smov 7  }
 0x108   : > { %v840_v52 = vsel %vm383_vm5, %v839_v38, %v838_v47  ;;  %v856_v53 = vsel %vm398_vm0, %v855_v46, %v854_v45  ;;  %v870_v54 = vld [vmem:[%s5273_s20 + $0x2c] sm:$0x1]  ;;  %v871_v55 = vld [vmem:[%s5273_s20 + $0x3c] sm:$0x1]  ;;  %v876_v56 = vrot.slane %v869_v51, 7  ;;  %s4956_s8 = smov 32  }
 0x109   : > { %841 = vrot.lane.b32.xlu1 %v840_v52, %s4954_s30  ;;  %v858_v57 = vsel %vm401_vm1, %v857_v48, %v856_v53  ;;  %v878_v58 = vrot.slane %v870_v54, 6  ;;  %v880_v59 = vrot.slane %v871_v55, 5  ;;  %v887_v60 = vld [vmem:[%s5281_s12 + $0xd] sm:$0x1]  ;;  %v888_v61 = vld [vmem:[%s5281_s12 + $0x25] sm:$0x1] }
 0x10a   : > { %v860_v62 = vsel %vm404_vm2, %v859_v49, %v858_v57  ;;  %v877_v63 = vsel %vm377_vm3, %v876_v56, %v868_v50  ;;  %v889_v1 = vld [vmem:[%s5281_s12 + $0x3d] sm:$0x1]  ;;  %v890_v2 = vld [vmem:[%s5281_s12 + $0x55] sm:$0x1]  ;;  %v895_v3 = vrot.slane %v887_v60, 4  ;;  %v896_v4 = vrot.slane %v888_v61, 3 }
 0x10b   : > { %861 = vrot.lane.b32.xlu0 %v860_v62, %s4955_s19  ;;  %v879_v5 = vsel %vm380_vm4, %v878_v58, %v877_v63  ;;  %v898_v6 = vrot.slane %v889_v1, 2  ;;  %v900_v7 = vrot.slane %v890_v2, 1  ;;  %v909_v8 = vld [vmem:[%s5273_s20 + $0xd] sm:$0x1]  ;;  %v910_v9 = vld [vmem:[%s5273_s20 + $0x1d] sm:$0x1] }
 0x10c   : > { %v881_v10 = vsel %vm383_vm5, %v880_v59, %v879_v5  ;;  %v897_v11 = vsel %vm398_vm0, %v896_v4, %v895_v3  ;;  %v911_v12 = vld [vmem:[%s5273_s20 + $0x2d] sm:$0x1]  ;;  %v912_v13 = vld [vmem:[%s5273_s20 + $0x3d] sm:$0x1]  ;;  %v917_v14 = vrot.slane %v910_v9, 7  ;;  %s4957_s14 = smov 31  }
 0x10d   : > { %882 = vrot.lane.b32.xlu1 %v881_v10, %s4956_s8  ;;  %v899_v15 = vsel %vm401_vm1, %v898_v6, %v897_v11  ;;  %v919_v16 = vrot.slane %v911_v12, 6  ;;  %v921_v17 = vrot.slane %v912_v13, 5  ;;  %v928_v18 = vld [vmem:[%s5281_s12 + $0xe] sm:$0x1]  ;;  %v929_v19 = vld [vmem:[%s5281_s12 + $0x26] sm:$0x1] }
 0x10e   : > { %v901_v20 = vsel %vm404_vm2, %v900_v7, %v899_v15  ;;  %v918_v21 = vsel %vm377_vm3, %v917_v14, %v909_v8  ;;  %v930_v22 = vld [vmem:[%s5281_s12 + $0x3e] sm:$0x1]  ;;  %v931_v23 = vld [vmem:[%s5281_s12 + $0x56] sm:$0x1]  ;;  %v936_v24 = vrot.slane %v928_v18, 4  ;;  %v937_v25 = vrot.slane %v929_v19, 3 }
 0x10f   : > { %902 = vrot.lane.b32.xlu0 %v901_v20, %s4957_s14  ;;  %v920_v26 = vsel %vm380_vm4, %v919_v16, %v918_v21  ;;  %v939_v27 = vrot.slane %v930_v22, 2  ;;  %v941_v28 = vrot.slane %v931_v23, 1  ;;  %v950_v29 = vld [vmem:[%s5273_s20 + $0xe] sm:$0x1]  ;;  %v951_v30 = vld [vmem:[%s5273_s20 + $0x1e] sm:$0x1] }
 0x110   : > { %v922_v31 = vsel %vm383_vm5, %v921_v17, %v920_v26  ;;  %v938_v32 = vsel %vm398_vm0, %v937_v25, %v936_v24  ;;  %v952_v33 = vld [vmem:[%s5273_s20 + $0x2e] sm:$0x1]  ;;  %v953_v34 = vld [vmem:[%s5273_s20 + $0x3e] sm:$0x1]  ;;  %v958_v35 = vrot.slane %v951_v30, 7  ;;  %s4958_s15 = smov 56  }
 0x111   : > { %923 = vrot.lane.b32.xlu1 %v922_v31, %s4958_s15  ;;  %v940_v36 = vsel %vm401_vm1, %v939_v27, %v938_v32  ;;  %v960_v37 = vrot.slane %v952_v33, 6  ;;  %v962_v38 = vrot.slane %v953_v34, 5  ;;  %v969_v39 = vld [vmem:[%s5281_s12 + $0xf] sm:$0x1]  ;;  %v970_v40 = vld [vmem:[%s5281_s12 + $0x27] sm:$0x1] }
 0x112   : > { %v942_v41 = vsel %vm404_vm2, %v941_v28, %v940_v36  ;;  %v959_v42 = vsel %vm377_vm3, %v958_v35, %v950_v29  ;;  %v971_v43 = vld [vmem:[%s5281_s12 + $0x3f] sm:$0x1]  ;;  %v972_v44 = vld [vmem:[%s5281_s12 + $0x57] sm:$0x1]  ;;  %v977_v45 = vrot.slane %v969_v39, 4  ;;  %v978_v46 = vrot.slane %v970_v40, 3 }
 0x113   : > { %s4959_s0 = smov 55   ;;  %v961_v47 = vsel %vm380_vm4, %v960_v37, %v959_v42  ;;  %v980_v48 = vrot.slane %v971_v43, 2  ;;  %v982_v49 = vrot.slane %v972_v44, 1  ;;  %v991_v50 = vld [vmem:[%s5273_s20 + $0xf] sm:$0x1]  ;;  %s4960_s3 = smov 80  }
 0x114   : > { %943 = vrot.lane.b32.xlu0 %v942_v41, %s4959_s0  ;;  %v992_v51 = vld [vmem:[%s5273_s20 + $0x1f] sm:$0x1]  ;;  %v963_v52 = vsel %vm383_vm5, %v962_v38, %v961_v47  ;;  %v979_v53 = vsel %vm398_vm0, %v978_v46, %v977_v45  ;;  %v993_v54 = vld [vmem:[%s5273_s20 + $0x2f] sm:$0x1]  ;;  %v1010_v60 = vld [vmem:[%s5281_s12 + $0x10] sm:$0x1] }
 0x115   : > { %v994_v55 = vld [vmem:[%s5273_s20 + $0x3f] sm:$0x1]  ;;  %v999_v56 = vrot.slane %v992_v51, 7  ;;  %964 = vrot.lane.b32.xlu1 %v963_v52, %s4960_s3  ;;  %v981_v57 = vsel %vm401_vm1, %v980_v48, %v979_v53  ;;  %v1001_v58 = vrot.slane %v993_v54, 6  ;;  %v1011_v61 = vld [vmem:[%s5281_s12 + $0x28] sm:$0x1] }
 0x116   : > { %v1003_v59 = vrot.slane %v994_v55, 5  ;;  %v983_v62 = vsel %vm404_vm2, %v982_v49, %v981_v57  ;;  %v1012_v1 = vld [vmem:[%s5281_s12 + $0x40] sm:$0x1]  ;;  %v1013_v2 = vld [vmem:[%s5281_s12 + $0x58] sm:$0x1]  ;;  %v1018_v3 = vrot.slane %v1010_v60, 4 }
 0x117   : > { %v1000_v63 = vsel %vm377_vm3, %v999_v56, %v991_v50  ;;  %v1019_v4 = vrot.slane %v1011_v61, 3  ;;  %s4961_s29 = smov 79   ;;  %v1021_v6 = vrot.slane %v1012_v1, 2  ;;  %v1023_v7 = vrot.slane %v1013_v2, 1  ;;  %v368_v8 = vld [vmem:[%s5273_s20] sm:$0x1] }
 0x118   : > { %984 = vrot.lane.b32.xlu0 %v983_v62, %s4961_s29  ;;  %v1002_v5 = vsel %vm380_vm4, %v1001_v58, %v1000_v63  ;;  %v369_v11 = vld [vmem:[%s5273_s20 + $0x10] sm:$0x1]  ;;  %v370_v12 = vld [vmem:[%s5273_s20 + $0x20] sm:$0x1]  ;;  %s4962_s10 = smov 104   ;;  %s4963_s12 = smov 103  }
 0x119   : > { %v1004_v9 = vsel %vm383_vm5, %v1003_v59, %v1002_v5  ;;  %v1020_v10 = vsel %vm398_vm0, %v1019_v4, %v1018_v3  ;;  %v371_v13 = vld [vmem:[%s5273_s20 + $0x30] sm:$0x1]  ;;  %v376_v15 = vrot.slane %v369_v11, 7  ;;  %v379_v16 = vrot.slane %v370_v12, 6  ;;  %s4964_s20 = smov 25   ;;  %v5569_v52 = vld [vmem:[#allocation2] sm:$0xff] }
 0x11a   : > { %1005 = vrot.lane.b32.xlu1 %v1004_v9, %s4962_s10  ;;  %v1022_v14 = vsel %vm401_vm1, %v1021_v6, %v1020_v10  ;;  %v382_v17 = vrot.slane %v371_v13, 5  ;;  %vm386_vm6 = vcmask 125952   ;;  %vm825_vm7 = vcmask 64512   ;;  %s4966_s16 = smov 1   ;;  %s4967_s9 = smov 105  }
 0x11b   : > { %v1024_v18 = vsel %vm404_vm2, %v1023_v7, %v1022_v14  ;;  %v378_v19 = vsel %vm377_vm3, %v376_v15, %v368_v8  ;;  %826 = vst.msk [vmem:[#allocation2 + $0x18] sm:$0xff] %vm825_vm7, %v4932_v0  ;;  %vm409_vm8 = vcmask 130052   ;;  %vm411_vm9 = vcmask 195712   ;;  %v1032_v57 = vld [vmem:[#allocation10] sm:$0xf]  ;;  %s4128_s8 = scalar_lea.sflag [#allocation6], %s5269_s4 }
 0x11c   : > { %1025 = vrot.lane.b32.xlu0 %v1024_v18, %s4963_s12  ;;  %v381_v20 = vsel %vm380_vm4, %v379_v16, %v378_v19  ;;  %vm618_vm10 = vcmask 64516   ;;  %vm596_vm11 = vcmask 60416   ;;  %vm620_vm12 = vcmask 130112   ;;  %v1039_v62 = vld [vmem:[#allocation9 + $0x4] sm:$0xf] }
 0x11d   : > { %v384_v21 = vsel %vm383_vm5, %v382_v17, %v381_v20  ;;  %vm430_vm13 = vcmask 322752   ;;  %vm450_vm14 = vcmask 326852   ;;  %vm452_vm15 = vcmask 392512   ;;  %v1033_v7 = vld [vmem:[#allocation9] sm:$0xf] }
 0x11e   : > { %387 = vst.msk [vmem:[#allocation2 + $0x8] sm:$0xf] %vm386_vm6, %v384_v21  ;;  %vm639_vm0 = vcmask 257152   ;;  %vm659_vm1 = vcmask 261252   ;;  %vm661_vm2 = vcmask 326912   ;;  %vm471_vm3 = vcmask 519552  }
 0x11f   : > { %vm491_vm4 = vcmask 523652   ;;  %vm493_vm5 = vcmask 589312   ;;  %vm680_vm6 = vcmask 453952   ;;  %v4968_v56 = vmov 0   ;;  %v1363_v15 = vld [vmem:[#allocation9 + $0x8] sm:$0xf] }
 0x120   : > { %4659 = vset.pattern.permute.xlu1 %v4968_v56  ;;  %4660 = vset.pattern.permute.xlu0 %v4968_v56 }
 0x14f   : > { %v407_v22 = vpop.permute.xlu0 %406 }
 0x150   : > { %410 = vst.msk [vmem:[#allocation2 + $0x8] sm:$0xf0] %vm409_vm8, %v407_v22  ;;  %vm700_vm8 = vcmask 458052  }
 0x151   : > { %v5535_v23 = vpop.permute.xlu1 %613  ;;  %412 = vst.msk [vmem:[#allocation2 + $0x8] sm:$0xff] %vm411_vm9, %v4932_v0  ;;  %vm702_vm9 = vcmask 523712  }
 0x152   : > { %619 = vst.msk [vmem:[#allocation2 + $0x10] sm:$0xf0] %vm618_vm10, %v5535_v23  ;;  %vm512_vm10 = vcmask 716352  }
 0x154   : > { %v5539_v24 = vpop.permute.xlu0 %591 }
 0x155   : > { %597 = vst.msk [vmem:[#allocation2 + $0x10] sm:$0xf] %vm596_vm11, %v5539_v24  ;;  %v428_v25 = vpop.permute.xlu1 %427  ;;  %vm532_vm11 = vcmask 720452  }
 0x156   : > { %621 = vst.msk [vmem:[#allocation2 + $0x10] sm:$0xff] %vm620_vm12, %v4932_v0  ;;  %vm534_vm12 = vcmask 786112  }
 0x157   : > { %431 = vst.msk [vmem:[#allocation2 + $0x8] sm:$0xf] %vm430_vm13, %v428_v25  ;;  %vm721_vm13 = vcmask 650752  }
 0x158   : > { %v448_v26 = vpop.permute.xlu0 %447 }
 0x159   : > { %451 = vst.msk [vmem:[#allocation2 + $0x8] sm:$0xf0] %vm450_vm14, %v448_v26  ;;  %vm741_vm14 = vcmask 654852  }
 0x15a   : > { %v637_v27 = vpop.permute.xlu1 %636  ;;  %453 = vst.msk [vmem:[#allocation2 + $0x8] sm:$0xff] %vm452_vm15, %v4932_v0  ;;  %vm743_vm15 = vcmask 720512  }
 0x15b   : > { %640 = vst.msk [vmem:[#allocation2 + $0x10] sm:$0xf] %vm639_vm0, %v637_v27  ;;  %vm553_vm0 = vcmask 913152  }
 0x15c   : > { %v657_v28 = vpop.permute.xlu0 %656 }
 0x15d   : > { %660 = vst.msk [vmem:[#allocation2 + $0x10] sm:$0xf0] %vm659_vm1, %v657_v28  ;;  %vm573_vm1 = vcmask 917252  }
 0x15e   : > { %v469_v29 = vpop.permute.xlu1 %468  ;;  %662 = vst.msk [vmem:[#allocation2 + $0x10] sm:$0xff] %vm661_vm2, %v4932_v0  ;;  %vm575_vm2 = vcmask 982912  }
 0x15f   : > { %472 = vst.msk [vmem:[#allocation2 + $0x8] sm:$0xf] %vm471_vm3, %v469_v29  ;;  %vm594_vm3 = vcmask 1044416  }
 0x160   : > { %v489_v30 = vpop.permute.xlu0 %488 }
 0x161   : > { %492 = vst.msk [vmem:[#allocation2 + $0x8] sm:$0xf0] %vm491_vm4, %v489_v30  ;;  %vm616_vm4 = vcmask 1048516   ;;  %v1691_v30 = vld [vmem:[#allocation9 + $0x10] sm:$0xf] }
 0x162   : > { %v678_v31 = vpop.permute.xlu1 %677  ;;  %494 = vst.msk [vmem:[#allocation2 + $0x8] sm:$0xff] %vm493_vm5, %v4932_v0  ;;  %vm762_vm5 = vcmask 847552  }
 0x163   : > { %681 = vst.msk [vmem:[#allocation2 + $0x10] sm:$0xf] %vm680_vm6, %v678_v31  ;;  %vm782_vm6 = vcmask 851652  }
 0x164   : > { %v698_v32 = vpop.permute.xlu0 %697 }
 0x165   : > { %701 = vst.msk [vmem:[#allocation2 + $0x10] sm:$0xf0] %vm700_vm8, %v698_v32  ;;  %vm784_vm8 = vcmask 917312  }
 0x166   : > { %v510_v33 = vpop.permute.xlu1 %509  ;;  %703 = vst.msk [vmem:[#allocation2 + $0x10] sm:$0xff] %vm702_vm9, %v4932_v0  ;;  %vm803_vm9 = vcmask 1044352  }
 0x167   : > { %513 = vst.msk [vmem:[#allocation2 + $0x8] sm:$0xf] %vm512_vm10, %v510_v33  ;;  %vm823_vm10 = vcmask 1048452  }
 0x168   : > { %v530_v34 = vpop.permute.xlu0 %529 }
 0x169   : > { %533 = vst.msk [vmem:[#allocation2 + $0x8] sm:$0xf0] %vm532_vm11, %v530_v34  ;;  %vm844_vm11 = vcmask 191552  }
 0x16a   : > { %v719_v35 = vpop.permute.xlu1 %718  ;;  %535 = vst.msk [vmem:[#allocation2 + $0x8] sm:$0xff] %vm534_vm12, %v4932_v0  ;;  %vm864_vm12 = vcmask 195652  }
 0x16b   : > { %722 = vst.msk [vmem:[#allocation2 + $0x10] sm:$0xf] %vm721_vm13, %v719_v35  ;;  %vm866_vm13 = vcmask 261312  }
 0x16d   : > { %v739_v36 = vpop.permute.xlu0 %738 }
 0x16e   : > { %742 = vst.msk [vmem:[#allocation2 + $0x10] sm:$0xf0] %vm741_vm14, %v739_v36  ;;  %v551_v37 = vpop.permute.xlu1 %550  ;;  %vm885_vm14 = vcmask 388352  }
 0x16f   : > { %744 = vst.msk [vmem:[#allocation2 + $0x10] sm:$0xff] %vm743_vm15, %v4932_v0  ;;  %vm905_vm15 = vcmask 392452  }
 0x170   : > { %554 = vst.msk [vmem:[#allocation2 + $0x8] sm:$0xf] %vm553_vm0, %v551_v37  ;;  %vm907_vm0 = vcmask 458112  }
 0x171   : > { %v571_v38 = vpop.permute.xlu0 %570 }
 0x172   : > { %574 = vst.msk [vmem:[#allocation2 + $0x8] sm:$0xf0] %vm573_vm1, %v571_v38  ;;  %vm926_vm1 = vcmask 585152   ;;  %v1840_v38 = vld [vmem:[#allocation9 + $0x14] sm:$0xf] }
 0x173   : > { %576 = vst.msk [vmem:[#allocation2 + $0x8] sm:$0xff] %vm575_vm2, %v4932_v0  ;;  %v760_v39 = vpop.permute.xlu1 %759  ;;  %vm946_vm2 = vcmask 589252  }
 0x174   : > { %595 = vst.msk [vmem:[#allocation2 + $0x8] sm:$0xf] %vm594_vm3, %v5539_v24  ;;  %vm948_vm3 = vcmask 654912  }
 0x175   : > { %617 = vst.msk [vmem:[#allocation2 + $0x8] sm:$0xf0] %vm616_vm4, %v5535_v23  ;;  %v780_v40 = vpop.permute.xlu0 %779  ;;  %vm967_vm4 = vcmask 781952   ;;  %v1527_v23 = vld [vmem:[#allocation9 + $0xc] sm:$0xf] }
 0x176   : > { %763 = vst.msk [vmem:[#allocation2 + $0x10] sm:$0xf] %vm762_vm5, %v760_v39  ;;  %vm987_vm5 = vcmask 786052  }
 0x177   : > { %783 = vst.msk [vmem:[#allocation2 + $0x10] sm:$0xf0] %vm782_vm6, %v780_v40  ;;  %v801_v41 = vpop.permute.xlu1 %800  ;;  %vm989_vm6 = vcmask 851712  }
 0x178   : > { %785 = vst.msk [vmem:[#allocation2 + $0x10] sm:$0xff] %vm784_vm8, %v4932_v0  ;;  %vm1008_vm8 = vcmask 978752  }
 0x179   : > { %804 = vst.msk [vmem:[#allocation2 + $0x10] sm:$0xf] %vm803_vm9, %v801_v41  ;;  %v821_v42 = vpop.permute.xlu0 %820  ;;  %vm1028_vm9 = vcmask 982852  }
 0x17a   : > { %824 = vst.msk [vmem:[#allocation2 + $0x10] sm:$0xf0] %vm823_vm10, %v821_v42  ;;  %vm1030_vm10 = vcmask 1048512  }
 0x17b   : > { %v842_v44 = vpop.permute.xlu1 %841 }
 0x17c   : > { %v5553_v43 = vld [vmem:[#allocation2 + $0x8] sm:$0xff]  ;;  %845 = vst.msk [vmem:[#allocation2 + $0x18] sm:$0xf] %vm844_vm11, %v842_v44  ;;  %vm4965_vm11 = vmmov 0  }
 0x17d   : > { %1046 = vrot.lane.b32.xlu1 %v5553_v43, %s4936_s17  ;;  %v862_v45 = vpop.permute.xlu0 %861  ;;  %4395 = vmatprep.mubr.msk.f32.mxu1 %vm4965_vm11, %v5569_v52 }
 0x17e   : > { %865 = vst.msk [vmem:[#allocation2 + $0x18] sm:$0xf0] %vm864_vm12, %v862_v45  ;;  %vm1052_vm12 = vcmask 195584  }
 0x17f   : > { %v883_v46 = vpop.permute.xlu1 %882  ;;  %867 = vst.msk [vmem:[#allocation2 + $0x18] sm:$0xff] %vm866_vm13, %v4932_v0  ;;  %vm1211_vm13 = vcmask 203776  }
 0x180   : > { %886 = vst.msk [vmem:[#allocation2 + $0x18] sm:$0xf] %vm885_vm14, %v883_v46  ;;  %vm1372_vm14 = vcmask 187392   ;;  %v2012_v46 = vld [vmem:[#allocation9 + $0x18] sm:$0xf] }
 0x181   : > { %1044 = vrot.lane.b32.xlu1 %v4932_v0, %s4936_s17  ;;  %v903_v47 = vpop.permute.xlu0 %902  ;;  %v5560_v48 = vld [vmem:[#allocation2 + $0x10] sm:$0xff] }
 0x182   : > { %906 = vst.msk [vmem:[#allocation2 + $0x18] sm:$0xf0] %vm905_vm15, %v903_v47  ;;  %1048 = vrot.lane.b32.xlu0 %v5560_v48, %s4936_s17  ;;  %vm1536_vm15 = vcmask 7168  }
 0x183   : > { %v924_v49 = vpop.permute.xlu1 %923  ;;  %908 = vst.msk [vmem:[#allocation2 + $0x18] sm:$0xff] %vm907_vm0, %v4932_v0  ;;  %vm1857_vm0 = vcmask 1039360  }
 0x184   : > { %927 = vst.msk [vmem:[#allocation2 + $0x18] sm:$0xf] %vm926_vm1, %v924_v49  ;;  %vm5927_vm1 = vcmask 859136  }
 0x185   : > { %1207 = vrot.lane.b32.xlu1 %v5560_v48, %s4964_s20 }
 0x186   : > { %v944_v50 = vpop.permute.xlu0 %943  ;;  %1205 = vrot.lane.b32.xlu0 %v5553_v43, %s4964_s20 }
 0x187   : > { %947 = vst.msk [vmem:[#allocation2 + $0x18] sm:$0xf0] %vm946_vm2, %v944_v50  ;;  %v965_v51 = vpop.permute.xlu1 %964  ;;  %vm5926_vm2 = vcmask 850944  }
 0x188   : > { %949 = vst.msk [vmem:[#allocation2 + $0x18] sm:$0xff] %vm948_vm3, %v5569_v52  ;;  %vm5925_vm3 = vcmask 842752  }
 0x189   : > { %1366 = vrot.lane.b32.xlu1 %v5553_v43, %s4937_s7  ;;  %968 = vst.msk [vmem:[#allocation2 + $0x18] sm:$0xf] %vm967_vm4, %v965_v51 }
 0x18a   : > { %v985_v0 = vpop.permute.xlu0 %984  ;;  %1203 = vrot.lane.b32.xlu0 %v5569_v52, %s4964_s20 }
 0x18b   : > { %988 = vst.msk [vmem:[#allocation2 + $0x18] sm:$0xf0] %vm987_vm5, %v985_v0  ;;  %v2176_v0 = vld [vmem:[#allocation9 + $0x1c] sm:$0xf] }
 0x18c   : > { %v1006_v53 = vpop.permute.xlu1 %1005  ;;  %990 = vst.msk [vmem:[#allocation2 + $0x18] sm:$0xff] %vm989_vm6, %v5569_v52 }
 0x18d   : > { %1364 = vrot.lane.b32.xlu1 %v5569_v52, %s4937_s7  ;;  %1009 = vst.msk [vmem:[#allocation2 + $0x18] sm:$0xf] %vm1008_vm8, %v1006_v53 }
 0x18e   : > { %v1026_v54 = vpop.permute.xlu0 %1025  ;;  %1368 = vrot.lane.b32.xlu0 %v5560_v48, %s4937_s7 }
 0x18f   : > { %1029 = vst.msk [vmem:[#allocation2 + $0x18] sm:$0xf0] %vm1028_vm9, %v1026_v54 }
 0x190   : > { %1031 = vst.msk [vmem:[#allocation2 + $0x18] sm:$0xff] %vm1030_vm10, %v5569_v52 }
 0x191   : > { %1532 = vrot.lane.b32.xlu1 %v5560_v48, %s4966_s16 }
 0x192   : > { %1530 = vrot.lane.b32.xlu0 %v5553_v43, %s4966_s16 }
 0x196   : > { %1528 = vrot.lane.b32.xlu0 %v5569_v52, %s4966_s16 }
 0x197   : > { %v5590_v55 = vld [vmem:[#allocation2 + $0x18] sm:$0xff] }
 0x198   : > { %1050 = vrot.lane.b32.xlu1 %v5590_v55, %s4936_s17 }
 0x19a   : > { %1209 = vrot.lane.b32.xlu0 %v5590_v55, %s4964_s20 }
 0x19c   : > { %1534 = vrot.lane.b32.xlu1 %v5590_v55, %s4966_s16 }
 0x19e   : > { %1853 = vrot.lane.b32.xlu0 %v5590_v55, %s4933_s27 }
 0x1a0   : > { %1851 = vrot.lane.b32.xlu1 %v5560_v48, %s4933_s27 }
 0x1a2   : > { %1370 = vrot.lane.b32.xlu0 %v5590_v55, %s4937_s7 }
 0x1a4   : > { %1849 = vrot.lane.b32.xlu1 %v5553_v43, %s4933_s27 }
 0x1a6   : > { %2015 = vrot.lane.b32.xlu0 %v5560_v48, %s4967_s9 }
 0x1a8   : > { %2017 = vrot.lane.b32.xlu1 %v5590_v55, %s4967_s9 }
 0x1aa   : > { %2013 = vrot.lane.b32.xlu0 %v5553_v43, %s4967_s9 }
 0x1ac   : > { %1855 = vrot.lane.b32.xlu1 %v5569_v52, %s4933_s27 }
 0x1ae   : > { %2179 = vrot.lane.b32.xlu0 %v5560_v48, %s4962_s10 }
 0x1b0   : > { %2181 = vrot.lane.b32.xlu1 %v5590_v55, %s4962_s10 }
 0x1b2   : > { %2177 = vrot.lane.b32.xlu0 %v5553_v43, %s4962_s10 }
 0x1b4   : > { %2019 = vrot.lane.b32.xlu1 %v5569_v52, %s4967_s9 }
 0x1b6   : > { %2183 = vrot.lane.b32.xlu0 %v5569_v52, %s4962_s10 }
 0x1b8   : > { %2343 = vrot.lane.b32.xlu1 %v5560_v48, %s4963_s12 }
 0x1ba   : > { %2345 = vrot.lane.b32.xlu0 %v5590_v55, %s4963_s12 }
 0x1bc   : > { %2341 = vrot.lane.b32.xlu1 %v5553_v43, %s4963_s12 }
 0x1be   : > { %2347 = vrot.lane.b32.xlu0 %v5569_v52, %s4963_s12 }
 0x1c0   : > { %2505 = vperm.xlu1 %4659, %v1032_v57  }
 0x1ef   : > { %v1047_v58 = vpop.permute.xlu1 %1046 }
 0x1f3   : > { %v1045_v59 = vpop.permute.xlu1 %1044 }
 0x1f4   : > { %v1049_v60 = vpop.permute.xlu0 %1048  ;;  %v1053_v1 = vsel %vm1052_vm12, %v1045_v59, %v1047_v58 }
 0x1f5   : > { %v1054_v61 = vsel %vm1052_vm12, %v1047_v58, %v1049_v60  ;;  %v2340_v58 = vld [vmem:[#allocation9 + $0x20] sm:$0xf] }
 0x1f6   : > { %1062 = vmatprep.subr.mxu0 %v1054_v61 }
 0x1f7   : > { %v1208_v63 = vpop.permute.xlu1 %1207  ;;  %1063 = vmatpush1.msra.mxu0 %v1053_v1 }
 0x1f8   : > { %v1206_v2 = vpop.permute.xlu0 %1205  ;;  %4290 = vmatmul.mubr.msk.f32.vlgmr.msra.gmra.mrb[0].mxu0 %vm825_vm7, %v1039_v62 }
 0x1f9   : > { %v1213_v3 = vsel %vm1211_vm13, %v1206_v2, %v1208_v63  ;;  %1285 = vmatprep.mubr.f32.mxu0 %v5569_v52 }
 0x1fa   : > { %1221 = vmatprep.subr.mxu0 %v1213_v3 }
 0x1fb   : > { %v1367_v4 = vpop.permute.xlu1 %1366 }
 0x1fc   : > { %v1204_v5 = vpop.permute.xlu0 %1203 }
 0x1fd   : > { %v1212_v6 = vsel %vm1211_vm13, %v1204_v5, %v1206_v2 }
 0x1fe   : > { %1222 = vmatpush1.msra.mxu0 %v1212_v6 }
 0x1ff   : > { %v1365_v8 = vpop.permute.xlu1 %1364 }
 0x200   : > { %v1369_v9 = vpop.permute.xlu0 %1368  ;;  %4292 = vmatmul.mubr.msk.f32.vlgmr.msra.gmra.mrb[0].mxu0 %vm825_vm7, %v1033_v7  ;;  %v1373_v11 = vsel %vm1372_vm14, %v1365_v8, %v1367_v4 }
 0x201   : > { %v1374_v10 = vsel %vm1372_vm14, %v1367_v4, %v1369_v9  ;;  %1446 = vmatprep.mubr.f32.mxu0 %v5569_v52 }
 0x202   : > { %1382 = vmatprep.subr.mxu0 %v1374_v10 }
 0x203   : > { %1383 = vmatpush1.msra.mxu0 %v1373_v11  ;;  %v1533_v12 = vpop.permute.xlu1 %1532 }
 0x204   : > { %v1531_v13 = vpop.permute.xlu0 %1530 }
 0x205   : > { %v1538_v14 = vsel %vm1536_vm15, %v1531_v13, %v1533_v12 }
 0x206   : > { %1546 = vmatprep.subr.mxu0 %v1538_v14 }
 0x208   : > { %v1529_v16 = vpop.permute.xlu0 %1528  ;;  %4294 = vmatmul.mubr.msk.f32.vlgmr.msra.gmra.mrb[0].mxu0 %vm825_vm7, %v1363_v15 }
 0x209   : > { %v1537_v17 = vsel %vm1536_vm15, %v1529_v16, %v1531_v13  ;;  %1610 = vmatprep.mubr.f32.mxu0 %v5569_v52 }
 0x20a   : > { %v1051_v18 = vpop.permute.xlu1 %1050  ;;  %1547 = vmatpush1.msra.mxu0 %v1537_v17 }
 0x20b   : > { %v1055_v19 = vsel %vm1052_vm12, %v1049_v60, %v1051_v18  ;;  %1695 = vmatprep.subr.mxu0 %v5560_v48 }
 0x20c   : > { %4394 = vmatpush3.msra.mxu1 %v1055_v19  ;;  %v1210_v20 = vpop.permute.xlu0 %1209 }
 0x20d   : > { %4398 = vmatprep.subr.mxu1 %v5569_v52  ;;  %4396 = vmatmul.mubr.msk.f32.vlgmr.msra.gmra.mrb[0].mxu1 %vm825_vm7, %v1039_v62  ;;  %v1214_v21 = vsel %vm1211_vm13, %v1208_v63, %v1210_v20  ;;  %v2514_v62 = vlaneseq }
 0x20e   : > { %v1535_v22 = vpop.permute.xlu1 %1534  ;;  %4400 = vmatprep.mubr.msk.f32.mxu1 %vm4965_vm11, %v5569_v52  ;;  %4399 = vmatpush3.msra.mxu1 %v1214_v21 }
 0x20f   : > { %4403 = vmatprep.subr.mxu1 %v5569_v52  ;;  %v1539_v32 = vsel %vm1536_vm15, %v1533_v12, %v1535_v22  ;;  %v2515_v3 = vand.u32 127, %v2514_v62 }
 0x210   : > { %v1854_v24 = vpop.permute.xlu0 %1853  ;;  %4296 = vmatmul.mubr.msk.f32.vlgmr.msra.gmra.mrb[0].mxu0 %vm825_vm7, %v1527_v23 }
 0x211   : > { %4401 = vmatmul.mubr.msk.f32.vlgmr.msra.gmra.mrb[2].mxu1 %vm825_vm7, %v1033_v7  ;;  %1696 = vmatpush1.msra.mxu0 %v5553_v43  ;;  %v2517_v4 = vadd.s32 256, %v2515_v3  ;;  %v2516_v10 = vadd.s32 128, %v2515_v3 }
 0x212   : > { %v1852_v25 = vpop.permute.xlu1 %1851  ;;  %4405 = vmatprep.mubr.msk.f32.mxu1 %vm4965_vm11, %v5569_v52  ;;  %1759 = vmatprep.mubr.f32.mxu0 %v5569_v52 }
 0x213   : > { %v1859_v26 = vsel %vm1857_vm0, %v1852_v25, %v1854_v24  ;;  %v5719_v16 = vmul.u32.u64.low 2863311531, %v2516_v10  ;;  %v5720_v17 = vmul.u32.u64.high 2863311531, %v2516_v10, %v5719_v16 }
 0x214   : > { %1867 = vmatprep.subr.mxu0 %v1859_v26  ;;  %v1371_v27 = vpop.permute.xlu0 %1370 }
 0x215   : > { %v1375_v28 = vsel %vm1372_vm14, %v1369_v9, %v1371_v27  ;;  %v5713_v8 = vmul.u32.u64.low 2863311531, %v2517_v4  ;;  %v5714_v9 = vmul.u32.u64.high 2863311531, %v2517_v4, %v5713_v8  ;;  %v2535_v27 = vshrl.u32 %v5720_v17, 4 }
 0x216   : > { %v1850_v29 = vpop.permute.xlu1 %1849  ;;  %4404 = vmatpush3.msra.mxu1 %v1375_v28 }
 0x217   : > { %v1858_v31 = vsel %vm1857_vm0, %v1850_v29, %v1852_v25  ;;  %4406 = vmatmul.mubr.msk.f32.vlgmr.msra.gmra.mrb[4].mxu1 %vm825_vm7, %v1363_v15  ;;  %4408 = vmatprep.subr.mxu1 %v5569_v52  ;;  %v5716_v14 = vmul.u32.u64.low 2863311531, %v2515_v3  ;;  %v5717_v15 = vmul.u32.u64.high 2863311531, %v2515_v3, %v5716_v14  ;;  %v2546_v21 = vshrl.u32 %v5714_v9, 4 }
 0x218   : > { %v2016_v33 = vpop.permute.xlu0 %2015  ;;  %4409 = vmatpush3.msra.mxu1 %v1539_v32  ;;  %4298 = vmatmul.mubr.msk.f32.vlgmr.msra.gmra.mrb[0].mxu0 %vm825_vm7, %v1691_v30 }
 0x219   : > { %1868 = vmatpush1.msra.mxu0 %v1858_v31  ;;  %4410 = vmatprep.mubr.msk.f32.mxu1 %vm4965_vm11, %v5569_v52  ;;  %v2524_v25 = vshrl.u32 %v5717_v15, 4  ;;  %v2547_v26 = vmul.u32 24, %v2546_v21 }
 0x21a   : > { %v2018_v34 = vpop.permute.xlu1 %2017  ;;  %4413 = vmatprep.subr.mxu1 %v5569_v52  ;;  %1931 = vmatprep.mubr.f32.mxu0 %v5569_v52 }
 0x21b   : > { %v2023_v35 = vsel %vm5927_vm1, %v2016_v33, %v2018_v34  ;;  %4411 = vmatmul.mubr.msk.f32.vlgmr.msra.gmra.mrb[6].mxu1 %vm825_vm7, %v1527_v23  ;;  %v2525_v31 = vmul.u32 24, %v2524_v25  ;;  %v2548_v32 = vsub.s32 %v2517_v4, %v2547_v26  ;;  %v2919_v26 = vld [vmem:[#allocation12 + $0x8] sm:$0xf] }
 0x21c   : > { %2031 = vmatprep.subr.mxu0 %v2023_v35  ;;  %v2014_v36 = vpop.permute.xlu0 %2013  ;;  %4414 = vmatpush3.msra.mxu1 %v5590_v55 }
 0x21d   : > { %4415 = vmatprep.mubr.msk.f32.mxu1 %vm4965_vm11, %v5569_v52  ;;  %4418 = vmatprep.subr.mxu1 %v5569_v52  ;;  %v2022_v40 = vsel %vm5927_vm1, %v2014_v36, %v2016_v33  ;;  %v2536_v33 = vmul.u32 24, %v2535_v27  ;;  %vm2556_vm4 = vcmp.lt.s32.totalorder %v2548_v32, 0 }
 0x21e   : > { %v1856_v37 = vpop.permute.xlu1 %1855 }
 0x21f   : > { %v1860_v39 = vsel %vm1857_vm0, %v1854_v24, %v1856_v37  ;;  %4416 = vmatmul.mubr.msk.f32.vlgmr.msra.gmra.mrb[8].mxu1 %vm825_vm7, %v1691_v30  ;;  %v2526_v37 = vsub.s32 %v2515_v3, %v2525_v31 }
 0x220   : > { %4419 = vmatpush3.msra.mxu1 %v1860_v39  ;;  %v2180_v41 = vpop.permute.xlu0 %2179  ;;  %4300 = vmatmul.mubr.msk.f32.vlgmr.msra.gmra.mrb[0].mxu0 %vm825_vm7, %v1840_v38  ;;  %v2562_v39 = vadd.s32 24, %v2548_v32 }
 0x221   : > { %2032 = vmatpush1.msra.mxu0 %v2022_v40  ;;  %4420 = vmatprep.mubr.msk.f32.mxu1 %vm4965_vm11, %v5569_v52  ;;  %vm2551_vm6 = vcmp.ne.s32.totalorder %v2526_v37, 0  ;;  %vm2554_vm8 = vcmp.lt.s32.totalorder %v2526_v37, 0 }
 0x222   : > { %v2182_v42 = vpop.permute.xlu1 %2181  ;;  %4423 = vmatprep.subr.mxu1 %v5569_v52  ;;  %2095 = vmatprep.mubr.f32.mxu0 %v5569_v52 }
 0x223   : > { %v2187_v43 = vsel %vm5926_vm2, %v2180_v41, %v2182_v42  ;;  %4421 = vmatmul.mubr.msk.f32.vlgmr.msra.gmra.mrb[10].mxu1 %vm825_vm7, %v1840_v38  ;;  %v2537_v38 = vsub.s32 %v2516_v10, %v2536_v33 }
 0x224   : > { %2195 = vmatprep.subr.mxu0 %v2187_v43  ;;  %v2178_v44 = vpop.permute.xlu0 %2177  ;;  %4425 = vmatprep.mubr.msk.f32.mxu1 %vm4965_vm11, %v5569_v52 }
 0x225   : > { %v2186_v48 = vsel %vm5926_vm2, %v2178_v44, %v2180_v41  ;;  %vm2552_vm9 = vcmp.ne.s32.totalorder %v2537_v38, 0  ;;  %vm2555_vm10 = vcmp.lt.s32.totalorder %v2537_v38, 0 }
 0x226   : > { %v2020_v45 = vpop.permute.xlu1 %2019 }
 0x227   : > { %v2024_v47 = vsel %vm5927_vm1, %v2018_v34, %v2020_v45  ;;  %v2561_v45 = vadd.s32 24, %v2537_v38 }
 0x228   : > { %4424 = vmatpush3.msra.mxu1 %v2024_v47  ;;  %v2184_v49 = vpop.permute.xlu0 %2183  ;;  %4302 = vmatmul.mubr.msk.f32.vlgmr.msra.gmra.mrb[0].mxu0 %vm825_vm7, %v2012_v46 }
 0x229   : > { %4426 = vmatmul.mubr.msk.f32.vlgmr.msra.gmra.mrb[12].mxu1 %vm825_vm7, %v2012_v46  ;;  %v2188_v50 = vsel %vm5926_vm2, %v2182_v42, %v2184_v49  ;;  %2196 = vmatpush1.msra.mxu0 %v2186_v48  ;;  %v2560_v42 = vadd.s32 24, %v2526_v37  ;;  %vm2558_vm2 = vmand %vm2555_vm10, %vm2552_vm9 }
 0x22a   : > { %4428 = vmatprep.subr.mxu1 %v5569_v52  ;;  %v2344_v51 = vpop.permute.xlu1 %2343  ;;  %4430 = vmatprep.mubr.msk.f32.mxu1 %vm4965_vm11, %v5569_v52 }
 0x22b   : > { %4429 = vmatpush3.msra.mxu1 %v2188_v50  ;;  %2259 = vmatprep.mubr.f32.mxu0 %v5569_v52 }
 0x22c   : > { %4433 = vmatprep.subr.mxu1 %v5569_v52  ;;  %v2346_v53 = vpop.permute.xlu0 %2345 }
 0x22d   : > { %4431 = vmatmul.mubr.msk.f32.vlgmr.msra.gmra.mrb[14].mxu1 %vm825_vm7, %v2176_v0  ;;  %v2351_v55 = vsel %vm5925_vm3, %v2344_v51, %v2346_v53 }
 0x22e   : > { %v2342_v54 = vpop.permute.xlu1 %2341  ;;  %4435 = vmatprep.mubr.msk.f32.mxu1 %vm4965_vm11, %v5569_v52  ;;  %2359 = vmatprep.subr.mxu0 %v2351_v55 }
 0x22f   : > { %v2350_v56 = vsel %vm5925_vm3, %v2342_v54, %v2344_v51  ;;  %v2564_v51 = vsel %vm2558_vm2, %v2561_v45, %v2537_v38  ;;  %vm2605_vm2 = vcmask 31744  }
 0x230   : > { %v2348_v57 = vpop.permute.xlu0 %2347  ;;  %4304 = vmatmul.mubr.msk.f32.vlgmr.msra.gmra.mrb[0].mxu0 %vm825_vm7, %v2176_v0 }
 0x231   : > { %v2352_v59 = vsel %vm5925_vm3, %v2346_v53, %v2348_v57  ;;  %2360 = vmatpush1.msra.mxu0 %v2350_v56  ;;  %2423 = vmatprep.mubr.f32.mxu0 %v5569_v52  ;;  %vm2557_vm3 = vmand %vm2554_vm8, %vm2551_vm6 }
 0x232   : > { %4434 = vmatpush3.msra.mxu1 %v2352_v59  ;;  %v2563_v48 = vsel %vm2557_vm3, %v2560_v42, %v2526_v37  ;;  %v3263_v42 = vld [vmem:[#allocation12 + $0x10] sm:$0xf] }
 0x233   : > { %4436 = vmatmul.mubr.msk.f32.vlgmr.msra.gmra.mrb[16].mxu1 %vm825_vm7, %v2340_v58  ;;  %4438 = vmatprep.subr.mxu1 %v5569_v52 }
 0x234   : > { %4440 = vmatprep.mubr.msk.f32.mxu1 %vm4965_vm11, %v5569_v52 }
 0x238   : > { %4306 = vmatmul.mubr.msk.f32.vlgmr.msra.gmra.mrb[0].mxu0 %vm825_vm7, %v2340_v58  ;;  %vm2553_vm7 = vcmp.ne.s32.totalorder %v2548_v32, 0 }
 0x239   : > { %2680 = vmatprep.mubr.f32.mxu0 %v5569_v52  ;;  %vm2559_vm5 = vmand %vm2556_vm4, %vm2553_vm7  ;;  %vm2566_vm7 = vcmp.lt.s32.totalorder %v2563_v48, 16  ;;  %vm2567_vm4 = vcmp.lt.s32.totalorder %v2564_v51, 16 }
 0x23a   : > { %v2565_v44 = vsel %vm2559_vm5, %v2562_v39, %v2548_v32  ;;  %vm5959_vm5 = vcmask 842752  }
 0x23b   : > { %vm2568_vm1 = vcmp.lt.s32.totalorder %v2565_v44, 16  ;;  %vm5960_vm6 = vmmov %vm5959_vm5 }
 0x23c   : > { %vm5961_vm8 = vmmov %vm5959_vm5 }
 0x23f   : > { %v2506_v41 = vpop.permute.xlu1 %2505 }
 0x2e0   : > { %v1199_v60 = vpop.f32.mrb[0].mxu1 }
 0x2e1   : > { %v4397_v61 = vpop.f32.mrb[1].mxu1 }
 0x2e4   : > { %v1358_v63 = vpop.f32.mrb[2].mxu1 }
 0x2e5   : > { %v1359_v1 = vadd.f32 %v1358_v63, %v1199_v60  ;;  %v4402_v2 = vpop.f32.mrb[3].mxu1 }
 0x2ea   : > { %v1519_v5 = vpop.f32.mrb[4].mxu1 }
 0x2eb   : > { %v1525_v6 = vadd.f32 %v1519_v5, %v1359_v1  ;;  %v4407_v7 = vpop.f32.mrb[5].mxu1  ;;  %v2584_v5 = vld [vmem:[#allocation13] sm:$0xf] }
 0x2ee   : > { %v1683_v11 = vpop.f32.mrb[6].mxu1 }
 0x2ef   : > { %v1689_v12 = vadd.f32 %v1683_v11, %v1525_v6  ;;  %v4412_v13 = vpop.f32.mrb[7].mxu1  ;;  %v2589_v11 = vld [vmem:[#allocation12 + $0x4] sm:$0xf] }
 0x2f2   : > { %v1832_v18 = vpop.f32.mrb[8].mxu1 }
 0x2f3   : > { %v1838_v19 = vadd.f32 %v1832_v18, %v1689_v12  ;;  %v4417_v20 = vpop.f32.mrb[9].mxu1 }
 0x2f6   : > { %v2004_v22 = vpop.f32.mrb[10].mxu1 }
 0x2f7   : > { %v2010_v23 = vadd.f32 %v2004_v22, %v1838_v19  ;;  %v4422_v24 = vpop.f32.mrb[11].mxu1  ;;  %v2585_v19 = vld [vmem:[#allocation12] sm:$0xf] }
 0x2fc   : > { %v2168_v28 = vpop.f32.mrb[12].mxu1 }
 0x2fd   : > { %v2174_v29 = vadd.f32 %v2168_v28, %v2010_v23  ;;  %v4427_v30 = vpop.f32.mrb[13].mxu1 }
 0x300   : > { %v2332_v34 = vpop.f32.mrb[14].mxu1 }
 0x301   : > { %v2338_v35 = vadd.f32 %v2332_v34, %v2174_v29  ;;  %v4432_v36 = vpop.f32.mrb[15].mxu1  ;;  %v3091_v34 = vld [vmem:[#allocation12 + $0xc] sm:$0xf] }
 0x306   : > { %v2496_v40 = vpop.f32.mrb[16].mxu1 }
 0x307   : > { %v2502_v43 = vadd.f32 %v2496_v40, %v2338_v35  ;;  %v4437_v46 = vpop.f32.mrb[17].mxu1 }
 0x309   : > { %v2510_v47 = vadd.f32 %v2506_v41, %v2502_v43 }
 0x30b   : > { %v2513_v49 = vmax.f32 %v2510_v47, 0.0  ;;  %v2425_v50 = vpop.f32.mrb[0].mxu0 }
 0x30c   : > { %v2508_v0 = vadd.f32 %v2506_v41, %v2425_v50  ;;  %v2427_v53 = vpop.f32.mrb[1].mxu0 }
 0x30d   : > { %v2577_v54 = vsel %vm2568_vm1, %v2513_v49, 0.0  ;;  %v2509_v55 = vadd.f32 %v2506_v41, %v2427_v53  ;;  %vm2609_vm1 = vcmask 1043456  }
 0x30e   : > { %2583 = vst [vmem:[#allocation3 + $0xc] sm:$0xf] %v2577_v54  ;;  %v2511_v56 = vmax.f32 %v2508_v0, 0.0  ;;  %v3423_v0 = vld [vmem:[#allocation12 + $0x14] sm:$0xf] }
 0x30f   : > { %v2512_v57 = vmax.f32 %v2509_v55, 0.0 }
 0x310   : > { %v2575_v58 = vsel %vm2566_vm7, %v2511_v56, 0.0 }
 0x311   : > { %v2576_v59 = vsel %vm2567_vm4, %v2512_v57, 0.0 }
 0x312   : > { %v5725_v60 = vcombine.low %v2575_v58, %v2576_v59  ;;  %v4665_v3 = vcombine.low %v2576_v59, %v2576_v59  ;;  %v3595_v59 = vld [vmem:[#allocation12 + $0x18] sm:$0xf] }
 0x314   : > { %2582 = vst [vmem:[#allocation3 + $0x4] sm:$0xff] %v5725_v60 }
 0x315   : > { %v3425_v1 = vld [vmem:[#allocation3 + $0xc] sm:$0xff] }
 0x316   : > { %v3429_v4 = vcombine.high %v3425_v1, %v3425_v1  ;;  %v3265_v49 = vld [vmem:[#allocation3 + $0xc] sm:$0xf] }
 0x31b   : > { %v2587_v61 = vld [vmem:[#allocation3 + $0x8] sm:$0xff]  ;;  %v2586_v62 = vld [vmem:[#allocation3] sm:$0xff] }
 0x31c   : > { %2598 = vrot.lane.b32.xlu1 %v2587_v61, %s4936_s17  ;;  %v2592_v63 = vcombine.high %v2586_v62, %v2586_v62  ;;  %v2925_v2 = vcombine.high %v2587_v61, %v2587_v61 }
 0x31e   : > { %2596 = vrot.lane.b32.xlu0 %v2592_v63, %s4936_s17 }
 0x320   : > { %2759 = vrot.lane.b32.xlu1 %v2592_v63, %s4964_s20 }
 0x322   : > { %2594 = vrot.lane.b32.xlu0 %v2586_v62, %s4936_s17 }
 0x324   : > { %2757 = vrot.lane.b32.xlu1 %v2586_v62, %s4964_s20 }
 0x326   : > { %2761 = vrot.lane.b32.xlu0 %v2587_v61, %s4964_s20 }
 0x328   : > { %2930 = vrot.lane.b32.xlu1 %v2587_v61, %s4937_s7 }
 0x32a   : > { %2928 = vrot.lane.b32.xlu0 %v2592_v63, %s4937_s7 }
 0x32c   : > { %3100 = vrot.lane.b32.xlu1 %v2592_v63, %s4966_s16 }
 0x32e   : > { %2926 = vrot.lane.b32.xlu0 %v2586_v62, %s4937_s7 }
 0x330   : > { %3098 = vrot.lane.b32.xlu1 %v2586_v62, %s4966_s16 }
 0x332   : > { %3102 = vrot.lane.b32.xlu0 %v2587_v61, %s4966_s16 }
 0x334   : > { %3434 = vrot.lane.b32.xlu1 %v3425_v1, %s4933_s27 }
 0x336   : > { %3430 = vrot.lane.b32.xlu0 %v5725_v60, %s4933_s27 }
 0x338   : > { %2763 = vrot.lane.b32.xlu1 %v2925_v2, %s4964_s20 }
 0x33a   : > { %2600 = vrot.lane.b32.xlu0 %v2925_v2, %s4936_s17 }
 0x33c   : > { %3602 = vrot.lane.b32.xlu1 %v5725_v60, %s4967_s9 }
 0x33e   : > { %3432 = vrot.lane.b32.xlu0 %v4665_v3, %s4933_s27 }
 0x340   : > { %2932 = vrot.lane.b32.xlu1 %v2925_v2, %s4937_s7  ;;  %s4525_s7 = smul.u32 192, %s5026_s25  ;;  %s4969_s25 = smov [#allocation15]  }
 0x341   : > { %s4842_s15 = sshll.u32 %s4969_s25, 4  ;;  %s4843_s15 = int_to_ptr.vmem [resolvable:$false] %s4842_s15 }
 0x342   : > { %3606 = vrot.lane.b32.xlu0 %v3425_v1, %s4967_s9  ;;  %s5871_s19 = scalar_lea.hbm %s5921_s6, %s4525_s7  ;;  %s4844_s0 = scalar_lea.vmem %s4843_s15, 384 }
 0x344   : > { %3604 = vrot.lane.b32.xlu1 %v4665_v3, %s4967_s9 }
 0x346   : > { %3104 = vrot.lane.b32.xlu0 %v2925_v2, %s4966_s16  ;;  %v3767_v2 = vld [vmem:[#allocation12 + $0x1c] sm:$0xf] }
 0x348   : > { %3774 = vrot.lane.b32.xlu1 %v5725_v60, %s4962_s10 }
 0x34a   : > { %3436 = vrot.lane.b32.xlu0 %v3429_v4, %s4933_s27  ;;  %s4518_s27 = smul.u32 12, %s5269_s4 }
 0x34c   : > { %3776 = vrot.lane.b32.xlu1 %v4665_v3, %s4962_s10  ;;  %s363_s17 = scalar_lea.vmem [#allocation15], %s4518_s27 }
 0x34d   : > { %s4142_s26 = sshll.u32 %s363_s17, 4  ;;  %s5873_s26 = int_to_ptr.vmem [resolvable:$true] %s4142_s26 }
 0x34e   : > { %3778 = vrot.lane.b32.xlu0 %v3425_v1, %s4962_s10  ;;  %s4838_s14 = scalar_lea.vmem %s5873_s26, 192  ;;  %p4845_p3 = scmp.lt.s32.totalorder %s5873_s26, %s4843_s15 }
 0x34f   : > { %p4839_p0 = scmp.ne.s32.totalorder %s5873_s26, %s4838_s14  ;;  %p4846_p5 = scmp.lt.s32.totalorder %s4844_s0, %s4838_s14 }
 0x350   : > { %3780 = vrot.lane.b32.xlu1 %v3429_v4, %s4962_s10 }
 0x351   : > { %p4840_p4 = pnand %p4839_p0, %p5170_p10  ;;  %p4847_p9 = por %p4846_p5, %p4845_p3 }
 0x352   : > { %3608 = vrot.lane.b32.xlu0 %v3429_v4, %s4967_s9 }
 0x353   : > { %p4841_p6 = pneg %p4840_p4 }
 0x354   : > { %3950 = vrot.lane.b32.xlu1 %v3425_v1, %s4963_s12 }
 0x355   : > { %p4848_p8 = pnand %p4847_p9, %p4841_p6 }
 0x356   : > { %3948 = vrot.lane.b32.xlu0 %v4665_v3, %s4963_s12 }
 0x358   : > { %3952 = vrot.lane.b32.xlu1 %v3429_v4, %s4963_s12 }
 0x35a   : > { %3946 = vrot.lane.b32.xlu0 %v5725_v60, %s4963_s12 }
 0x35e   : > { %4112 = vperm.xlu0 %4660, %v2584_v5  }
 0x38e   : > { %v2599_v6 = vpop.permute.xlu1 %2598 }
 0x390   : > { %v2597_v7 = vpop.permute.xlu0 %2596 }
 0x391   : > { %v2603_v8 = vsel %vm1052_vm12, %v2597_v7, %v2599_v6 }
 0x392   : > { %v2760_v9 = vpop.permute.xlu1 %2759  ;;  %4308 = vmatprep.subr.msk.mxu0 %vm2609_vm1, %v2603_v8 }
 0x394   : > { %v2595_v10 = vpop.permute.xlu0 %2594 }
 0x395   : > { %v2602_v12 = vsel %vm1052_vm12, %v2595_v10, %v2597_v7  ;;  %v3939_v7 = vld [vmem:[#allocation12 + $0x20] sm:$0xf] }
 0x396   : > { %v2758_v13 = vpop.permute.xlu1 %2757  ;;  %4309 = vmatpush1.msk.msra.mxu0 %vm2609_vm1, %v2602_v12 }
 0x397   : > { %4310 = vmatmul.mubr.msk.f32.vlgmr.msra.gmra.mrb[2].mxu0 %vm2605_vm2, %v2589_v11  ;;  %v2765_v16 = vsel %vm1211_vm13, %v2758_v13, %v2760_v9 }
 0x398   : > { %v2762_v14 = vpop.permute.xlu0 %2761  ;;  %2841 = vmatprep.mubr.f32.mxu0 %v5569_v52 }
 0x399   : > { %v2766_v15 = vsel %vm1211_vm13, %v2760_v9, %v2762_v14 }
 0x39a   : > { %v2931_v17 = vpop.permute.xlu1 %2930  ;;  %4313 = vmatprep.subr.msk.mxu0 %vm2609_vm1, %v2766_v15 }
 0x39b   : > { %4314 = vmatpush1.msk.msra.mxu0 %vm2609_vm1, %v2765_v16 }
 0x39c   : > { %v2929_v18 = vpop.permute.xlu0 %2928 }
 0x39d   : > { %v2935_v20 = vsel %vm1372_vm14, %v2929_v18, %v2931_v17 }
 0x39e   : > { %v3101_v21 = vpop.permute.xlu1 %3100  ;;  %4318 = vmatprep.subr.msk.mxu0 %vm2609_vm1, %v2935_v20 }
 0x39f   : > { %4315 = vmatmul.mubr.msk.f32.vlgmr.msra.gmra.mrb[2].mxu0 %vm2605_vm2, %v2585_v19 }
 0x3a0   : > { %v2927_v22 = vpop.permute.xlu0 %2926  ;;  %3010 = vmatprep.mubr.f32.mxu0 %v5569_v52 }
 0x3a1   : > { %v2934_v23 = vsel %vm1372_vm14, %v2927_v22, %v2929_v18 }
 0x3a2   : > { %v3099_v24 = vpop.permute.xlu1 %3098  ;;  %4319 = vmatpush1.msk.msra.mxu0 %vm2609_vm1, %v2934_v23 }
 0x3a3   : > { %v3106_v29 = vsel %vm1536_vm15, %v3099_v24, %v3101_v21 }
 0x3a4   : > { %v3103_v25 = vpop.permute.xlu0 %3102 }
 0x3a5   : > { %v3107_v27 = vsel %vm1536_vm15, %v3101_v21, %v3103_v25 }
 0x3a6   : > { %v3435_v28 = vpop.permute.xlu1 %3434  ;;  %4323 = vmatprep.subr.msk.mxu0 %vm2609_vm1, %v3107_v27 }
 0x3a7   : > { %4320 = vmatmul.mubr.msk.f32.vlgmr.msra.gmra.mrb[2].mxu0 %vm2605_vm2, %v2919_v26 }
 0x3a8   : > { %4324 = vmatpush1.msk.msra.mxu0 %vm2609_vm1, %v3106_v29  ;;  %v3431_v30 = vpop.permute.xlu0 %3430  ;;  %3182 = vmatprep.mubr.f32.mxu0 %v5569_v52 }
 0x3a9   : > { %4328 = vmatprep.subr.msk.mxu0 %vm2609_vm1, %v4665_v3 }
 0x3aa   : > { %v2764_v31 = vpop.permute.xlu1 %2763 }
 0x3ab   : > { %v2767_v36 = vsel %vm1211_vm13, %v2762_v14, %v2764_v31 }
 0x3ac   : > { %v2601_v32 = vpop.permute.xlu0 %2600 }
 0x3ad   : > { %v2604_v33 = vsel %vm1052_vm12, %v2599_v6, %v2601_v32  ;;  %vm5953_vm12 = vcmask 859136  }
 0x3ae   : > { %v3603_v35 = vpop.permute.xlu1 %3602  ;;  %4439 = vmatpush3.msk.msra.mxu1 %vm2609_vm1, %v2604_v33  ;;  %vm5954_vm13 = vmmov %vm5953_vm12 }
 0x3af   : > { %4441 = vmatmul.mubr.msk.f32.vlgmr.msra.gmra.mrb[18].mxu1 %vm2605_vm2, %v2589_v11  ;;  %4443 = vmatprep.subr.mxu1 %v5569_v52 }
 0x3b0   : > { %4325 = vmatmul.mubr.msk.f32.vlgmr.msra.gmra.mrb[2].mxu0 %vm2605_vm2, %v3091_v34  ;;  %4444 = vmatpush3.msk.msra.mxu1 %vm2609_vm1, %v2767_v36  ;;  %v3433_v37 = vpop.permute.xlu0 %3432 }
 0x3b1   : > { %4329 = vmatpush1.msk.msra.mxu0 %vm2609_vm1, %v5725_v60  ;;  %v3439_v38 = vsel %vm1857_vm0, %v3433_v37, %v3435_v28  ;;  %4445 = vmatprep.mubr.msk.f32.mxu1 %vm4965_vm11, %v5569_v52  ;;  %v3438_v45 = vsel %vm1857_vm0, %v3431_v30, %v3433_v37 }
 0x3b2   : > { %v2933_v39 = vpop.permute.xlu1 %2932  ;;  %4333 = vmatprep.subr.msk.mxu0 %vm2609_vm1, %v3439_v38  ;;  %4448 = vmatprep.subr.mxu1 %v5569_v52 }
 0x3b3   : > { %v2936_v40 = vsel %vm1372_vm14, %v2931_v17, %v2933_v39  ;;  %4446 = vmatmul.mubr.msk.f32.vlgmr.msra.gmra.mrb[20].mxu1 %vm2605_vm2, %v2585_v19  ;;  %3342 = vmatprep.mubr.f32.mxu0 %v5569_v52  ;;  %vm5955_vm14 = vcmask 850944  }
 0x3b4   : > { %4449 = vmatpush3.msk.msra.mxu1 %vm2609_vm1, %v2936_v40  ;;  %v3607_v41 = vpop.permute.xlu0 %3606  ;;  %4450 = vmatprep.mubr.msk.f32.mxu1 %vm4965_vm11, %v5569_v52 }
 0x3b5   : > { %4453 = vmatprep.subr.mxu1 %v5569_v52 }
 0x3b6   : > { %v3605_v43 = vpop.permute.xlu1 %3604 }
 0x3b7   : > { %v3611_v44 = vsel %vm5953_vm12, %v3605_v43, %v3607_v41  ;;  %4451 = vmatmul.mubr.msk.f32.vlgmr.msra.gmra.mrb[22].mxu1 %vm2605_vm2, %v2919_v26  ;;  %v3610_v54 = vsel %vm5954_vm13, %v3603_v35, %v3605_v43 }
 0x3b8   : > { %4330 = vmatmul.mubr.msk.f32.vlgmr.msra.gmra.mrb[2].mxu0 %vm2605_vm2, %v3263_v42  ;;  %v3105_v46 = vpop.permute.xlu0 %3104  ;;  %4455 = vmatprep.mubr.msk.f32.mxu1 %vm4965_vm11, %v5569_v52 }
 0x3b9   : > { %4334 = vmatpush1.msk.msra.mxu0 %vm2609_vm1, %v3438_v45  ;;  %v3108_v47 = vsel %vm1536_vm15, %v3103_v25, %v3105_v46  ;;  %3514 = vmatprep.mubr.f32.mxu0 %v5569_v52  ;;  %vm5956_vm15 = vmmov %vm5953_vm12 }
 0x3ba   : > { %4338 = vmatprep.subr.msk.mxu0 %vm2609_vm1, %v3611_v44  ;;  %v3775_v48 = vpop.permute.xlu1 %3774  ;;  %4454 = vmatpush3.msk.msra.mxu1 %vm2609_vm1, %v3108_v47 }
 0x3bb   : > { %4456 = vmatmul.mubr.msk.f32.vlgmr.msra.gmra.mrb[24].mxu1 %vm2605_vm2, %v3091_v34  ;;  %4458 = vmatprep.subr.mxu1 %v5569_v52 }
 0x3bc   : > { %4459 = vmatpush3.msk.msra.mxu1 %vm2609_vm1, %v3265_v49  ;;  %v3437_v50 = vpop.permute.xlu0 %3436  ;;  %4460 = vmatprep.mubr.msk.f32.mxu1 %vm4965_vm11, %v5569_v52 }
 0x3bd   : > { %v3440_v51 = vsel %vm1857_vm0, %v3435_v28, %v3437_v50  ;;  %4463 = vmatprep.subr.mxu1 %v5569_v52  ;;  %vm5957_vm0 = vmmov %vm5955_vm14 }
 0x3be   : > { %v3777_v53 = vpop.permute.xlu1 %3776  ;;  %vm5958_vm3 = vmmov %vm5957_vm0 }
 0x3bf   : > { %4461 = vmatmul.mubr.msk.f32.vlgmr.msra.gmra.mrb[26].mxu1 %vm2605_vm2, %v3263_v42  ;;  %v3782_v63 = vsel %vm5958_vm3, %v3775_v48, %v3777_v53 }
 0x3c0   : > { %4335 = vmatmul.mubr.msk.f32.vlgmr.msra.gmra.mrb[2].mxu0 %vm2605_vm2, %v3423_v0  ;;  %4464 = vmatpush3.msk.msra.mxu1 %vm2609_vm1, %v3440_v51  ;;  %v3779_v55 = vpop.permute.xlu0 %3778 }
 0x3c1   : > { %4339 = vmatpush1.msk.msra.mxu0 %vm2609_vm1, %v3610_v54  ;;  %v3783_v56 = vsel %vm5955_vm14, %v3777_v53, %v3779_v55  ;;  %4465 = vmatprep.mubr.msk.f32.mxu1 %vm4965_vm11, %v5569_v52 }
 0x3c2   : > { %v3781_v57 = vpop.permute.xlu1 %3780  ;;  %4343 = vmatprep.subr.msk.mxu0 %vm2609_vm1, %v3783_v56  ;;  %4468 = vmatprep.subr.mxu1 %v5569_v52 }
 0x3c3   : > { %4466 = vmatmul.mubr.msk.f32.vlgmr.msra.gmra.mrb[28].mxu1 %vm2605_vm2, %v3423_v0  ;;  %3686 = vmatprep.mubr.f32.mxu0 %v5569_v52  ;;  %v3784_v62 = vsel %vm5957_vm0, %v3779_v55, %v3781_v57 }
 0x3c4   : > { %v3609_v58 = vpop.permute.xlu0 %3608  ;;  %4470 = vmatprep.mubr.msk.f32.mxu1 %vm4965_vm11, %v5569_v52 }
 0x3c5   : > { %v3612_v60 = vsel %vm5956_vm15, %v3607_v41, %v3609_v58 }
 0x3c6   : > { %v3951_v61 = vpop.permute.xlu1 %3950  ;;  %4469 = vmatpush3.msk.msra.mxu1 %vm2609_vm1, %v3612_v60 }
 0x3c7   : > { %4471 = vmatmul.mubr.msk.f32.vlgmr.msra.gmra.mrb[30].mxu1 %vm2605_vm2, %v3595_v59  ;;  %4473 = vmatprep.subr.mxu1 %v5569_v52 }
 0x3c8   : > { %4340 = vmatmul.mubr.msk.f32.vlgmr.msra.gmra.mrb[2].mxu0 %vm2605_vm2, %v3595_v59  ;;  %4474 = vmatpush3.msk.msra.mxu1 %vm2609_vm1, %v3784_v62  ;;  %v3949_v1 = vpop.permute.xlu0 %3948 }
 0x3c9   : > { %4344 = vmatpush1.msk.msra.mxu0 %vm2609_vm1, %v3782_v63  ;;  %v3955_v3 = vsel %vm5959_vm5, %v3949_v1, %v3951_v61  ;;  %4475 = vmatprep.mubr.msk.f32.mxu1 %vm4965_vm11, %v5569_v52 }
 0x3ca   : > { %v3953_v4 = vpop.permute.xlu1 %3952  ;;  %4348 = vmatprep.subr.msk.mxu0 %vm2609_vm1, %v3955_v3  ;;  %4478 = vmatprep.subr.mxu1 %v5569_v52 }
 0x3cb   : > { %v3956_v5 = vsel %vm5960_vm6, %v3951_v61, %v3953_v4  ;;  %4476 = vmatmul.mubr.msk.f32.vlgmr.msra.gmra.mrb[32].mxu1 %vm2605_vm2, %v3767_v2  ;;  %3858 = vmatprep.mubr.f32.mxu0 %v5569_v52 }
 0x3cc   : > { %4479 = vmatpush3.msk.msra.mxu1 %vm2609_vm1, %v3956_v5  ;;  %v3947_v6 = vpop.permute.xlu0 %3946  ;;  %4480 = vmatprep.mubr.msk.f32.mxu1 %vm4965_vm11, %v5569_v52 }
 0x3cd   : > { %v3954_v8 = vsel %vm5961_vm8, %v3947_v6, %v3949_v1 }
 0x3cf   : > { %4481 = vmatmul.mubr.msk.f32.vlgmr.msra.gmra.mrb[34].mxu1 %vm2605_vm2, %v3939_v7 }
 0x3d0   : > { %4345 = vmatmul.mubr.msk.f32.vlgmr.msra.gmra.mrb[2].mxu0 %vm2605_vm2, %v3767_v2 }
 0x3d1   : > { %4349 = vmatpush1.msk.msra.mxu0 %vm2609_vm1, %v3954_v8  ;;  %4030 = vmatprep.mubr.f32.mxu0 %v5569_v52 }
 0x3d8   : > { %4350 = vmatmul.mubr.msk.f32.vlgmr.msra.gmra.mrb[2].mxu0 %vm2605_vm2, %v3939_v7 }
 0x3dd   : > { %v4113_v32 = vpop.permute.xlu0 %4112 }
 0x482   : > { %v2753_v9 = vpop.f32.mrb[18].mxu1 }
 0x483   : > { %v4442_v10 = vpop.f32.mrb[19].mxu1 }
 0x486   : > { %v2914_v11 = vpop.f32.mrb[20].mxu1 }
 0x487   : > { %v2915_v12 = vadd.f32 %v2914_v11, %v2753_v9  ;;  %v4447_v13 = vpop.f32.mrb[21].mxu1 }
 0x48a   : > { %v3083_v14 = vpop.f32.mrb[22].mxu1 }
 0x48b   : > { %v3089_v15 = vadd.f32 %v3083_v14, %v2915_v12  ;;  %v4452_v16 = vpop.f32.mrb[23].mxu1 }
 0x48e   : > { %v3255_v17 = vpop.f32.mrb[24].mxu1 }
 0x48f   : > { %v3261_v18 = vadd.f32 %v3255_v17, %v3089_v15  ;;  %v4457_v19 = vpop.f32.mrb[25].mxu1 }
 0x492   : > { %v3415_v20 = vpop.f32.mrb[26].mxu1 }
 0x493   : > { %v3421_v21 = vadd.f32 %v3415_v20, %v3261_v18  ;;  %v4462_v22 = vpop.f32.mrb[27].mxu1 }
 0x496   : > { %v3587_v23 = vpop.f32.mrb[28].mxu1 }
 0x497   : > { %v3593_v24 = vadd.f32 %v3587_v23, %v3421_v21  ;;  %v4467_v52 = vpop.f32.mrb[29].mxu1 }
 0x49a   : > { %v3759_v25 = vpop.f32.mrb[30].mxu1 }
 0x49b   : > { %v3765_v26 = vadd.f32 %v3759_v25, %v3593_v24  ;;  %v4472_v27 = vpop.f32.mrb[31].mxu1 }
 0x49e   : > { %v3931_v28 = vpop.f32.mrb[32].mxu1 }
 0x49f   : > { %v3937_v29 = vadd.f32 %v3931_v28, %v3765_v26  ;;  %v4477_v30 = vpop.f32.mrb[33].mxu1 }
 0x4a2   : > { %v4103_v31 = vpop.f32.mrb[34].mxu1 }
 0x4a3   : > { %v4109_v33 = vadd.f32 %v4103_v31, %v3937_v29  ;;  %v4482_v34 = vpop.f32.mrb[35].mxu1 }
 0x4a5   : > { %v4117_v35 = vadd.f32 %v4113_v32, %v4109_v33 }
 0x4a7   : > { %v4120_v36 = vmax.f32 %v4117_v35, 0.0 }
 0x4a9   : > { %4126 = vst [vmem:[%s363_s17 + $0x8] sm:$0xf] %v4120_v36 }
 0x4ab   : > { %v4032_v37 = vpop.f32.mrb[2].mxu0 }
 0x4ac   : > { %v4115_v38 = vadd.f32 %v4113_v32, %v4032_v37  ;;  %v4034_v39 = vpop.f32.mrb[3].mxu0 }
 0x4ad   : > { %v4116_v40 = vadd.f32 %v4113_v32, %v4034_v39 }
 0x4ae   : > { %v4118_v41 = vmax.f32 %v4115_v38, 0.0 }
 0x4af   : > { %v4119_v42 = vmax.f32 %v4116_v40, 0.0 }
 0x4b1   : > { %v4123_v43 = vcombine.low %v4118_v41, %v4119_v42 }
 0x4b3   : > { %4125 = vst [vmem:[%s363_s17] sm:$0xff] %v4123_v43 }
 0x4b4   : > { %4851 = shalt.err (!%p4848_p8)
}
 0x4b5   : > { %s4852_s4 = scalar_lea.hbm %s5871_s19, 192  ;;  %s4856_s10 = scalar_lea.hbm %s5921_s6, 384 }
 0x4b6   : > { %p4853_p11 = scmp.ne.s32.totalorder %s5871_s19, %s4852_s4  ;;  %p4857_p1 = scmp.lt.u32.totalorder %s5871_s19, %s5921_s6 }
 0x4b7   : > { %p4858_p2 = scmp.lt.u32.totalorder %s4856_s10, %s4852_s4  ;;  %p4860_p0 = scmp.lt.u32.totalorder %s4852_s4, %s5871_s19 }
 0x4b8   : > { %p4854_p7 = pnand %p4853_p11, %p5170_p10 }
 0x4b9   : > { %p4859_p13 = por %p4858_p2, %p4857_p1 }
 0x4ba   : > { %p4855_p12 = pneg %p4854_p7 }
 0x4bb   : > { %p4861_p4 = por %p4860_p0, %p4859_p13 }
 0x4bd   : > { %p4862_p6 = pnand %p4861_p4, %p4855_p12 }
 0x4bf   : > { %4865 = shalt.err (!%p4862_p6)
}
 0x4c0   : > { %4546 = dma.vmem_to_hbm [thread:$0]  (%p5170_p10), %s5873_s26, 192, %s5871_s19, %s4128_s8  }
 0x4c1 PF: > { %s4154_s16 = sand.u32 1, %s4908_s21   ;;  %p5962_p3 = scmp.ne.s32.totalorder %s5933_s28, 0 }
 0x4c2   : > { %p5963_p5 = scmp.ge.s32.totalorder %s4920_s24, 2  ;;  %s4155_s9 = scalar_lea.sflag [#allocation6], %s4154_s16 }
 0x4c4   : > { %p4569_p9 = pnand %p5963_p5, %p5962_p3 }
 0x4c6   : > { %4903 = dma.done.wait (!%p4569_p9), %s4155_s9, 192  }
 0x4c7   : > { %4905 = vsyncadd (!%p4569_p9), %s4155_s9, 4294967104  ;;  %p24_p8 = scmp.ge.s32.totalorder %s5160_s18, 4   ;;  %s5964_s21 = smov %s4912_s22 }
 0x4c8   : > { %s5965_s22 = smov %s4916_s23  ;;  %s5966_s23 = smov %s5176_s13 }
 0x4c9   : > { %s5967_s24 = smov %s5160_s18  ;;  %26 = sbr.rel (!%p24_p8) target bundleno = 14 (0xe), region = 134 }
 0x4d0   :  { %4160 = vsyncpa [#allocation5], 1 }
 0x4d1   :  { %4162 = vsyncpa [#allocation5 + $0x1], 1 }
 0x4d2   :  { %4163 = vsyncpa [#allocation8], 1 }
 0x4d3   :  { %4165 = vsyncpa [#allocation8 + $0x1], 1 }
 0x4d4   :  { %4166 = vsyncpa [#allocation11], 1 }
 0x4d5   :  { %4167 = vsyncpa [#allocation14], 1 }
 0x4d6   :  { %4168 = vsyncpa [#allocation6], 1 }
 0x4d7   :  { %4170 = vsyncpa [#allocation6 + $0x1], 1 }

</bundles_post_ra>
